<compile_context>
chip_gen: v5e
topology: v5e:2x2
jax: 0.10.0
libtpu: 0.0.40
codegen_flags: <defaults>
</compile_context>

<pallas_src>
import numpy as np
import jax
import jax.numpy as jnp
from jax import lax
from jax.experimental import pallas as pl
from jax.experimental.pallas import tpu as pltpu


def _round_up(v, m):
    return (v + m - 1) // m * m


# ---------------------------------------------------------------------------
# fused per-block kernel (one grid step = `bb` images stacked on sublanes)
# ---------------------------------------------------------------------------
def _lenet_kernel(xw_ref, k1_ref, k2_ref,
                  wfc1_ref, bfc1_ref, wfc2_ref, bfc2_ref, wfc3_ref, bfc3_ref,
                  o_ref):
    f32 = jnp.float32
    bf16 = jnp.bfloat16
    bb = o_ref.shape[0]                       # images per grid step (static)

    # ---- conv1 (1->32, k=5): ONE MXU matmul --------------------------------
    # lhs rows are h-major / image-minor (row = h*bb + b); lanes are the 5
    # kernel-row windows concatenated (i*28 + w_in).  Weight columns are
    # parity*384 + a*32 + c (even / odd output columns merged along N).
    y1 = jnp.dot(xw_ref[0], k1_ref[...], preferred_element_type=f32)   # (24bb, 768)

    # ---- 2x2 max-pool of conv1 (+ ReLU) -------------------------------------
    # w-direction: even/odd output columns are the two 384-lane halves.
    p1 = jnp.maximum(y1[:, 0:384], y1[:, 384:768])                     # (24bb, 384)
    # h-direction: rows are h-major, so row pairs are adjacent bb-row slabs.
    rows = []
    for a in range(12):
        ev = p1[(2 * a) * bb:(2 * a + 1) * bb, :]
        od = p1[(2 * a + 1) * bb:(2 * a + 2) * bb, :]
        rows.append(jnp.maximum(ev, od))
    x2 = jnp.maximum(jnp.concatenate(rows, axis=0), 0.0).astype(bf16)  # (12bb, 384)

    # ---- conv2 (32->16, k=5): 5 shifted matmuls, even/odd merged (N=128) ----
    y2 = jnp.zeros((8 * bb, 128), f32)
    for i in range(5):
        a2 = x2[i * bb:(i + 8) * bb, :]                                 # (8bb, 384)
        y2 = y2 + jnp.dot(a2, k2_ref[i], preferred_element_type=f32)

    # ---- 2x2 max-pool of conv2 (+ ReLU) + flatten ----------------------------
    p2 = jnp.maximum(y2[:, 0:64], y2[:, 64:128])                        # (8bb, 64)
    cols = []
    for s in range(4):
        ev = p2[(2 * s) * bb:(2 * s + 1) * bb, :]
        od = p2[(2 * s + 1) * bb:(2 * s + 2) * bb, :]
        cols.append(jnp.maximum(ev, od))
    # flatten to lane order h*64 + w*16 + c; the torch .view(-1,256) permutation
    # is folded into wfc1's rows at init.
    flat = jnp.maximum(jnp.concatenate(cols, axis=-1), 0.0).astype(bf16)  # (bb, 256)

    # ---- fc1 -> ReLU -> fc2 -> ReLU -> fc3 -----------------------------------
    f1 = jnp.maximum(
        jnp.dot(flat, wfc1_ref[...], preferred_element_type=f32) + bfc1_ref[...], 0.0)
    f2 = jnp.maximum(
        jnp.dot(f1.astype(bf16), wfc2_ref[...], preferred_element_type=f32)
        + bfc2_ref[...], 0.0)
    f3 = jnp.dot(f2.astype(bf16), wfc3_ref[...], preferred_element_type=f32) \
        + bfc3_ref[...]
    o_ref[...] = f3.astype(o_ref.dtype)                                  # (bb, 10)


# ---------------------------------------------------------------------------
# wrapper
# ---------------------------------------------------------------------------
_WEIGHT_ORDER = ["k1", "k2", "wfc1", "bfc1", "wfc2", "bfc2", "wfc3", "bfc3"]


def _conv1_lhs(x, bb):
    """(n_pad,1,28,28) f32 -> (n_blocks, 24*bb, 140) bf16 conv1 lhs.

    Row = h_out*bb + local_image, lane = kernel_row*28 + w_in.  All the layout
    plumbing (window shifts, batch->h-major transpose) happens here in XLA so
    the kernel body only matmuls.
    """
    n_pad = x.shape[0]
    nblk = n_pad // bb
    xs = x[:, 0]                                                          # (n_pad,28,28)
    win = jnp.concatenate([xs[:, i:i + 24, :] for i in range(5)], axis=-1)  # (n_pad,24,140)
    win = win.reshape(nblk, bb, 24, 140).transpose(0, 2, 1, 3)            # (nblk,24,bb,140)
    return win.reshape(nblk, 24 * bb, 140).astype(jnp.bfloat16)


def lenet_pallas(prep, x, block_b=32):
    # x: (N, 1, 28, 28) float32 NCHW
    n = x.shape[0]
    bb = min(block_b, _round_up(n, 8))         # images per grid step (multiple of 8)
    n_pad = _round_up(n, bb)
    if n_pad != n:
        x = jnp.concatenate(
            [x, jnp.zeros((n_pad - n,) + x.shape[1:], x.dtype)], axis=0)

    xw = _conv1_lhs(x, bb)                      # (nblk, 24*bb, 140) bf16
    nblk = n_pad // bb
    weights = [prep[k] for k in _WEIGHT_ORDER]

    in_specs = [pl.BlockSpec((1, 24 * bb, 140), lambda g: (g, 0, 0))]
    for w in weights:   # full-array blocks, constant index -> loaded once, VMEM-resident
        in_specs.append(pl.BlockSpec(w.shape, lambda g, nd=w.ndim: (0,) * nd))

    out = pl.pallas_call(
        _lenet_kernel,
        out_shape=jax.ShapeDtypeStruct((n_pad, 10), jnp.float32),
        grid=(nblk,),
        in_specs=in_specs,
        out_specs=pl.BlockSpec((bb, 10), lambda g: (g, 0)),
        compiler_params=pltpu.CompilerParams(dimension_semantics=("parallel",)),
    )(xw, *weights)
    return out[:n]


lenet_forward = jax.jit(lenet_pallas)


# ---------------------------------------------------------------------------
# parameters: raw (PyTorch layout) + one-time packing into kernel layout
# ---------------------------------------------------------------------------
def init_raw_params(key):
    ks = jax.random.split(key, 8)
    f32 = jnp.float32
    return {
        # LinearCNNLayer(28, 5, 1, 32, 'normal', False): conv 1->32, k=5, no bias
        "conv1_w": 0.1 * jax.random.normal(ks[0], (32, 1, 5, 5), f32),
        # LinearCNNLayer(12, 5, 32, 16, 'normal', False): conv 32->16, k=5, no bias
        "conv2_w": 0.1 * jax.random.normal(ks[1], (16, 32, 5, 5), f32),
        "fc1_w": 0.1 * jax.random.normal(ks[2], (64, 16 * 4 * 4), f32),
        "fc1_b": 0.01 * jax.random.normal(ks[3], (64,), f32),
        "fc2_w": 0.1 * jax.random.normal(ks[4], (32, 64), f32),
        "fc2_b": 0.01 * jax.random.normal(ks[5], (32,), f32),
        "fc3_w": 0.1 * jax.random.normal(ks[6], (10, 32), f32),
        "fc3_b": 0.01 * jax.random.normal(ks[7], (10,), f32),
    }


def prepare_params(raw):
    """One-time host-side packing of PyTorch-layout weights into kernel layout."""
    w1 = np.asarray(raw["conv1_w"], np.float32)       # (32, 1, 5, 5)
    w2 = np.asarray(raw["conv2_w"], np.float32)       # (16, 32, 5, 5)

    # conv1: width-expanded, kernel rows folded into K, even/odd output columns
    # merged along N.  k1[i*28 + w_in, parity*384 + a*32 + c] = w1[c,0,i,j].
    k1 = np.zeros((5, 28, 768), np.float32)
    for i in range(5):
        for a in range(12):
            for j in range(5):
                k1[i, 2 * a + j, a * 32:(a + 1) * 32] = w1[:, 0, i, j]              # even
                k1[i, 2 * a + 1 + j, 384 + a * 32:384 + (a + 1) * 32] = w1[:, 0, i, j]  # odd
    k1 = k1.reshape(140, 768)

    # conv2: width-expanded per kernel row, even/odd merged along N (=128).
    # k2[i, w_in*32 + ci, parity*64 + b*16 + co] = w2[co, ci, i, j].
    k2 = np.zeros((5, 384, 128), np.float32)
    for i in range(5):
        for b in range(4):
            for j in range(5):
                k2[i, (2 * b + j) * 32:(2 * b + j + 1) * 32,
                   b * 16:(b + 1) * 16] = w2[:, :, i, j].T                          # even
                k2[i, (2 * b + 1 + j) * 32:(2 * b + 2 + j) * 32,
                   64 + b * 16:64 + (b + 1) * 16] = w2[:, :, i, j].T                # odd

    # fc1: fold the torch NCHW .view(-1, 256) permutation into the rows
    # (kernel flatten order is h*64 + w*16 + c; torch order is c*16 + h*4 + w).
    fc1_w = np.asarray(raw["fc1_w"], np.float32)      # (64, 256)
    wfc1 = np.zeros((256, 64), np.float32)
    for h in range(4):
        for w in range(4):
            for c in range(16):
                wfc1[h * 64 + w * 16 + c, :] = fc1_w[:, c * 16 + h * 4 + w]

    bf16 = jnp.bfloat16
    return {
        "k1": jnp.asarray(k1, bf16),
        "k2": jnp.asarray(k2, bf16),
        "wfc1": jnp.asarray(wfc1, bf16),
        "bfc1": jnp.asarray(np.asarray(raw["fc1_b"], np.float32)[None, :]),
        "wfc2": jnp.asarray(np.asarray(raw["fc2_w"], np.float32).T, bf16),
        "bfc2": jnp.asarray(np.asarray(raw["fc2_b"], np.float32)[None, :]),
        "wfc3": jnp.asarray(np.asarray(raw["fc3_w"], np.float32).T, bf16),
        "bfc3": jnp.asarray(np.asarray(raw["fc3_b"], np.float32)[None, :]),
    }


# ---------------------------------------------------------------------------
# pure-XLA f32 reference (mirrors the PyTorch module) for verification
# ---------------------------------------------------------------------------
def reference_forward(raw, x):
    def conv(v, w):
        return lax.conv_general_dilated(v, w, (1, 1), "VALID",
                                        dimension_numbers=("NCHW", "OIHW", "NCHW"))

    def pool(v):
        return lax.reduce_window(v, -jnp.inf, lax.max,
                                 (1, 1, 2, 2), (1, 1, 2, 2), "VALID")

    o = pool(jnp.maximum(conv(x, raw["conv1_w"]), 0.0))
    o = pool(jnp.maximum(conv(o, raw["conv2_w"]), 0.0))
    o = o.reshape(o.shape[0], -1)                     # == torch .view(-1, 256)
    o = jnp.maximum(o @ raw["fc1_w"].T + raw["fc1_b"], 0.0)
    o = jnp.maximum(o @ raw["fc2_w"].T + raw["fc2_b"], 0.0)
    return o @ raw["fc3_w"].T + raw["fc3_b"]


if __name__ == "__main__":
    key = jax.random.PRNGKey(0)
    pkey, xkey = jax.random.split(key)
    raw = init_raw_params(pkey)
    prep = prepare_params(raw)

    # Spatial math of the module (28 -5+1=24 ->12 -5+1=8 ->4) forces 1x28x28 inputs.
    x = jax.random.normal(xkey, (8, 1, 28, 28), jnp.float32)

    out = lenet_forward(prep, x)
    jax.block_until_ready(out)
    assert out.shape == (8, 10) and out.dtype == jnp.float32

    ref = reference_forward(raw, x)
    # bf16 matmul operands (f32 accumulation) -> allow a few 1e-2 of deviation.
    if not bool(jnp.allclose(out, ref, rtol=5e-2, atol=5e-2)):
        err = float(jnp.max(jnp.abs(out - ref)))
        raise AssertionError(f"Pallas LeNet mismatch vs XLA reference (max abs err {err})")

    print("KERNEL_OK")
</pallas_src>

<mosaic_0001>
module attributes {stable_mosaic.version = 11 : i64} {
  func.func @_lenet_kernel(%arg0: i32, %arg1: memref<1x192x140xbf16, #tpu.memory_space<vmem>>, %arg2: memref<140x768xbf16, #tpu.memory_space<vmem>>, %arg3: memref<5x384x128xbf16, #tpu.memory_space<vmem>>, %arg4: memref<256x64xbf16, #tpu.memory_space<vmem>>, %arg5: memref<1x64xf32, #tpu.memory_space<vmem>>, %arg6: memref<64x32xbf16, #tpu.memory_space<vmem>>, %arg7: memref<1x32xf32, #tpu.memory_space<vmem>>, %arg8: memref<32x10xbf16, #tpu.memory_space<vmem>>, %arg9: memref<1x10xf32, #tpu.memory_space<vmem>>, %arg10: memref<8x10xf32, #tpu.memory_space<vmem>>) attributes {dimension_semantics = [#tpu.dimension_semantics<parallel>], iteration_bounds = array<i64: 1>, scalar_prefetch = 0 : i64, scratch_operands = 0 : i64, tpu.core_type = #tpu.core_type<tc>, window_params = [{transform_indices = @transform_0, window_bounds = array<i64: 1, 192, 140>}, {pipeline_mode = #tpu.pipeline_mode<synchronous>, transform_indices = @transform_1, window_bounds = array<i64: 140, 768>}, {pipeline_mode = #tpu.pipeline_mode<synchronous>, transform_indices = @transform_2, window_bounds = array<i64: 5, 384, 128>}, {pipeline_mode = #tpu.pipeline_mode<synchronous>, transform_indices = @transform_3, window_bounds = array<i64: 256, 64>}, {pipeline_mode = #tpu.pipeline_mode<synchronous>, transform_indices = @transform_4, window_bounds = array<i64: 1, 64>}, {pipeline_mode = #tpu.pipeline_mode<synchronous>, transform_indices = @transform_5, window_bounds = array<i64: 64, 32>}, {pipeline_mode = #tpu.pipeline_mode<synchronous>, transform_indices = @transform_6, window_bounds = array<i64: 1, 32>}, {pipeline_mode = #tpu.pipeline_mode<synchronous>, transform_indices = @transform_7, window_bounds = array<i64: 32, 10>}, {pipeline_mode = #tpu.pipeline_mode<synchronous>, transform_indices = @transform_8, window_bounds = array<i64: 1, 10>}, {transform_indices = @transform_9, window_bounds = array<i64: 8, 10>}]} {
    %c0 = arith.constant 0 : index
    %c0_0 = arith.constant 0 : index
    %c0_1 = arith.constant 0 : index
    %0 = vector.load %arg1[%c0, %c0_0, %c0_1] : memref<1x192x140xbf16, #tpu.memory_space<vmem>>, vector<1x192x140xbf16>
    %1 = vector.shape_cast %0 : vector<1x192x140xbf16> to vector<192x140xbf16>
    %c0_2 = arith.constant 0 : index
    %c0_3 = arith.constant 0 : index
    %2 = vector.load %arg2[%c0_2, %c0_3] : memref<140x768xbf16, #tpu.memory_space<vmem>>, vector<140x768xbf16>
    %cst = arith.constant dense<0.000000e+00> : vector<192x768xf32>
    %3 = tpu.matmul %1, %2, %cst {dimension_numbers = #tpu.dot_dimension_numbers<[1], [0], [0], [1], [0, 0, 1, 1], [], []>} : vector<192x140xbf16>, vector<140x768xbf16>, vector<192x768xf32> -> vector<192x768xf32>
    %4 = vector.extract_strided_slice %3 {offsets = [0, 0], sizes = [192, 384], strides = [1, 1]} : vector<192x768xf32> to vector<192x384xf32>
    %5 = vector.extract_strided_slice %3 {offsets = [0, 384], sizes = [192, 384], strides = [1, 1]} : vector<192x768xf32> to vector<192x384xf32>
    %6 = arith.maximumf %4, %5 : vector<192x384xf32>
    %7 = vector.extract_strided_slice %6 {offsets = [0, 0], sizes = [8, 384], strides = [1, 1]} : vector<192x384xf32> to vector<8x384xf32>
    %8 = vector.extract_strided_slice %6 {offsets = [8, 0], sizes = [8, 384], strides = [1, 1]} : vector<192x384xf32> to vector<8x384xf32>
    %9 = arith.maximumf %7, %8 : vector<8x384xf32>
    %10 = vector.extract_strided_slice %6 {offsets = [16, 0], sizes = [8, 384], strides = [1, 1]} : vector<192x384xf32> to vector<8x384xf32>
    %11 = vector.extract_strided_slice %6 {offsets = [24, 0], sizes = [8, 384], strides = [1, 1]} : vector<192x384xf32> to vector<8x384xf32>
    %12 = arith.maximumf %10, %11 : vector<8x384xf32>
    %13 = vector.extract_strided_slice %6 {offsets = [32, 0], sizes = [8, 384], strides = [1, 1]} : vector<192x384xf32> to vector<8x384xf32>
    %14 = vector.extract_strided_slice %6 {offsets = [40, 0], sizes = [8, 384], strides = [1, 1]} : vector<192x384xf32> to vector<8x384xf32>
    %15 = arith.maximumf %13, %14 : vector<8x384xf32>
    %16 = vector.extract_strided_slice %6 {offsets = [48, 0], sizes = [8, 384], strides = [1, 1]} : vector<192x384xf32> to vector<8x384xf32>
    %17 = vector.extract_strided_slice %6 {offsets = [56, 0], sizes = [8, 384], strides = [1, 1]} : vector<192x384xf32> to vector<8x384xf32>
    %18 = arith.maximumf %16, %17 : vector<8x384xf32>
    %19 = vector.extract_strided_slice %6 {offsets = [64, 0], sizes = [8, 384], strides = [1, 1]} : vector<192x384xf32> to vector<8x384xf32>
    %20 = vector.extract_strided_slice %6 {offsets = [72, 0], sizes = [8, 384], strides = [1, 1]} : vector<192x384xf32> to vector<8x384xf32>
    %21 = arith.maximumf %19, %20 : vector<8x384xf32>
    %22 = vector.extract_strided_slice %6 {offsets = [80, 0], sizes = [8, 384], strides = [1, 1]} : vector<192x384xf32> to vector<8x384xf32>
    %23 = vector.extract_strided_slice %6 {offsets = [88, 0], sizes = [8, 384], strides = [1, 1]} : vector<192x384xf32> to vector<8x384xf32>
    %24 = arith.maximumf %22, %23 : vector<8x384xf32>
    %25 = vector.extract_strided_slice %6 {offsets = [96, 0], sizes = [8, 384], strides = [1, 1]} : vector<192x384xf32> to vector<8x384xf32>
    %26 = vector.extract_strided_slice %6 {offsets = [104, 0], sizes = [8, 384], strides = [1, 1]} : vector<192x384xf32> to vector<8x384xf32>
    %27 = arith.maximumf %25, %26 : vector<8x384xf32>
    %28 = vector.extract_strided_slice %6 {offsets = [112, 0], sizes = [8, 384], strides = [1, 1]} : vector<192x384xf32> to vector<8x384xf32>
    %29 = vector.extract_strided_slice %6 {offsets = [120, 0], sizes = [8, 384], strides = [1, 1]} : vector<192x384xf32> to vector<8x384xf32>
    %30 = arith.maximumf %28, %29 : vector<8x384xf32>
    %31 = vector.extract_strided_slice %6 {offsets = [128, 0], sizes = [8, 384], strides = [1, 1]} : vector<192x384xf32> to vector<8x384xf32>
    %32 = vector.extract_strided_slice %6 {offsets = [136, 0], sizes = [8, 384], strides = [1, 1]} : vector<192x384xf32> to vector<8x384xf32>
    %33 = arith.maximumf %31, %32 : vector<8x384xf32>
    %34 = vector.extract_strided_slice %6 {offsets = [144, 0], sizes = [8, 384], strides = [1, 1]} : vector<192x384xf32> to vector<8x384xf32>
    %35 = vector.extract_strided_slice %6 {offsets = [152, 0], sizes = [8, 384], strides = [1, 1]} : vector<192x384xf32> to vector<8x384xf32>
    %36 = arith.maximumf %34, %35 : vector<8x384xf32>
    %37 = vector.extract_strided_slice %6 {offsets = [160, 0], sizes = [8, 384], strides = [1, 1]} : vector<192x384xf32> to vector<8x384xf32>
    %38 = vector.extract_strided_slice %6 {offsets = [168, 0], sizes = [8, 384], strides = [1, 1]} : vector<192x384xf32> to vector<8x384xf32>
    %39 = arith.maximumf %37, %38 : vector<8x384xf32>
    %40 = vector.extract_strided_slice %6 {offsets = [176, 0], sizes = [8, 384], strides = [1, 1]} : vector<192x384xf32> to vector<8x384xf32>
    %41 = vector.extract_strided_slice %6 {offsets = [184, 0], sizes = [8, 384], strides = [1, 1]} : vector<192x384xf32> to vector<8x384xf32>
    %42 = arith.maximumf %40, %41 : vector<8x384xf32>
    %43 = tpu.concatenate %9, %12, %15, %18, %21, %24, %27, %30, %33, %36, %39, %42 in 0 : vector<8x384xf32>, vector<8x384xf32>, vector<8x384xf32>, vector<8x384xf32>, vector<8x384xf32>, vector<8x384xf32>, vector<8x384xf32>, vector<8x384xf32>, vector<8x384xf32>, vector<8x384xf32>, vector<8x384xf32>, vector<8x384xf32> -> vector<96x384xf32>
    %cst_4 = arith.constant 0.000000e+00 : f32
    %44 = vector.broadcast %cst_4 : f32 to vector<96x384xf32>
    %45 = arith.maximumf %43, %44 : vector<96x384xf32>
    %46 = arith.truncf %45 : vector<96x384xf32> to vector<96x384xbf16>
    %cst_5 = arith.constant 0.000000e+00 : f32
    %47 = vector.broadcast %cst_5 : f32 to vector<64x128xf32>
    %48 = vector.extract_strided_slice %46 {offsets = [0, 0], sizes = [64, 384], strides = [1, 1]} : vector<96x384xbf16> to vector<64x384xbf16>
    %c0_6 = arith.constant 0 : index
    %c0_7 = arith.constant 0 : index
    %c0_8 = arith.constant 0 : index
    %49 = vector.load %arg3[%c0_6, %c0_7, %c0_8] : memref<5x384x128xbf16, #tpu.memory_space<vmem>>, vector<1x384x128xbf16>
    %50 = vector.shape_cast %49 : vector<1x384x128xbf16> to vector<384x128xbf16>
    %cst_9 = arith.constant dense<0.000000e+00> : vector<64x128xf32>
    %51 = tpu.matmul %48, %50, %cst_9 {dimension_numbers = #tpu.dot_dimension_numbers<[1], [0], [0], [1], [0, 0, 1, 1], [], []>} : vector<64x384xbf16>, vector<384x128xbf16>, vector<64x128xf32> -> vector<64x128xf32>
    %52 = arith.addf %47, %51 : vector<64x128xf32>
    %53 = vector.extract_strided_slice %46 {offsets = [8, 0], sizes = [64, 384], strides = [1, 1]} : vector<96x384xbf16> to vector<64x384xbf16>
    %c1 = arith.constant 1 : index
    %c0_10 = arith.constant 0 : index
    %c0_11 = arith.constant 0 : index
    %54 = vector.load %arg3[%c1, %c0_10, %c0_11] : memref<5x384x128xbf16, #tpu.memory_space<vmem>>, vector<1x384x128xbf16>
    %55 = vector.shape_cast %54 : vector<1x384x128xbf16> to vector<384x128xbf16>
    %cst_12 = arith.constant dense<0.000000e+00> : vector<64x128xf32>
    %56 = tpu.matmul %53, %55, %cst_12 {dimension_numbers = #tpu.dot_dimension_numbers<[1], [0], [0], [1], [0, 0, 1, 1], [], []>} : vector<64x384xbf16>, vector<384x128xbf16>, vector<64x128xf32> -> vector<64x128xf32>
    %57 = arith.addf %52, %56 : vector<64x128xf32>
    %58 = vector.extract_strided_slice %46 {offsets = [16, 0], sizes = [64, 384], strides = [1, 1]} : vector<96x384xbf16> to vector<64x384xbf16>
    %c2 = arith.constant 2 : index
    %c0_13 = arith.constant 0 : index
    %c0_14 = arith.constant 0 : index
    %59 = vector.load %arg3[%c2, %c0_13, %c0_14] : memref<5x384x128xbf16, #tpu.memory_space<vmem>>, vector<1x384x128xbf16>
    %60 = vector.shape_cast %59 : vector<1x384x128xbf16> to vector<384x128xbf16>
    %cst_15 = arith.constant dense<0.000000e+00> : vector<64x128xf32>
    %61 = tpu.matmul %58, %60, %cst_15 {dimension_numbers = #tpu.dot_dimension_numbers<[1], [0], [0], [1], [0, 0, 1, 1], [], []>} : vector<64x384xbf16>, vector<384x128xbf16>, vector<64x128xf32> -> vector<64x128xf32>
    %62 = arith.addf %57, %61 : vector<64x128xf32>
    %63 = vector.extract_strided_slice %46 {offsets = [24, 0], sizes = [64, 384], strides = [1, 1]} : vector<96x384xbf16> to vector<64x384xbf16>
    %c3 = arith.constant 3 : index
    %c0_16 = arith.constant 0 : index
    %c0_17 = arith.constant 0 : index
    %64 = vector.load %arg3[%c3, %c0_16, %c0_17] : memref<5x384x128xbf16, #tpu.memory_space<vmem>>, vector<1x384x128xbf16>
    %65 = vector.shape_cast %64 : vector<1x384x128xbf16> to vector<384x128xbf16>
    %cst_18 = arith.constant dense<0.000000e+00> : vector<64x128xf32>
    %66 = tpu.matmul %63, %65, %cst_18 {dimension_numbers = #tpu.dot_dimension_numbers<[1], [0], [0], [1], [0, 0, 1, 1], [], []>} : vector<64x384xbf16>, vector<384x128xbf16>, vector<64x128xf32> -> vector<64x128xf32>
    %67 = arith.addf %62, %66 : vector<64x128xf32>
    %68 = vector.extract_strided_slice %46 {offsets = [32, 0], sizes = [64, 384], strides = [1, 1]} : vector<96x384xbf16> to vector<64x384xbf16>
    %c4 = arith.constant 4 : index
    %c0_19 = arith.constant 0 : index
    %c0_20 = arith.constant 0 : index
    %69 = vector.load %arg3[%c4, %c0_19, %c0_20] : memref<5x384x128xbf16, #tpu.memory_space<vmem>>, vector<1x384x128xbf16>
    %70 = vector.shape_cast %69 : vector<1x384x128xbf16> to vector<384x128xbf16>
    %cst_21 = arith.constant dense<0.000000e+00> : vector<64x128xf32>
    %71 = tpu.matmul %68, %70, %cst_21 {dimension_numbers = #tpu.dot_dimension_numbers<[1], [0], [0], [1], [0, 0, 1, 1], [], []>} : vector<64x384xbf16>, vector<384x128xbf16>, vector<64x128xf32> -> vector<64x128xf32>
    %72 = arith.addf %67, %71 : vector<64x128xf32>
    %73 = vector.extract_strided_slice %72 {offsets = [0, 0], sizes = [64, 64], strides = [1, 1]} : vector<64x128xf32> to vector<64x64xf32>
    %74 = vector.extract_strided_slice %72 {offsets = [0, 64], sizes = [64, 64], strides = [1, 1]} : vector<64x128xf32> to vector<64x64xf32>
    %75 = arith.maximumf %73, %74 : vector<64x64xf32>
    %76 = vector.extract_strided_slice %75 {offsets = [0, 0], sizes = [8, 64], strides = [1, 1]} : vector<64x64xf32> to vector<8x64xf32>
    %77 = vector.extract_strided_slice %75 {offsets = [8, 0], sizes = [8, 64], strides = [1, 1]} : vector<64x64xf32> to vector<8x64xf32>
    %78 = arith.maximumf %76, %77 : vector<8x64xf32>
    %79 = vector.extract_strided_slice %75 {offsets = [16, 0], sizes = [8, 64], strides = [1, 1]} : vector<64x64xf32> to vector<8x64xf32>
    %80 = vector.extract_strided_slice %75 {offsets = [24, 0], sizes = [8, 64], strides = [1, 1]} : vector<64x64xf32> to vector<8x64xf32>
    %81 = arith.maximumf %79, %80 : vector<8x64xf32>
    %82 = vector.extract_strided_slice %75 {offsets = [32, 0], sizes = [8, 64], strides = [1, 1]} : vector<64x64xf32> to vector<8x64xf32>
    %83 = vector.extract_strided_slice %75 {offsets = [40, 0], sizes = [8, 64], strides = [1, 1]} : vector<64x64xf32> to vector<8x64xf32>
    %84 = arith.maximumf %82, %83 : vector<8x64xf32>
    %85 = vector.extract_strided_slice %75 {offsets = [48, 0], sizes = [8, 64], strides = [1, 1]} : vector<64x64xf32> to vector<8x64xf32>
    %86 = vector.extract_strided_slice %75 {offsets = [56, 0], sizes = [8, 64], strides = [1, 1]} : vector<64x64xf32> to vector<8x64xf32>
    %87 = arith.maximumf %85, %86 : vector<8x64xf32>
    %88 = tpu.concatenate %78, %81, %84, %87 in 1 : vector<8x64xf32>, vector<8x64xf32>, vector<8x64xf32>, vector<8x64xf32> -> vector<8x256xf32>
    %cst_22 = arith.constant 0.000000e+00 : f32
    %89 = vector.broadcast %cst_22 : f32 to vector<8x256xf32>
    %90 = arith.maximumf %88, %89 : vector<8x256xf32>
    %91 = arith.truncf %90 : vector<8x256xf32> to vector<8x256xbf16>
    %c0_23 = arith.constant 0 : index
    %c0_24 = arith.constant 0 : index
    %92 = vector.load %arg4[%c0_23, %c0_24] : memref<256x64xbf16, #tpu.memory_space<vmem>>, vector<256x64xbf16>
    %cst_25 = arith.constant dense<0.000000e+00> : vector<8x64xf32>
    %93 = tpu.matmul %91, %92, %cst_25 {dimension_numbers = #tpu.dot_dimension_numbers<[1], [0], [0], [1], [0, 0, 1, 1], [], []>} : vector<8x256xbf16>, vector<256x64xbf16>, vector<8x64xf32> -> vector<8x64xf32>
    %c0_26 = arith.constant 0 : index
    %c0_27 = arith.constant 0 : index
    %94 = vector.load %arg5[%c0_26, %c0_27] : memref<1x64xf32, #tpu.memory_space<vmem>>, vector<1x64xf32>
    %95 = vector.broadcast %94 : vector<1x64xf32> to vector<8x64xf32>
    %96 = arith.addf %93, %95 : vector<8x64xf32>
    %cst_28 = arith.constant 0.000000e+00 : f32
    %97 = vector.broadcast %cst_28 : f32 to vector<8x64xf32>
    %98 = arith.maximumf %96, %97 : vector<8x64xf32>
    %99 = arith.truncf %98 : vector<8x64xf32> to vector<8x64xbf16>
    %c0_29 = arith.constant 0 : index
    %c0_30 = arith.constant 0 : index
    %100 = vector.load %arg6[%c0_29, %c0_30] : memref<64x32xbf16, #tpu.memory_space<vmem>>, vector<64x32xbf16>
    %cst_31 = arith.constant dense<0.000000e+00> : vector<8x32xf32>
    %101 = tpu.matmul %99, %100, %cst_31 {dimension_numbers = #tpu.dot_dimension_numbers<[1], [0], [0], [1], [0, 0, 1, 1], [], []>} : vector<8x64xbf16>, vector<64x32xbf16>, vector<8x32xf32> -> vector<8x32xf32>
    %c0_32 = arith.constant 0 : index
    %c0_33 = arith.constant 0 : index
    %102 = vector.load %arg7[%c0_32, %c0_33] : memref<1x32xf32, #tpu.memory_space<vmem>>, vector<1x32xf32>
    %103 = vector.broadcast %102 : vector<1x32xf32> to vector<8x32xf32>
    %104 = arith.addf %101, %103 : vector<8x32xf32>
    %cst_34 = arith.constant 0.000000e+00 : f32
    %105 = vector.broadcast %cst_34 : f32 to vector<8x32xf32>
    %106 = arith.maximumf %104, %105 : vector<8x32xf32>
    %107 = arith.truncf %106 : vector<8x32xf32> to vector<8x32xbf16>
    %c0_35 = arith.constant 0 : index
    %c0_36 = arith.constant 0 : index
    %108 = vector.load %arg8[%c0_35, %c0_36] : memref<32x10xbf16, #tpu.memory_space<vmem>>, vector<32x10xbf16>
    %cst_37 = arith.constant dense<0.000000e+00> : vector<8x10xf32>
    %109 = tpu.matmul %107, %108, %cst_37 {dimension_numbers = #tpu.dot_dimension_numbers<[1], [0], [0], [1], [0, 0, 1, 1], [], []>} : vector<8x32xbf16>, vector<32x10xbf16>, vector<8x10xf32> -> vector<8x10xf32>
    %c0_38 = arith.constant 0 : index
    %c0_39 = arith.constant 0 : index
    %110 = vector.load %arg9[%c0_38, %c0_39] : memref<1x10xf32, #tpu.memory_space<vmem>>, vector<1x10xf32>
    %111 = vector.broadcast %110 : vector<1x10xf32> to vector<8x10xf32>
    %112 = arith.addf %109, %111 : vector<8x10xf32>
    %c0_40 = arith.constant 0 : index
    %c0_41 = arith.constant 0 : index
    %113 = vector.load %arg10[%c0_40, %c0_41] : memref<8x10xf32, #tpu.memory_space<vmem>>, vector<8x10xf32>
    tpu.vector_store %arg10[%c0_40, %c0_41], %112 {strides = array<i32>} : memref<8x10xf32, #tpu.memory_space<vmem>>, vector<8x10xf32>,
    return
  }
  func.func @transform_0(%arg0: i32) -> (i32, i32, i32) {
    %c0_i32 = arith.constant 0 : i32
    %c0_i32_0 = arith.constant 0 : i32
    %c0_i32_1 = arith.constant 0 : i32
    return %arg0, %c0_i32, %c0_i32_0 : i32, i32, i32
  }
  func.func @transform_1(%arg0: i32) -> (i32, i32) {
    %c0_i32 = arith.constant 0 : i32
    %c0_i32_0 = arith.constant 0 : i32
    %c0_i32_1 = arith.constant 0 : i32
    return %c0_i32, %c0_i32_0 : i32, i32
  }
  func.func @transform_2(%arg0: i32) -> (i32, i32, i32) {
    %c0_i32 = arith.constant 0 : i32
    %c0_i32_0 = arith.constant 0 : i32
    %c0_i32_1 = arith.constant 0 : i32
    %c0_i32_2 = arith.constant 0 : i32
    return %c0_i32, %c0_i32_0, %c0_i32_1 : i32, i32, i32
  }
  func.func @transform_3(%arg0: i32) -> (i32, i32) {
    %c0_i32 = arith.constant 0 : i32
    %c0_i32_0 = arith.constant 0 : i32
    %c0_i32_1 = arith.constant 0 : i32
    return %c0_i32, %c0_i32_0 : i32, i32
  }
  func.func @transform_4(%arg0: i32) -> (i32, i32) {
    %c0_i32 = arith.constant 0 : i32
    %c0_i32_0 = arith.constant 0 : i32
    %c0_i32_1 = arith.constant 0 : i32
    return %c0_i32, %c0_i32_0 : i32, i32
  }
  func.func @transform_5(%arg0: i32) -> (i32, i32) {
    %c0_i32 = arith.constant 0 : i32
    %c0_i32_0 = arith.constant 0 : i32
    %c0_i32_1 = arith.constant 0 : i32
    return %c0_i32, %c0_i32_0 : i32, i32
  }
  func.func @transform_6(%arg0: i32) -> (i32, i32) {
    %c0_i32 = arith.constant 0 : i32
    %c0_i32_0 = arith.constant 0 : i32
    %c0_i32_1 = arith.constant 0 : i32
    return %c0_i32, %c0_i32_0 : i32, i32
  }
  func.func @transform_7(%arg0: i32) -> (i32, i32) {
    %c0_i32 = arith.constant 0 : i32
    %c0_i32_0 = arith.constant 0 : i32
    %c0_i32_1 = arith.constant 0 : i32
    return %c0_i32, %c0_i32_0 : i32, i32
  }
  func.func @transform_8(%arg0: i32) -> (i32, i32) {
    %c0_i32 = arith.constant 0 : i32
    %c0_i32_0 = arith.constant 0 : i32
    %c0_i32_1 = arith.constant 0 : i32
    return %c0_i32, %c0_i32_0 : i32, i32
  }
  func.func @transform_9(%arg0: i32) -> (i32, i32) {
    %c0_i32 = arith.constant 0 : i32
    %c0_i32_0 = arith.constant 0 : i32
    return %arg0, %c0_i32 : i32, i32
  }
}

</mosaic_0001>

<bundles_post_ra>
// kernel: lenet_pallas.1
= control target key start
LH: loop header
LB: loop body
LE: loop exit
PB: predicated region body
PF: predicated region fallthrough
CT: control target
= control target key end

     0   :  { %vm521_vm0 = vcmask 1045504   ;;  %vm484_vm1 = vcmask 97280   ;;  %s6578_s0 = inlined_call_operand.vmem [shape: bf16[1,192,140], index: 0, kind: input, shape index: {}]   ;;  %s6579_s1 = inlined_call_operand.vmem [shape: bf16[140,768], index: 1, kind: input, shape index: {}]   ;;  %s6580_s2 = inlined_call_operand.vmem [shape: bf16[5,384,128], index: 2, kind: input, shape index: {}]   ;;  %s6581_s3 = inlined_call_operand.vmem [shape: bf16[256,64], index: 3, kind: input, shape index: {}]   ;;  %s6582_s4 = inlined_call_operand.vmem [shape: f32[1,64], index: 4, kind: input, shape index: {}]   ;;  %s6583_s5 = inlined_call_operand.vmem [shape: bf16[64,32], index: 5, kind: input, shape index: {}]   ;;  %s6584_s6 = inlined_call_operand.vmem [shape: f32[1,32], index: 6, kind: input, shape index: {}]   ;;  %s6585_s7 = inlined_call_operand.vmem [shape: bf16[32,10], index: 7, kind: input, shape index: {}]   ;;  %s6586_s8 = inlined_call_operand.vmem [shape: f32[1,10], index: 8, kind: input, shape index: {}]   ;;  %s6587_s9 = inlined_call_operand.hbm [shape: f32[8,10], index: 9, kind: output, shape index: {}]  }
   0x1   :  { %v3679_v0 = vld [vmem:[%s6579_s1 + $0x150] sm:$0xf]  ;;  %v4628_v1 = vld [vmem:[%s6579_s1 + $0x164] sm:$0xf0]  ;;  %v4625_v2 = vld [vmem:[%s6579_s1 + $0x154] sm:$0xf] }
   0x2   :  { %v3680_v3 = vor.u32 %v4628_v1, %v3679_v0  ;;  %v3681_v4 = vld [vmem:[%s6579_s1 + $0x168] sm:$0xf0]  ;;  %v3703_v5 = vld [vmem:[%s6579_s1 + $0x180] sm:$0xf]  ;;  %v4634_v6 = vld [vmem:[%s6579_s1 + $0x194] sm:$0x30] }
   0x3   :  { %v3684_v7 = vor.u32 %v4625_v2, %v3681_v4  ;;  %v3704_v8 = vor.u32 %v4634_v6, %v3703_v5  ;;  %v4631_v9 = vld [vmem:[%s6579_s1 + $0x184] sm:$0xf]  ;;  %v3705_v10 = vld [vmem:[%s6579_s1 + $0x198] sm:$0x30]  ;;  %v3655_v12 = vld [vmem:[%s6579_s1 + $0x120] sm:$0xf] }
   0x4   :  { %540 = vmatpush.bf16.msra.mxu0 %v3680_v3  ;;  %v3708_v11 = vor.u32 %v4631_v9, %v3705_v10  ;;  %v4622_v13 = vld [vmem:[%s6579_s1 + $0x134] sm:$0xf0]  ;;  %v4559_v14 = vld [vmem:[%s6578_s0 + $0x4] sm:$0xf]  ;;  %v3417_v17 = vld [vmem:[%s6578_s0 + $0x8] sm:$0xf0] }
   0x5   :  { %678 = vmatpush.bf16.msra.mxu2 %v3684_v7  ;;  %v523_v15 = vsel %vm521_vm0, %v3704_v8, 0  ;;  %v3656_v16 = vor.u32 %v4622_v13, %v3655_v12  ;;  %v4619_v18 = vld [vmem:[%s6579_s1 + $0x124] sm:$0xf]  ;;  %v4923_v20 = vor.u32 %v4559_v14, %v3417_v17  ;;  %v3657_v21 = vld [vmem:[%s6579_s1 + $0x138] sm:$0xf0] }
   0x6   :  { %616 = vmatpush.bf16.msra.mxu1 %v523_v15  ;;  %v526_v19 = vsel %vm521_vm0, %v3708_v11, 0  ;;  %v3631_v22 = vld [vmem:[%s6579_s1 + $0xf0] sm:$0xf]  ;;  %v3660_v23 = vor.u32 %v4619_v18, %v3657_v21  ;;  %v4616_v24 = vld [vmem:[%s6579_s1 + $0x104] sm:$0xf0] }
   0x7   :  { %754 = vmatpush.bf16.msra.mxu3 %v526_v19  ;;  %v4613_v25 = vld [vmem:[%s6579_s1 + $0xf4] sm:$0xf]  ;;  %v3633_v26 = vld [vmem:[%s6579_s1 + $0x108] sm:$0xf0]  ;;  %v3632_v27 = vor.u32 %v4616_v24, %v3631_v22  ;;  %v3607_v29 = vld [vmem:[%s6579_s1 + $0xc0] sm:$0xf] }
   0x8   :  { %541 = vmatpush.bf16.msra.mxu0 %v3656_v16  ;;  %v3636_v28 = vor.u32 %v4613_v25, %v3633_v26  ;;  %v4610_v30 = vld [vmem:[%s6579_s1 + $0xd4] sm:$0xf0]  ;;  %v4607_v31 = vld [vmem:[%s6579_s1 + $0xc4] sm:$0xf]  ;;  %v3609_v32 = vld [vmem:[%s6579_s1 + $0xd8] sm:$0xf0] }
   0x9   :  { %3725 = vmatmul.msk.bf16.vlgmr.msra.gmra.mxu1 %vm484_vm1, %v4923_v20  ;;  %679 = vmatpush.bf16.msra.mxu2 %v3660_v23  ;;  %v3608_v33 = vor.u32 %v4610_v30, %v3607_v29  ;;  %v3711_v34 = vld [vmem:[%s6579_s1 + $0x188] sm:$0xf]  ;;  %v3612_v35 = vor.u32 %v4607_v31, %v3609_v32  ;;  %v3583_v36 = vld [vmem:[%s6579_s1 + $0x90] sm:$0xf]  ;;  %v4635_v38 = vld [vmem:[%s6579_s1 + $0x19c] sm:$0x30] }
   0xa   :  { %3737 = vmatmul.msk.bf16.vlgmr.msra.gmra.mxu3 %vm484_vm1, %v4923_v20  ;;  %v4604_v37 = vld [vmem:[%s6579_s1 + $0xa4] sm:$0xf0]  ;;  %v4601_v39 = vld [vmem:[%s6579_s1 + $0x94] sm:$0xf]  ;;  %v3585_v40 = vld [vmem:[%s6579_s1 + $0xa8] sm:$0xf0]  ;;  %v3712_v41 = vor.u32 %v4635_v38, %v3711_v34 }
   0xb   :  { %v3584_v42 = vor.u32 %v4604_v37, %v3583_v36  ;;  %v3687_v44 = vld [vmem:[%s6579_s1 + $0x158] sm:$0xf]  ;;  %v4629_v45 = vld [vmem:[%s6579_s1 + $0x16c] sm:$0xf0]  ;;  %v3588_v46 = vor.u32 %v4601_v39, %v3585_v40  ;;  %v3559_v47 = vld [vmem:[%s6579_s1 + $0x60] sm:$0xf] }
   0xc   :  { %542 = vmatpush.bf16.msra.mxu0 %v3632_v27  ;;  %v529_v43 = vsel %vm521_vm0, %v3712_v41, 0  ;;  %v4598_v48 = vld [vmem:[%s6579_s1 + $0x74] sm:$0xf0]  ;;  %v4561_v49 = vld [vmem:[%s6578_s0 + $0x14] sm:$0xf]  ;;  %v3688_v50 = vor.u32 %v4629_v45, %v3687_v44 }
   0xd   :  { %680 = vmatpush.bf16.msra.mxu2 %v3636_v28  ;;  %892 = vmatpush.bf16.msrb.mxu3 %v529_v43  ;;  %v3425_v51 = vld [vmem:[%s6578_s0 + $0x18] sm:$0xf0]  ;;  %v4595_v52 = vld [vmem:[%s6579_s1 + $0x64] sm:$0xf]  ;;  %v3560_v54 = vor.u32 %v4598_v48, %v3559_v47  ;;  %v3535_v55 = vld [vmem:[%s6579_s1 + $0x30] sm:$0xf] }
   0xe   :  { %v3561_v53 = vld [vmem:[%s6579_s1 + $0x78] sm:$0xf0]  ;;  %816 = vmatpush.bf16.msrb.mxu1 %v3688_v50  ;;  %v4592_v56 = vld [vmem:[%s6579_s1 + $0x44] sm:$0xf0]  ;;  %v5005_v57 = vor.u32 %v4561_v49, %v3425_v51  ;;  %v4589_v59 = vld [vmem:[%s6579_s1 + $0x34] sm:$0xf] }
   0xf   :  { %v3564_v58 = vor.u32 %v4595_v52, %v3561_v53  ;;  %v3537_v60 = vld [vmem:[%s6579_s1 + $0x48] sm:$0xf0] }
  0x10   :  { %543 = vmatpush.bf16.msra.mxu0 %v3608_v33 }
  0x11   :  { %681 = vmatpush.bf16.msra.mxu2 %v3612_v35 }
  0x14   :  { %544 = vmatpush.bf16.msra.mxu0 %v3584_v42 }
  0x15   :  { %682 = vmatpush.bf16.msra.mxu2 %v3588_v46 }
  0x16   :  { %14 = vsyncpa [#allocation3], 0  ;;  %v3511_v61 = vld [vmem:[%s6579_s1] sm:$0xf]  ;;  %v3536_v62 = vor.u32 %v4592_v56, %v3535_v55  ;;  %v4586_v63 = vld [vmem:[%s6579_s1 + $0x14] sm:$0xf0]  ;;  %v3540_v2 = vor.u32 %v4589_v59, %v3537_v60 }
  0x17   :  { %v4632_v0 = vld [vmem:[%s6579_s1 + $0x18c] sm:$0xf]  ;;  %v3713_v1 = vld [vmem:[%s6579_s1 + $0x1a0] sm:$0x30]  ;;  %v3513_v4 = vld [vmem:[%s6579_s1 + $0x18] sm:$0xf0]  ;;  %v3512_v11 = vor.u32 %v4586_v63, %v3511_v61 }
  0x18   :  { %545 = vmatpush.bf16.msra.mxu0 %v3560_v54  ;;  %v4583_v3 = vld [vmem:[%s6579_s1 + $0x4] sm:$0xf]  ;;  %v4626_v5 = vld [vmem:[%s6579_s1 + $0x15c] sm:$0xf]  ;;  %v3689_v6 = vld [vmem:[%s6579_s1 + $0x170] sm:$0xf0]  ;;  %v3716_v9 = vor.u32 %v4632_v0, %v3713_v1 }
  0x19   :  { %3726 = vmatmul.msk.bf16.gmra.mxu1 %vm484_vm1, %v5005_v57  ;;  %683 = vmatpush.bf16.msra.mxu2 %v3564_v58  ;;  %v3663_v7 = vld [vmem:[%s6579_s1 + $0x128] sm:$0xf]  ;;  %v4623_v8 = vld [vmem:[%s6579_s1 + $0x13c] sm:$0xf0]  ;;  %v3516_v14 = vor.u32 %v4583_v3, %v3513_v4  ;;  %v3692_v15 = vor.u32 %v4626_v5, %v3689_v6  ;;  %v4620_v16 = vld [vmem:[%s6579_s1 + $0x12c] sm:$0xf] }
  0x1a   :  { %3738 = vmatmul.msk.bf16.gmra.mxu3 %vm484_vm1, %v5005_v57  ;;  %v3664_v10 = vor.u32 %v4623_v8, %v3663_v7  ;;  %v3415_v12 = vld [vmem:[%s6578_s0] sm:$0xf]  ;;  %v4560_v13 = vld [vmem:[%s6578_s0 + $0x4] sm:$0xf0]  ;;  %v3665_v17 = vld [vmem:[%s6579_s1 + $0x140] sm:$0xf0] }
  0x1b   :  { %v5059_v18 = vor.u32 %v4560_v13, %v3415_v12  ;;  %v532_v19 = vsel %vm521_vm0, %v3716_v9, 0  ;;  %v3668_v21 = vor.u32 %v4620_v16, %v3665_v17  ;;  %v4563_v22 = vld [vmem:[%s6578_s0 + $0x24] sm:$0xf]  ;;  %v3433_v23 = vld [vmem:[%s6578_s0 + $0x28] sm:$0xf0]  ;;  %vm3137_vm2 = vcmask 523264  }
  0x1c   :  { %546 = vmatpush.bf16.msra.mxu0 %v3536_v62  ;;  %817 = vmatpush.bf16.msrb.mxu1 %v3664_v10  ;;  %v5070_v24 = vor.u32 %v4563_v22, %v3433_v23  ;;  %v3639_v25 = vld [vmem:[%s6579_s1 + $0xf8] sm:$0xf]  ;;  %v4617_v26 = vld [vmem:[%s6579_s1 + $0x10c] sm:$0xf0]  ;;  %v4565_v31 = vld [vmem:[%s6578_s0 + $0x34] sm:$0xf] }
  0x1d   :  { %684 = vmatpush.bf16.msra.mxu2 %v3540_v2  ;;  %v3640_v27 = vor.u32 %v4617_v26, %v3639_v25  ;;  %v3423_v28 = vld [vmem:[%s6578_s0 + $0x10] sm:$0xf]  ;;  %v4562_v29 = vld [vmem:[%s6578_s0 + $0x14] sm:$0xf0]  ;;  %v3441_v32 = vld [vmem:[%s6578_s0 + $0x38] sm:$0xf0] }
  0x1e   :  { %v5088_v30 = vor.u32 %v4562_v29, %v3423_v28  ;;  %v5098_v33 = vor.u32 %v4565_v31, %v3441_v32  ;;  %v4614_v34 = vld [vmem:[%s6579_s1 + $0xfc] sm:$0xf]  ;;  %v3641_v35 = vld [vmem:[%s6579_s1 + $0x110] sm:$0xf0]  ;;  %v3431_v37 = vld [vmem:[%s6578_s0 + $0x20] sm:$0xf] }
  0x1f   :  { %v3644_v36 = vor.u32 %v4614_v34, %v3641_v35  ;;  %v4564_v38 = vld [vmem:[%s6578_s0 + $0x24] sm:$0xf0]  ;;  %v4567_v40 = vld [vmem:[%s6578_s0 + $0x44] sm:$0xf]  ;;  %v3449_v41 = vld [vmem:[%s6578_s0 + $0x48] sm:$0xf0] }
  0x20   :  { %547 = vmatpush.bf16.msra.mxu0 %v3512_v11  ;;  %818 = vmatpush.bf16.msrb.mxu1 %v3640_v27  ;;  %v5116_v39 = vor.u32 %v4564_v38, %v3431_v37  ;;  %v5126_v42 = vor.u32 %v4567_v40, %v3449_v41  ;;  %v3615_v43 = vld [vmem:[%s6579_s1 + $0xc8] sm:$0xf]  ;;  %v4611_v44 = vld [vmem:[%s6579_s1 + $0xdc] sm:$0xf0]  ;;  %v4608_v45 = vld [vmem:[%s6579_s1 + $0xcc] sm:$0xf] }
  0x21   :  { %685 = vmatpush.bf16.msra.mxu2 %v3516_v14  ;;  %v3616_v46 = vor.u32 %v4611_v44, %v3615_v43  ;;  %v3617_v47 = vld [vmem:[%s6579_s1 + $0xe0] sm:$0xf0]  ;;  %v3439_v48 = vld [vmem:[%s6578_s0 + $0x30] sm:$0xf]  ;;  %v4566_v49 = vld [vmem:[%s6578_s0 + $0x34] sm:$0xf0] }
  0x22   :  { %v3620_v50 = vor.u32 %v4608_v45, %v3617_v47  ;;  %v5150_v51 = vor.u32 %v4566_v49, %v3439_v48  ;;  %v4569_v52 = vld [vmem:[%s6578_s0 + $0x54] sm:$0xf]  ;;  %v3457_v53 = vld [vmem:[%s6578_s0 + $0x58] sm:$0xf0]  ;;  %v3591_v55 = vld [vmem:[%s6579_s1 + $0x98] sm:$0xf] }
  0x23   :  { %548 = vmatmul.bf16.vlgmr.msra.gmra.mxu0 %v5059_v18  ;;  %v5160_v54 = vor.u32 %v4569_v52, %v3457_v53  ;;  %v4605_v56 = vld [vmem:[%s6579_s1 + $0xac] sm:$0xf0]  ;;  %v3447_v59 = vld [vmem:[%s6578_s0 + $0x40] sm:$0xf]  ;;  %v4568_v60 = vld [vmem:[%s6578_s0 + $0x44] sm:$0xf0] }
  0x24   :  { %954 = vmatpush.bf16.msrb.mxu0 %v3692_v15  ;;  %686 = vmatmul.bf16.vlgmr.msra.gmra.mxu2 %v5059_v18  ;;  %v3592_v58 = vor.u32 %v4605_v56, %v3591_v55  ;;  %v5178_v61 = vor.u32 %v4568_v60, %v3447_v59  ;;  %v4571_v62 = vld [vmem:[%s6578_s0 + $0x64] sm:$0xf]  ;;  %v3465_v63 = vld [vmem:[%s6578_s0 + $0x68] sm:$0xf0]  ;;  %v4602_v1 = vld [vmem:[%s6579_s1 + $0x9c] sm:$0xf] }
  0x25   :  { %1030 = vmatpush.bf16.msrb.mxu2 %v532_v19  ;;  %819 = vmatpush.bf16.msrb.mxu1 %v3616_v46  ;;  %v5188_v0 = vor.u32 %v4571_v62, %v3465_v63  ;;  %v3593_v2 = vld [vmem:[%s6579_s1 + $0xb0] sm:$0xf0]  ;;  %v3455_v4 = vld [vmem:[%s6578_s0 + $0x50] sm:$0xf]  ;;  %v4570_v5 = vld [vmem:[%s6578_s0 + $0x54] sm:$0xf0] }
  0x26   :  { %v3596_v3 = vor.u32 %v4602_v1, %v3593_v2  ;;  %v5206_v6 = vor.u32 %v4570_v5, %v3455_v4  ;;  %v4573_v7 = vld [vmem:[%s6578_s0 + $0x74] sm:$0xf]  ;;  %v3473_v8 = vld [vmem:[%s6578_s0 + $0x78] sm:$0xf0]  ;;  %v3567_v10 = vld [vmem:[%s6579_s1 + $0x68] sm:$0xf] }
  0x27   :  { %v5216_v9 = vor.u32 %v4573_v7, %v3473_v8  ;;  %v4599_v11 = vld [vmem:[%s6579_s1 + $0x7c] sm:$0xf0]  ;;  %v4572_v14 = vld [vmem:[%s6578_s0 + $0x64] sm:$0xf0]  ;;  %v4596_v16 = vld [vmem:[%s6579_s1 + $0x6c] sm:$0xf] }
  0x28   :  { %955 = vmatpush.bf16.msrb.mxu0 %v3668_v21  ;;  %v3568_v12 = vor.u32 %v4599_v11, %v3567_v10  ;;  %v3463_v13 = vld [vmem:[%s6578_s0 + $0x60] sm:$0xf]  ;;  %v3569_v17 = vld [vmem:[%s6579_s1 + $0x80] sm:$0xf0]  ;;  %v3481_v21 = vld [vmem:[%s6578_s0 + $0x88] sm:$0xf0] }
  0x29   :  { %3727 = vmatmul.msk.bf16.gmra.mxu1 %vm484_vm1, %v5070_v24  ;;  %v5234_v15 = vor.u32 %v4572_v14, %v3463_v13  ;;  %v4575_v19 = vld [vmem:[%s6578_s0 + $0x84] sm:$0xf]  ;;  %v3572_v22 = vor.u32 %v4596_v16, %v3569_v17  ;;  %v3471_v26 = vld [vmem:[%s6578_s0 + $0x70] sm:$0xf]  ;;  %v4574_v27 = vld [vmem:[%s6578_s0 + $0x74] sm:$0xf0] }
  0x2a   :  { %3739 = vmatmul.msk.bf16.gmra.mxu3 %vm484_vm1, %v5070_v24  ;;  %820 = vmatpush.bf16.msrb.mxu1 %v3592_v58  ;;  %v5250_v23 = vor.u32 %v4575_v19, %v3481_v21  ;;  %v5262_v31 = vor.u32 %v4574_v27, %v3471_v26  ;;  %v3543_v32 = vld [vmem:[%s6579_s1 + $0x38] sm:$0xf]  ;;  %v4593_v34 = vld [vmem:[%s6579_s1 + $0x4c] sm:$0xf0]  ;;  %v4577_v35 = vld [vmem:[%s6578_s0 + $0x94] sm:$0xf] }
  0x2b   :  { %v3544_v37 = vor.u32 %v4593_v34, %v3543_v32  ;;  %v4590_v43 = vld [vmem:[%s6579_s1 + $0x3c] sm:$0xf]  ;;  %v3545_v44 = vld [vmem:[%s6579_s1 + $0x50] sm:$0xf0]  ;;  %v3479_v46 = vld [vmem:[%s6578_s0 + $0x80] sm:$0xf] }
  0x2c   :  { %956 = vmatpush.bf16.msrb.mxu0 %v3644_v36  ;;  %v3489_v36 = vld [vmem:[%s6578_s0 + $0x98] sm:$0xf0]  ;;  %v3548_v45 = vor.u32 %v4590_v43, %v3545_v44  ;;  %v4576_v47 = vld [vmem:[%s6578_s0 + $0x84] sm:$0xf0]  ;;  %v4579_v55 = vld [vmem:[%s6578_s0 + $0xa4] sm:$0xf] }
  0x2d   :  { %v5278_v40 = vor.u32 %v4577_v35, %v3489_v36  ;;  %v3497_v56 = vld [vmem:[%s6578_s0 + $0xa8] sm:$0xf0]  ;;  %v3519_v58 = vld [vmem:[%s6579_s1 + $0x8] sm:$0xf]  ;;  %v4587_v59 = vld [vmem:[%s6579_s1 + $0x1c] sm:$0xf0] }
  0x2e   :  { %821 = vmatpush.bf16.msrb.mxu1 %v3568_v12  ;;  %v5314_v62 = vor.u32 %v4579_v55, %v3497_v56  ;;  %v3520_v63 = vor.u32 %v4587_v59, %v3519_v58  ;;  %v3487_v7 = vld [vmem:[%s6578_s0 + $0x90] sm:$0xf]  ;;  %v4578_v8 = vld [vmem:[%s6578_s0 + $0x94] sm:$0xf0]  ;;  %v4584_v19 = vld [vmem:[%s6579_s1 + $0xc] sm:$0xf] }
  0x2f   :  { %v5330_v13 = vor.u32 %v4578_v8, %v3487_v7  ;;  %v3521_v21 = vld [vmem:[%s6579_s1 + $0x20] sm:$0xf0]  ;;  %v3719_v43 = vld [vmem:[%s6579_s1 + $0x190] sm:$0xf]  ;;  %v4636_v44 = vld [vmem:[%s6579_s1 + $0x1a4] sm:$0x30] }
  0x30   :  { %957 = vmatpush.bf16.msrb.mxu0 %v3620_v50  ;;  %v5296_v50 = vor.u32 %v4576_v47, %v3479_v46  ;;  %v3524_v26 = vor.u32 %v4584_v19, %v3521_v21  ;;  %v3720_v46 = vor.u32 %v4636_v44, %v3719_v43  ;;  %v3695_v58 = vld [vmem:[%s6579_s1 + $0x160] sm:$0xf]  ;;  %v4630_v59 = vld [vmem:[%s6579_s1 + $0x174] sm:$0xf0]  ;;  %vm3378_vm3 = vcmask 261120   ;;  %s4831_s11 = smov [#allocation2]  }
  0x31   :  { %s3402_s12 = sshll.u32 %s4831_s11, 4  ;;  %s3404_s14 = sshll.u32 %s6587_s9, 4  ;;  %vm3395_vm4 = vcmask 80896   ;;  %s3403_s12 = int_to_ptr.vmem [resolvable:$true] %s3402_s12  ;;  %s3405_s14 = int_to_ptr.hbm [resolvable:$true] %s3404_s14 }
  0x32   :  { %822 = vmatpush.bf16.msrb.mxu1 %v3544_v37  ;;  %v3495_v37 = vld [vmem:[%s6578_s0 + $0xa0] sm:$0xf]  ;;  %v535_v55 = vsel %vm521_vm0, %v3720_v46, 0 }
  0x33   :  { %553 = vmatmul.bf16.gmra.mxu0 %v5088_v30  ;;  %1168 = vmatpush.bf16.msra.mxu3 %v535_v55 }
  0x34   :  { %691 = vmatmul.bf16.gmra.mxu2 %v5088_v30  ;;  %958 = vmatpush.bf16.msrb.mxu0 %v3596_v3 }
  0x36   :  { %823 = vmatpush.bf16.msrb.mxu1 %v3520_v63  ;;  %v3696_v63 = vor.u32 %v4630_v59, %v3695_v58 }
  0x38   :  { %959 = vmatpush.bf16.msrb.mxu0 %v3572_v22  ;;  %v4581_v22 = vld [vmem:[%s6578_s0 + $0xb4] sm:$0xf] }
  0x39   :  { %3728 = vmatmul.msk.bf16.gmra.mxu1 %vm484_vm1, %v5098_v33 }
  0x3a   :  { %3740 = vmatmul.msk.bf16.gmra.mxu3 %vm484_vm1, %v5098_v33  ;;  %1092 = vmatpush.bf16.msra.mxu1 %v3696_v63 }
  0x3c   :  { %960 = vmatpush.bf16.msrb.mxu0 %v3548_v45 }
  0x40   :  { %961 = vmatpush.bf16.msrb.mxu0 %v3524_v26  ;;  %v4582_v26 = vld [vmem:[%s6578_s0 + $0xb4] sm:$0xf0] }
  0x43   :  { %558 = vmatmul.bf16.gmra.mxu0 %v5116_v39 }
  0x44   :  { %696 = vmatmul.bf16.gmra.mxu2 %v5116_v39 }
  0x49   :  { %3729 = vmatmul.msk.bf16.gmra.mxu1 %vm484_vm1, %v5126_v42 }
  0x4a   :  { %3741 = vmatmul.msk.bf16.gmra.mxu3 %vm484_vm1, %v5126_v42 }
  0x53   :  { %563 = vmatmul.bf16.gmra.mxu0 %v5150_v51 }
  0x54   :  { %701 = vmatmul.bf16.gmra.mxu2 %v5150_v51 }
  0x59   :  { %3730 = vmatmul.msk.bf16.gmra.mxu1 %vm484_vm1, %v5160_v54 }
  0x5a   :  { %3742 = vmatmul.msk.bf16.gmra.mxu3 %vm484_vm1, %v5160_v54 }
  0x63   :  { %568 = vmatmul.bf16.gmra.mxu0 %v5178_v61 }
  0x64   :  { %706 = vmatmul.bf16.gmra.mxu2 %v5178_v61 }
  0x69   :  { %3731 = vmatmul.msk.bf16.gmra.mxu1 %vm484_vm1, %v5188_v0 }
  0x6a   :  { %3743 = vmatmul.msk.bf16.gmra.mxu3 %vm484_vm1, %v5188_v0 }
  0x73   :  { %573 = vmatmul.bf16.gmra.mxu0 %v5206_v6 }
  0x74   :  { %711 = vmatmul.bf16.gmra.mxu2 %v5206_v6 }
  0x79   :  { %3732 = vmatmul.msk.bf16.gmra.mxu1 %vm484_vm1, %v5216_v9 }
  0x7a   :  { %3744 = vmatmul.msk.bf16.gmra.mxu3 %vm484_vm1, %v5216_v9 }
  0x83   :  { %578 = vmatmul.bf16.gmra.mxu0 %v5234_v15 }
  0x84   :  { %716 = vmatmul.bf16.gmra.mxu2 %v5234_v15 }
  0x86   :  { %v618_v25 = vpop.f32.mrf.mxu1 }
  0x89   :  { %3733 = vmatmul.msk.bf16.gmra.mxu1 %vm484_vm1, %v5250_v23 }
  0x8a   :  { %3745 = vmatmul.msk.bf16.gmra.mxu3 %vm484_vm1, %v5250_v23 }
  0x8d   :  { %v756_v28 = vpop.f32.mrf.mxu3 }
  0x8e   :  { %v620_v29 = vpop.f32.mrf.mxu1 }
  0x93   :  { %583 = vmatmul.bf16.gmra.mxu0 %v5262_v31 }
  0x94   :  { %721 = vmatmul.bf16.gmra.mxu2 %v5262_v31 }
  0x95   :  { %v758_v38 = vpop.f32.mrf.mxu3 }
  0x96   :  { %v623_v41 = vpop.f32.mrf.mxu1 }
  0x99   :  { %3734 = vmatmul.msk.bf16.gmra.mxu1 %vm484_vm1, %v5278_v40 }
  0x9a   :  { %3746 = vmatmul.msk.bf16.gmra.mxu3 %vm484_vm1, %v5278_v40 }
  0x9d   :  { %v761_v48 = vpop.f32.mrf.mxu3 }
  0x9e   :  { %v625_v49 = vpop.f32.mrf.mxu1 }
  0xa0   :  { %v549_v52 = vpop.f32.mrf.mxu0 }
  0xa1   :  { %v5298_v53 = vadd.f32 %v618_v25, %v549_v52  ;;  %v3505_v25 = vld [vmem:[%s6578_s0 + $0xb8] sm:$0xf0] }
  0xa3   :  { %588 = vmatmul.bf16.gmra.mxu0 %v5296_v50 }
  0xa4   :  { %726 = vmatmul.bf16.gmra.mxu2 %v5296_v50 }
  0xa5   :  { %v763_v60 = vpop.f32.mrf.mxu3 }
  0xa6   :  { %v628_v1 = vpop.f32.mrf.mxu1 }
  0xa7   :  { %v687_v2 = vpop.f32.mrf.mxu2 }
  0xa8   :  { %v5316_v3 = vadd.f32 %v756_v28, %v687_v2  ;;  %v551_v4 = vpop.f32.mrf.mxu0  ;;  %v5350_v28 = vor.u32 %v4581_v22, %v3505_v25  ;;  %v3721_v2 = vld [vmem:[%s6579_s1 + $0x1a8] sm:$0x30]  ;;  %v4627_v22 = vld [vmem:[%s6579_s1 + $0x164] sm:$0xf] }
  0xa9   :  { %v5318_v5 = vadd.f32 %v620_v29, %v551_v4  ;;  %3735 = vmatmul.msk.bf16.gmra.mxu1 %vm484_vm1, %v5314_v62 }
  0xaa   :  { %6588 = vst [vmem:[#allocation5_spill] sm:$0xff] %v5316_v3  ;;  %3747 = vmatmul.msk.bf16.gmra.mxu3 %vm484_vm1, %v5314_v62 }
  0xad   :  { %v766_v10 = vpop.f32.mrf.mxu3 }
  0xae   :  { %v630_v11 = vpop.f32.mrf.mxu1 }
  0xaf   :  { %v689_v12 = vpop.f32.mrf.mxu2 }
  0xb0   :  { %v5332_v14 = vadd.f32 %v758_v38, %v689_v12  ;;  %v554_v16 = vpop.f32.mrf.mxu0  ;;  %v4580_v38 = vld [vmem:[%s6578_s0 + $0xa4] sm:$0xf0] }
  0xb1   :  { %v5334_v17 = vadd.f32 %v623_v41, %v554_v16 }
  0xb2   :  { %6589 = vst [vmem:[#allocation6_spill] sm:$0xff] %v5332_v14 }
  0xb3   :  { %593 = vmatmul.bf16.gmra.mxu0 %v5330_v13 }
  0xb4   :  { %731 = vmatmul.bf16.gmra.mxu2 %v5330_v13 }
  0xb5   :  { %v768_v27 = vpop.f32.mrf.mxu3 }
  0xb6   :  { %v633_v29 = vpop.f32.mrf.mxu1 }
  0xb7   :  { %v692_v32 = vpop.f32.mrf.mxu2 }
  0xb8   :  { %v5352_v34 = vadd.f32 %v761_v48, %v692_v32  ;;  %v556_v35 = vpop.f32.mrf.mxu0  ;;  %v5372_v48 = vor.u32 %v4580_v38, %v3495_v37 }
  0xb9   :  { %v5354_v36 = vadd.f32 %v625_v49, %v556_v35  ;;  %3736 = vmatmul.msk.bf16.gmra.mxu1 %vm484_vm1, %v5350_v28 }
  0xba   :  { %6590 = vst [vmem:[#allocation7_spill] sm:$0xff] %v5352_v34  ;;  %3748 = vmatmul.msk.bf16.gmra.mxu3 %vm484_vm1, %v5350_v28 }
  0xbd   :  { %v771_v41 = vpop.f32.mrf.mxu3 }
  0xbe   :  { %v635_v45 = vpop.f32.mrf.mxu1 }
  0xbf   :  { %v694_v47 = vpop.f32.mrf.mxu2 }
  0xc0   :  { %v5374_v49 = vadd.f32 %v763_v60, %v694_v47  ;;  %v559_v52 = vpop.f32.mrf.mxu0 }
  0xc1   :  { %v5377_v56 = vadd.f32 %v628_v1, %v559_v52  ;;  %v4633_v1 = vld [vmem:[%s6579_s1 + $0x194] sm:$0xf] }
  0xc2   :  { %6591 = vst [vmem:[#allocation8_spill] sm:$0xff] %v5374_v49  ;;  %v3724_v7 = vor.u32 %v4633_v1, %v3721_v2 }
  0xc3   :  { %598 = vmatmul.bf16.gmra.mxu0 %v5372_v48 }
  0xc4   :  { %736 = vmatmul.bf16.gmra.mxu2 %v5372_v48  ;;  %v538_v19 = vsel %vm521_vm0, %v3724_v7, 0 }
  0xc5   :  { %v773_v60 = vpop.f32.mrf.mxu3  ;;  %1306 = vmatpush.bf16.msra.mxu2 %v538_v19  ;;  %v4621_v19 = vld [vmem:[%s6579_s1 + $0x134] sm:$0xf] }
  0xc6   :  { %v638_v4 = vpop.f32.mrf.mxu1 }
  0xc7   :  { %v697_v8 = vpop.f32.mrf.mxu2 }
  0xc8   :  { %v5393_v12 = vadd.f32 %v766_v10, %v697_v8  ;;  %v561_v16 = vpop.f32.mrf.mxu0  ;;  %v3697_v10 = vld [vmem:[%s6579_s1 + $0x178] sm:$0xf0] }
  0xc9   :  { %v5396_v21 = vadd.f32 %v630_v11, %v561_v16  ;;  %824 = vmatmul.bf16.vlgmr.msrb.gmra.mxu1 %v5059_v18  ;;  %v3700_v25 = vor.u32 %v4627_v22, %v3697_v10  ;;  %v3503_v11 = vld [vmem:[%s6578_s0 + $0xb0] sm:$0xf]  ;;  %v3673_v22 = vld [vmem:[%s6579_s1 + $0x148] sm:$0xf0] }
  0xca   :  { %6592 = vst [vmem:[#allocation9_spill] sm:$0xff] %v5393_v12  ;;  %3749 = vmatmul.msk.bf16.vlgmr.msrb.gmra.mxu3 %vm484_vm1, %v4923_v20  ;;  %v5413_v38 = vor.u32 %v4582_v26, %v3503_v11  ;;  %v3676_v10 = vor.u32 %v4621_v19, %v3673_v22 }
  0xcb   :  { %1230 = vmatpush.bf16.msra.mxu0 %v3700_v25 }
  0xcd   :  { %v776_v32 = vpop.f32.mrf.mxu3 }
  0xce   :  { %v640_v35 = vpop.f32.mrf.mxu1 }
  0xcf   :  { %v699_v37 = vpop.f32.mrf.mxu2  ;;  %1231 = vmatpush.bf16.msra.mxu0 %v3676_v10 }
  0xd0   :  { %v5415_v43 = vadd.f32 %v768_v27, %v699_v37  ;;  %v564_v44 = vpop.f32.mrf.mxu0  ;;  %v3671_v27 = vld [vmem:[%s6579_s1 + $0x130] sm:$0xf] }
  0xd1   :  { %v5417_v46 = vadd.f32 %v633_v29, %v564_v44  ;;  %v4624_v29 = vld [vmem:[%s6579_s1 + $0x144] sm:$0xf0] }
  0xd2   :  { %6593 = vst [vmem:[#allocation10_spill] sm:$0xff] %v5415_v43  ;;  %v3672_v1 = vor.u32 %v4624_v29, %v3671_v27 }
  0xd3   :  { %603 = vmatmul.bf16.gmra.mxu0 %v5413_v38 }
  0xd4   :  { %741 = vmatmul.bf16.gmra.mxu2 %v5413_v38  ;;  %1093 = vmatpush.bf16.msra.mxu1 %v3672_v1 }
  0xd5   :  { %v778_v47 = vpop.f32.mrf.mxu3 }
  0xd6   :  { %v643_v52 = vpop.f32.mrf.mxu1 }
  0xd7   :  { %v702_v55 = vpop.f32.mrf.mxu2 }
  0xd8   :  { %v5421_v58 = vadd.f32 %v771_v41, %v702_v55  ;;  %v566_v59 = vpop.f32.mrf.mxu0 }
  0xd9   :  { %v5423_v63 = vadd.f32 %v635_v45, %v566_v59  ;;  %829 = vmatmul.bf16.gmra.mxu1 %v5088_v30 }
  0xda   :  { %6594 = vst [vmem:[#allocation11_spill] sm:$0xff] %v5421_v58  ;;  %3750 = vmatmul.msk.bf16.gmra.mxu3 %vm484_vm1, %v5005_v57 }
  0xdd   :  { %v781_v2 = vpop.f32.mrf.mxu3 }
  0xde   :  { %v645_v41 = vpop.f32.mrf.mxu1 }
  0xdf   :  { %v704_v7 = vpop.f32.mrf.mxu2 }
  0xe0   :  { %v5434_v45 = vadd.f32 %v773_v60, %v704_v7  ;;  %v569_v8 = vpop.f32.mrf.mxu0 }
  0xe1   :  { %v5436_v16 = vadd.f32 %v638_v4, %v569_v8 }
  0xe2   :  { %6595 = vst [vmem:[#allocation12_spill] sm:$0xff] %v5434_v45 }
  0xe3   :  { %962 = vmatmul.bf16.vlgmr.msrb.gmra.mxu0 %v5059_v18 }
  0xe4   :  { %3761 = vmatmul.msk.bf16.vlgmr.msrb.gmra.mxu2 %vm484_vm1, %v4923_v20 }
  0xe5   :  { %v783_v60 = vpop.f32.mrf.mxu3 }
  0xe6   :  { %v648_v25 = vpop.f32.mrf.mxu1 }
  0xe7   :  { %v707_v11 = vpop.f32.mrf.mxu2 }
  0xe8   :  { %v5447_v4 = vadd.f32 %v776_v32, %v707_v11  ;;  %v571_v26 = vpop.f32.mrf.mxu0  ;;  %v3647_v32 = vld [vmem:[%s6579_s1 + $0x100] sm:$0xf]  ;;  %v4615_v11 = vld [vmem:[%s6579_s1 + $0x104] sm:$0xf] }
  0xe9   :  { %v5449_v37 = vadd.f32 %v640_v35, %v571_v26  ;;  %834 = vmatmul.bf16.gmra.mxu1 %v5116_v39  ;;  %v4618_v35 = vld [vmem:[%s6579_s1 + $0x114] sm:$0xf0]  ;;  %v3649_v26 = vld [vmem:[%s6579_s1 + $0x118] sm:$0xf0] }
  0xea   :  { %6596 = vst [vmem:[#allocation13_spill] sm:$0xff] %v5447_v4  ;;  %3751 = vmatmul.msk.bf16.gmra.mxu3 %vm484_vm1, %v5070_v24  ;;  %v3648_v7 = vor.u32 %v4618_v35, %v3647_v32 }
  0xec   :  { %1094 = vmatpush.bf16.msra.mxu1 %v3648_v7 }
  0xed   :  { %v786_v44 = vpop.f32.mrf.mxu3 }
  0xee   :  { %v650_v55 = vpop.f32.mrf.mxu1 }
  0xef   :  { %v709_v59 = vpop.f32.mrf.mxu2 }
  0xf0   :  { %v5454_v27 = vadd.f32 %v778_v47, %v709_v59  ;;  %v574_v29 = vpop.f32.mrf.mxu0  ;;  %v3652_v59 = vor.u32 %v4615_v11, %v3649_v26 }
  0xf1   :  { %v5456_v1 = vadd.f32 %v643_v52, %v574_v29 }
  0xf2   :  { %6597 = vst [vmem:[#allocation14_spill] sm:$0xff] %v5454_v27  ;;  %1232 = vmatpush.bf16.msra.mxu0 %v3652_v59 }
  0xf3   :  { %967 = vmatmul.bf16.gmra.mxu0 %v5088_v30 }
  0xf4   :  { %3762 = vmatmul.msk.bf16.gmra.mxu2 %vm484_vm1, %v5005_v57 }
  0xf5   :  { %v788_v47 = vpop.f32.mrf.mxu3 }
  0xf6   :  { %v653_v8 = vpop.f32.mrf.mxu1 }
  0xf7   :  { %v712_v19 = vpop.f32.mrf.mxu2 }
  0xf8   :  { %v5467_v52 = vadd.f32 %v781_v2, %v712_v19  ;;  %v576_v22 = vpop.f32.mrf.mxu0 }
  0xf9   :  { %v5469_v10 = vadd.f32 %v645_v41, %v576_v22  ;;  %839 = vmatmul.bf16.gmra.mxu1 %v5150_v51 }
  0xfa   :  { %6598 = vst [vmem:[#allocation15_spill] sm:$0xff] %v5467_v52  ;;  %3752 = vmatmul.msk.bf16.gmra.mxu3 %vm484_vm1, %v5098_v33 }
  0xfd   :  { %v791_v29 = vpop.f32.mrf.mxu3 }
  0xfe   :  { %v655_v2 = vpop.f32.mrf.mxu1 }
  0xff   :  { %v714_v32 = vpop.f32.mrf.mxu2 }
 0x100   :  { %v5480_v41 = vadd.f32 %v783_v60, %v714_v32  ;;  %v579_v35 = vpop.f32.mrf.mxu0  ;;  %v3623_v60 = vld [vmem:[%s6579_s1 + $0xd0] sm:$0xf] }
 0x101   :  { %v5482_v7 = vadd.f32 %v648_v25, %v579_v35  ;;  %v4612_v25 = vld [vmem:[%s6579_s1 + $0xe4] sm:$0xf0] }
 0x102   :  { %6599 = vst [vmem:[#allocation16_spill] sm:$0xff] %v5480_v41  ;;  %v3624_v59 = vor.u32 %v4612_v25, %v3623_v60  ;;  %v3625_v41 = vld [vmem:[%s6579_s1 + $0xe8] sm:$0xf0] }
 0x103   :  { %972 = vmatmul.bf16.gmra.mxu0 %v5116_v39 }
 0x104   :  { %3763 = vmatmul.msk.bf16.gmra.mxu2 %vm484_vm1, %v5070_v24  ;;  %1095 = vmatpush.bf16.msra.mxu1 %v3624_v59 }
 0x105   :  { %v793_v19 = vpop.f32.mrf.mxu3 }
 0x106   :  { %v658_v22 = vpop.f32.mrf.mxu1 }
 0x107   :  { %v717_v52 = vpop.f32.mrf.mxu2 }
 0x108   :  { %v5487_v27 = vadd.f32 %v786_v44, %v717_v52  ;;  %v581_v11 = vpop.f32.mrf.mxu0 }
 0x109   :  { %v5489_v26 = vadd.f32 %v650_v55, %v581_v11  ;;  %844 = vmatmul.bf16.gmra.mxu1 %v5178_v61 }
 0x10a   :  { %6600 = vst [vmem:[#allocation17_spill] sm:$0xff] %v5487_v27  ;;  %3753 = vmatmul.msk.bf16.gmra.mxu3 %vm484_vm1, %v5126_v42  ;;  %v4609_v27 = vld [vmem:[%s6579_s1 + $0xd4] sm:$0xf] }
 0x10b   :  { %v3628_v4 = vor.u32 %v4609_v27, %v3625_v41 }
 0x10d   :  { %v796_v32 = vpop.f32.mrf.mxu3  ;;  %1233 = vmatpush.bf16.msra.mxu0 %v3628_v4 }
 0x10e   :  { %v660_v44 = vpop.f32.mrf.mxu1 }
 0x10f   :  { %v719_v52 = vpop.f32.mrf.mxu2 }
 0x110   :  { %v5500_v55 = vadd.f32 %v788_v47, %v719_v52  ;;  %v584_v35 = vpop.f32.mrf.mxu0 }
 0x111   :  { %v5502_v11 = vadd.f32 %v653_v8, %v584_v35 }
 0x112   :  { %6601 = vst [vmem:[#allocation18_spill] sm:$0xff] %v5500_v55 }
 0x113   :  { %977 = vmatmul.bf16.gmra.mxu0 %v5150_v51 }
 0x114   :  { %3764 = vmatmul.msk.bf16.gmra.mxu2 %vm484_vm1, %v5098_v33 }
 0x115   :  { %v798_v47 = vpop.f32.mrf.mxu3 }
 0x116   :  { %v663_v60 = vpop.f32.mrf.mxu1 }
 0x117   :  { %v722_v25 = vpop.f32.mrf.mxu2 }
 0x118   :  { %v5513_v8 = vadd.f32 %v791_v29, %v722_v25  ;;  %v586_v59 = vpop.f32.mrf.mxu0  ;;  %v3599_v29 = vld [vmem:[%s6579_s1 + $0xa0] sm:$0xf] }
 0x119   :  { %v5515_v52 = vadd.f32 %v655_v2, %v586_v59  ;;  %849 = vmatmul.bf16.gmra.mxu1 %v5206_v6  ;;  %v4606_v2 = vld [vmem:[%s6579_s1 + $0xb4] sm:$0xf0] }
 0x11a   :  { %6602 = vst [vmem:[#allocation19_spill] sm:$0xff] %v5513_v8  ;;  %3754 = vmatmul.msk.bf16.gmra.mxu3 %vm484_vm1, %v5160_v54  ;;  %v3600_v25 = vor.u32 %v4606_v2, %v3599_v29  ;;  %v4603_v29 = vld [vmem:[%s6579_s1 + $0xa4] sm:$0xf]  ;;  %v3601_v2 = vld [vmem:[%s6579_s1 + $0xb8] sm:$0xf0] }
 0x11c   :  { %1096 = vmatpush.bf16.msra.mxu1 %v3600_v25  ;;  %v3604_v25 = vor.u32 %v4603_v29, %v3601_v2 }
 0x11d   :  { %v801_v27 = vpop.f32.mrf.mxu3 }
 0x11e   :  { %v665_v41 = vpop.f32.mrf.mxu1  ;;  %1234 = vmatpush.bf16.msra.mxu0 %v3604_v25 }
 0x11f   :  { %v724_v35 = vpop.f32.mrf.mxu2 }
 0x120   :  { %v5520_v55 = vadd.f32 %v793_v19, %v724_v35  ;;  %v589_v45 = vpop.f32.mrf.mxu0 }
 0x121   :  { %v5522_v4 = vadd.f32 %v658_v22, %v589_v45 }
 0x122   :  { %6603 = vst [vmem:[#allocation20_spill] sm:$0xff] %v5520_v55 }
 0x123   :  { %982 = vmatmul.bf16.gmra.mxu0 %v5178_v61 }
 0x124   :  { %3765 = vmatmul.msk.bf16.gmra.mxu2 %vm484_vm1, %v5126_v42 }
 0x125   :  { %v803_v19 = vpop.f32.mrf.mxu3 }
 0x126   :  { %v668_v59 = vpop.f32.mrf.mxu1 }
 0x127   :  { %v727_v35 = vpop.f32.mrf.mxu2 }
 0x128   :  { %v5533_v45 = vadd.f32 %v796_v32, %v727_v35  ;;  %v591_v22 = vpop.f32.mrf.mxu0 }
 0x129   :  { %v5535_v55 = vadd.f32 %v660_v44, %v591_v22  ;;  %854 = vmatmul.bf16.gmra.mxu1 %v5234_v15 }
 0x12a   :  { %6604 = vst [vmem:[#allocation21_spill] sm:$0xff] %v5533_v45  ;;  %3755 = vmatmul.msk.bf16.gmra.mxu3 %vm484_vm1, %v5188_v0 }
 0x12d   :  { %v806_v8 = vpop.f32.mrf.mxu3 }
 0x12e   :  { %v670_v32 = vpop.f32.mrf.mxu1 }
 0x12f   :  { %v729_v35 = vpop.f32.mrf.mxu2 }
 0x130   :  { %v5546_v44 = vadd.f32 %v798_v47, %v729_v35  ;;  %v594_v22 = vpop.f32.mrf.mxu0  ;;  %v3575_v47 = vld [vmem:[%s6579_s1 + $0x70] sm:$0xf] }
 0x131   :  { %v5548_v45 = vadd.f32 %v663_v60, %v594_v22  ;;  %v4600_v60 = vld [vmem:[%s6579_s1 + $0x84] sm:$0xf0] }
 0x132   :  { %6605 = vst [vmem:[#allocation22_spill] sm:$0xff] %v5546_v44  ;;  %v3576_v25 = vor.u32 %v4600_v60, %v3575_v47 }
 0x133   :  { %987 = vmatmul.bf16.gmra.mxu0 %v5206_v6 }
 0x134   :  { %3766 = vmatmul.msk.bf16.gmra.mxu2 %vm484_vm1, %v5160_v54  ;;  %1097 = vmatpush.bf16.msra.mxu1 %v3576_v25 }
 0x135   :  { %v808_v58 = vpop.f32.mrf.mxu3 }
 0x136   :  { %v673_v43 = vpop.f32.mrf.mxu1 }
 0x137   :  { %v732_v12 = vpop.f32.mrf.mxu2 }
 0x138   :  { %v5553_v49 = vadd.f32 %v801_v27, %v732_v12  ;;  %v596_v29 = vpop.f32.mrf.mxu0 }
 0x139   :  { %v5555_v2 = vadd.f32 %v665_v41, %v596_v29  ;;  %859 = vmatmul.bf16.gmra.mxu1 %v5262_v31  ;;  %v4597_v29 = vld [vmem:[%s6579_s1 + $0x74] sm:$0xf] }
 0x13a   :  { %6606 = vst [vmem:[#allocation23_spill] sm:$0xff] %v5553_v49  ;;  %3756 = vmatmul.msk.bf16.gmra.mxu3 %vm484_vm1, %v5216_v9  ;;  %v3577_v49 = vld [vmem:[%s6579_s1 + $0x88] sm:$0xf0] }
 0x13b   :  { %v3580_v34 = vor.u32 %v4597_v29, %v3577_v49 }
 0x13d   :  { %v811_v35 = vpop.f32.mrf.mxu3  ;;  %1235 = vmatpush.bf16.msra.mxu0 %v3580_v34 }
 0x13e   :  { %v675_v12 = vpop.f32.mrf.mxu1 }
 0x13f   :  { %v734_v27 = vpop.f32.mrf.mxu2 }
 0x140   :  { %v5566_v41 = vadd.f32 %v803_v19, %v734_v27  ;;  %v599_v22 = vpop.f32.mrf.mxu0 }
 0x141   :  { %v5574_v44 = vadd.f32 %v668_v59, %v599_v22 }
 0x142   :  { %6607 = vst [vmem:[#allocation24_spill] sm:$0xff] %v5566_v41 }
 0x143   :  { %992 = vmatmul.bf16.gmra.mxu0 %v5234_v15 }
 0x144   :  { %3767 = vmatmul.msk.bf16.gmra.mxu2 %vm484_vm1, %v5188_v0 }
 0x145   :  { %v813_v19 = vpop.f32.mrf.mxu3 }
 0x146   :  { %v825_v47 = vpop.f32.mrf.mxu1 }
 0x147   :  { %v737_v60 = vpop.f32.mrf.mxu2 }
 0x148   :  { %v5579_v25 = vadd.f32 %v806_v8, %v737_v60  ;;  %v601_v27 = vpop.f32.mrf.mxu0 }
 0x149   :  { %v5581_v41 = vadd.f32 %v670_v32, %v601_v27  ;;  %864 = vmatmul.bf16.gmra.mxu1 %v5296_v50 }
 0x14a   :  { %6608 = vst [vmem:[#allocation25_spill] sm:$0xff] %v5579_v25  ;;  %3757 = vmatmul.msk.bf16.gmra.mxu3 %vm484_vm1, %v5250_v23 }
 0x14d   :  { %v894_v49 = vpop.f32.mrf.mxu3 }
 0x14e   :  { %v5586_v59 = vadd.f32 %v894_v49, %v825_v47  ;;  %v827_v22 = vpop.f32.mrf.mxu1  ;;  %v3551_v47 = vld [vmem:[%s6579_s1 + $0x40] sm:$0xf] }
 0x14f   :  { %v739_v29 = vpop.f32.mrf.mxu2 }
 0x150   :  { %6609 = vst [vmem:[#allocation26_spill] sm:$0xff] %v5586_v59  ;;  %v5588_v14 = vadd.f32 %v808_v58, %v739_v29  ;;  %v604_v34 = vpop.f32.mrf.mxu0  ;;  %v4594_v58 = vld [vmem:[%s6579_s1 + $0x54] sm:$0xf0] }
 0x151   :  { %v5590_v3 = vadd.f32 %v673_v43, %v604_v34  ;;  %v3552_v43 = vor.u32 %v4594_v58, %v3551_v47 }
 0x152   :  { %6610 = vst [vmem:[#allocation27_spill] sm:$0xff] %v5588_v14 }
 0x153   :  { %997 = vmatmul.bf16.gmra.mxu0 %v5262_v31  ;;  %1098 = vmatpush.bf16.msra.mxu1 %v3552_v43  ;;  %v3527_v43 = vld [vmem:[%s6579_s1 + $0x10] sm:$0xf] }
 0x154   :  { %3768 = vmatmul.msk.bf16.gmra.mxu2 %vm484_vm1, %v5216_v9 }
 0x155   :  { %v896_v8 = vpop.f32.mrf.mxu3 }
 0x156   :  { %v5595_v32 = vadd.f32 %v896_v8, %v827_v22  ;;  %v830_v60 = vpop.f32.mrf.mxu1  ;;  %v4591_v22 = vld [vmem:[%s6579_s1 + $0x44] sm:$0xf]  ;;  %v3553_v8 = vld [vmem:[%s6579_s1 + $0x58] sm:$0xf0] }
 0x157   :  { %v742_v27 = vpop.f32.mrf.mxu2  ;;  %v3556_v47 = vor.u32 %v4591_v22, %v3553_v8  ;;  %v4588_v22 = vld [vmem:[%s6579_s1 + $0x24] sm:$0xf0] }
 0x158   :  { %6611 = vst [vmem:[#allocation28_spill] sm:$0xff] %v5595_v32  ;;  %v5603_v49 = vadd.f32 %v811_v35, %v742_v27  ;;  %v606_v29 = vpop.f32.mrf.mxu0  ;;  %v3528_v8 = vor.u32 %v4588_v22, %v3527_v43 }
 0x159   :  { %v5605_v34 = vadd.f32 %v675_v12, %v606_v29  ;;  %869 = vmatmul.bf16.gmra.mxu1 %v5330_v13  ;;  %1236 = vmatpush.bf16.msra.mxu0 %v3556_v47 }
 0x15a   :  { %6612 = vst [vmem:[#allocation29_spill] sm:$0xff] %v5603_v49  ;;  %3758 = vmatmul.msk.bf16.gmra.mxu3 %vm484_vm1, %v5278_v40  ;;  %1099 = vmatpush.bf16.msra.mxu1 %v3528_v8 }
 0x15d   :  { %v899_v35 = vpop.f32.mrf.mxu3 }
 0x15e   :  { %v5616_v58 = vadd.f32 %v899_v35, %v830_v60  ;;  %v832_v12 = vpop.f32.mrf.mxu1 }
 0x15f   :  { %v744_v27 = vpop.f32.mrf.mxu2 }
 0x160   :  { %6613 = vst [vmem:[#allocation30_spill] sm:$0xff] %v5616_v58  ;;  %v5618_v29 = vadd.f32 %v813_v19, %v744_v27  ;;  %v963_v49 = vpop.f32.mrf.mxu0 }
 0x162   :  { %6614 = vst [vmem:[#allocation31_spill] sm:$0xff] %v5618_v29 }
 0x163   :  { %1002 = vmatmul.bf16.gmra.mxu0 %v5296_v50 }
 0x164   :  { %3769 = vmatmul.msk.bf16.gmra.mxu2 %vm484_vm1, %v5250_v23 }
 0x165   :  { %v901_v60 = vpop.f32.mrf.mxu3 }
 0x166   :  { %v5629_v47 = vadd.f32 %v901_v60, %v832_v12  ;;  %v835_v19 = vpop.f32.mrf.mxu1 }
 0x167   :  { %v1032_v35 = vpop.f32.mrf.mxu2 }
 0x168   :  { %v1033_v27 = vadd.f32 %v1032_v35, %v963_v49  ;;  %v965_v29 = vpop.f32.mrf.mxu0 }
 0x169   :  { %874 = vmatmul.bf16.gmra.mxu1 %v5372_v48 }
 0x16a   :  { %v1368_v14 = vmax.f32 %v5298_v53, %v1033_v27  ;;  %3759 = vmatmul.msk.bf16.gmra.mxu3 %vm484_vm1, %v5314_v62 }
 0x16d   :  { %v904_v25 = vpop.f32.mrf.mxu3 }
 0x16e   :  { %v5635_v58 = vadd.f32 %v904_v25, %v835_v19  ;;  %v837_v32 = vpop.f32.mrf.mxu1  ;;  %v4585_v25 = vld [vmem:[%s6579_s1 + $0x14] sm:$0xf] }
 0x16f   :  { %v1034_v59 = vpop.f32.mrf.mxu2 }
 0x170   :  { %6615 = vst [vmem:[#allocation32_spill] sm:$0xff] %v5635_v58  ;;  %v1035_v43 = vadd.f32 %v1034_v59, %v965_v29  ;;  %v968_v12 = vpop.f32.mrf.mxu0  ;;  %v3529_v59 = vld [vmem:[%s6579_s1 + $0x28] sm:$0xf0] }
 0x171   :  { %v3532_v29 = vor.u32 %v4585_v25, %v3529_v59 }
 0x172   :  { %v1371_v22 = vmax.f32 %v5318_v5, %v1035_v43 }
 0x173   :  { %1007 = vmatmul.bf16.gmra.mxu0 %v5330_v13 }
 0x174   :  { %v5639_v49 = vmax.f32 %v1368_v14, %v1371_v22  ;;  %3770 = vmatmul.msk.bf16.gmra.mxu2 %vm484_vm1, %v5278_v40  ;;  %1237 = vmatpush.bf16.msra.mxu0 %v3532_v29 }
 0x175   :  { %v906_v53 = vpop.f32.mrf.mxu3 }
 0x176   :  { %v5643_v60 = vadd.f32 %v906_v53, %v837_v32  ;;  %v840_v8 = vpop.f32.mrf.mxu1 }
 0x177   :  { %v1037_v5 = vpop.f32.mrf.mxu2 }
 0x178   :  { %6616 = vst [vmem:[#allocation33_spill] sm:$0xff] %v5643_v60  ;;  %v1038_v19 = vadd.f32 %v1037_v5, %v968_v12  ;;  %v970_v14 = vpop.f32.mrf.mxu0 }
 0x179   :  { %879 = vmatmul.bf16.gmra.mxu1 %v5413_v38 }
 0x17a   :  { %v1374_v35 = vmax.f32 %v5334_v17, %v1038_v19  ;;  %3760 = vmatmul.msk.bf16.gmra.mxu3 %vm484_vm1, %v5350_v28 }
 0x17d   :  { %v909_v32 = vpop.f32.mrf.mxu3 }
 0x17e   :  { %v5655_v27 = vadd.f32 %v909_v32, %v840_v8  ;;  %v842_v43 = vpop.f32.mrf.mxu1 }
 0x17f   :  { %v1039_v22 = vpop.f32.mrf.mxu2 }
 0x180   :  { %v1040_v53 = vadd.f32 %v1039_v22, %v970_v14  ;;  %v973_v60 = vpop.f32.mrf.mxu0 }
 0x182   :  { %v1377_v58 = vmax.f32 %v5354_v36, %v1040_v53 }
 0x183   :  { %1012 = vmatmul.bf16.gmra.mxu0 %v5372_v48 }
 0x184   :  { %v5659_v12 = vmax.f32 %v1374_v35, %v1377_v58  ;;  %3771 = vmatmul.msk.bf16.gmra.mxu2 %vm484_vm1, %v5314_v62 }
 0x185   :  { %v911_v17 = vpop.f32.mrf.mxu3 }
 0x186   :  { %v5663_v25 = vadd.f32 %v911_v17, %v842_v43  ;;  %v845_v59 = vpop.f32.mrf.mxu1 }
 0x187   :  { %v1042_v5 = vpop.f32.mrf.mxu2 }
 0x188   :  { %v1043_v8 = vadd.f32 %v1042_v5, %v973_v60  ;;  %v975_v29 = vpop.f32.mrf.mxu0 }
 0x189   :  { %1100 = vmatmul.bf16.vlgmr.msra.gmra.mxu1 %v5059_v18 }
 0x18a   :  { %v1380_v19 = vmax.f32 %v5377_v56, %v1043_v8  ;;  %3773 = vmatmul.msk.bf16.vlgmr.msra.gmra.mxu3 %vm484_vm1, %v4923_v20 }
 0x18d   :  { %v914_v36 = vpop.f32.mrf.mxu3 }
 0x18e   :  { %v5669_v58 = vadd.f32 %v914_v36, %v845_v59  ;;  %v847_v14 = vpop.f32.mrf.mxu1 }
 0x18f   :  { %v1044_v35 = vpop.f32.mrf.mxu2 }
 0x190   :  { %v1045_v32 = vadd.f32 %v1044_v35, %v975_v29  ;;  %v978_v22 = vpop.f32.mrf.mxu0 }
 0x192   :  { %v1383_v43 = vmax.f32 %v5396_v21, %v1045_v32 }
 0x193   :  { %1017 = vmatmul.bf16.gmra.mxu0 %v5413_v38 }
 0x194   :  { %v5673_v60 = vmax.f32 %v1380_v19, %v1383_v43  ;;  %3772 = vmatmul.msk.bf16.gmra.mxu2 %vm484_vm1, %v5350_v28 }
 0x195   :  { %v916_v56 = vpop.f32.mrf.mxu3 }
 0x196   :  { %v5677_v53 = vadd.f32 %v916_v56, %v847_v14  ;;  %v850_v17 = vpop.f32.mrf.mxu1 }
 0x197   :  { %v1047_v5 = vpop.f32.mrf.mxu2 }
 0x198   :  { %v1048_v59 = vadd.f32 %v1047_v5, %v978_v22  ;;  %v980_v8 = vpop.f32.mrf.mxu0 }
 0x199   :  { %1105 = vmatmul.bf16.gmra.mxu1 %v5088_v30 }
 0x19a   :  { %v1386_v29 = vmax.f32 %v5417_v46, %v1048_v59  ;;  %3774 = vmatmul.msk.bf16.gmra.mxu3 %vm484_vm1, %v5005_v57 }
 0x19d   :  { %v919_v21 = vpop.f32.mrf.mxu3 }
 0x19e   :  { %v5683_v19 = vadd.f32 %v919_v21, %v850_v17  ;;  %v852_v36 = vpop.f32.mrf.mxu1  ;;  %v4676_v17 = vld [vmem:[%s6580_s2 + $0x138] sm:$0xff] }
 0x19f   :  { %v1049_v35 = vpop.f32.mrf.mxu2  ;;  %1870 = vmatpush.bf16.msrb.mxu3 %v4676_v17 }
 0x1a0   :  { %v1050_v32 = vadd.f32 %v1049_v35, %v980_v8  ;;  %v983_v43 = vpop.f32.mrf.mxu0  ;;  %v4684_v35 = vld [vmem:[%s6580_s2 + $0x178] sm:$0xff] }
 0x1a1   :  { %1899 = vmatpush.bf16.msrb.mxu0 %v4684_v35 }
 0x1a2   :  { %v1389_v14 = vmax.f32 %v5423_v63, %v1050_v32 }
 0x1a3   :  { %1238 = vmatmul.bf16.vlgmr.msra.gmra.mxu0 %v5059_v18 }
 0x1a4   :  { %v5687_v22 = vmax.f32 %v1386_v29, %v1389_v14  ;;  %3785 = vmatmul.msk.bf16.vlgmr.msra.gmra.mxu2 %vm484_vm1, %v4923_v20 }
 0x1a5   :  { %v921_v46 = vpop.f32.mrf.mxu3 }
 0x1a6   :  { %v5691_v56 = vadd.f32 %v921_v46, %v852_v36  ;;  %v855_v5 = vpop.f32.mrf.mxu1  ;;  %v4668_v36 = vld [vmem:[%s6580_s2 + $0xf8] sm:$0xff] }
 0x1a7   :  { %v1052_v59 = vpop.f32.mrf.mxu2  ;;  %1841 = vmatpush.bf16.msrb.mxu1 %v4668_v36 }
 0x1a8   :  { %v1053_v8 = vadd.f32 %v1052_v59, %v983_v43  ;;  %v985_v21 = vpop.f32.mrf.mxu0 }
 0x1a9   :  { %1110 = vmatmul.bf16.gmra.mxu1 %v5116_v39 }
 0x1aa   :  { %v1392_v18 = vmax.f32 %v5436_v16, %v1053_v8  ;;  %3775 = vmatmul.msk.bf16.gmra.mxu3 %vm484_vm1, %v5070_v24 }
 0x1ad   :  { %v924_v20 = vpop.f32.mrf.mxu3 }
 0x1ae   :  { %v5700_v63 = vadd.f32 %v924_v20, %v855_v5  ;;  %v857_v29 = vpop.f32.mrf.mxu1 }
 0x1af   :  { %v1054_v32 = vpop.f32.mrf.mxu2 }
 0x1b0   :  { %6617 = vst [vmem:[#allocation34_spill] sm:$0xff] %v5700_v63  ;;  %v1055_v43 = vadd.f32 %v1054_v32, %v985_v21  ;;  %v988_v14 = vpop.f32.mrf.mxu0 }
 0x1b2   :  { %v1395_v16 = vmax.f32 %v5449_v37, %v1055_v43 }
 0x1b3   :  { %1243 = vmatmul.bf16.gmra.mxu0 %v5088_v30 }
 0x1b4   :  { %v5710_v46 = vmax.f32 %v1392_v18, %v1395_v16  ;;  %3786 = vmatmul.msk.bf16.gmra.mxu2 %vm484_vm1, %v5005_v57  ;;  %v4675_v57 = vld [vmem:[%s6580_s2 + $0x130] sm:$0xff] }
 0x1b5   :  { %v926_v5 = vpop.f32.mrf.mxu3  ;;  %1871 = vmatpush.bf16.msrb.mxu3 %v4675_v57 }
 0x1b6   :  { %v5714_v17 = vadd.f32 %v926_v5, %v857_v29  ;;  %v860_v59 = vpop.f32.mrf.mxu1  ;;  %v4667_v5 = vld [vmem:[%s6580_s2 + $0xf0] sm:$0xff] }
 0x1b7   :  { %v1057_v8 = vpop.f32.mrf.mxu2  ;;  %1842 = vmatpush.bf16.msrb.mxu1 %v4667_v5 }
 0x1b8   :  { %v1058_v20 = vadd.f32 %v1057_v8, %v988_v14  ;;  %v990_v63 = vpop.f32.mrf.mxu0 }
 0x1b9   :  { %1115 = vmatmul.bf16.gmra.mxu1 %v5150_v51 }
 0x1ba   :  { %v1398_v21 = vmax.f32 %v5456_v1, %v1058_v20  ;;  %3776 = vmatmul.msk.bf16.gmra.mxu3 %vm484_vm1, %v5098_v33 }
 0x1bd   :  { %v929_v30 = vpop.f32.mrf.mxu3 }
 0x1be   :  { %v5720_v37 = vadd.f32 %v929_v30, %v860_v59  ;;  %v862_v18 = vpop.f32.mrf.mxu1 }
 0x1bf   :  { %v1059_v29 = vpop.f32.mrf.mxu2 }
 0x1c0   :  { %v1060_v36 = vadd.f32 %v1059_v29, %v990_v63  ;;  %v993_v35 = vpop.f32.mrf.mxu0  ;;  %v4683_v63 = vld [vmem:[%s6580_s2 + $0x170] sm:$0xff] }
 0x1c1   :  { %1900 = vmatpush.bf16.msrb.mxu0 %v4683_v63 }
 0x1c2   :  { %v1401_v32 = vmax.f32 %v5469_v10, %v1060_v36 }
 0x1c3   :  { %1248 = vmatmul.bf16.gmra.mxu0 %v5116_v39 }
 0x1c4   :  { %v5727_v1 = vmax.f32 %v1398_v21, %v1401_v32  ;;  %3787 = vmatmul.msk.bf16.gmra.mxu2 %vm484_vm1, %v5070_v24 }
 0x1c5   :  { %v931_v43 = vpop.f32.mrf.mxu3 }
 0x1c6   :  { %v5731_v14 = vadd.f32 %v931_v43, %v862_v18  ;;  %v865_v16 = vpop.f32.mrf.mxu1  ;;  %v4674_v43 = vld [vmem:[%s6580_s2 + $0x128] sm:$0xff] }
 0x1c7   :  { %v1062_v10 = vpop.f32.mrf.mxu2  ;;  %1872 = vmatpush.bf16.msrb.mxu3 %v4674_v43 }
 0x1c8   :  { %v1063_v59 = vadd.f32 %v1062_v10, %v993_v35  ;;  %v995_v39 = vpop.f32.mrf.mxu0 }
 0x1c9   :  { %1120 = vmatmul.bf16.gmra.mxu1 %v5178_v61 }
 0x1ca   :  { %v1404_v24 = vmax.f32 %v5482_v7, %v1063_v59  ;;  %3777 = vmatmul.msk.bf16.gmra.mxu3 %vm484_vm1, %v5126_v42  ;;  %v4666_v59 = vld [vmem:[%s6580_s2 + $0xe8] sm:$0xff] }
 0x1cb   :  { %1843 = vmatpush.bf16.msrb.mxu1 %v4666_v59 }
 0x1cd   :  { %v934_v8 = vpop.f32.mrf.mxu3 }
 0x1ce   :  { %v5743_v20 = vadd.f32 %v934_v8, %v865_v16  ;;  %v867_v21 = vpop.f32.mrf.mxu1 }
 0x1cf   :  { %v1064_v30 = vpop.f32.mrf.mxu2 }
 0x1d0   :  { %v1065_v18 = vadd.f32 %v1064_v30, %v995_v39  ;;  %v998_v57 = vpop.f32.mrf.mxu0  ;;  %v4682_v39 = vld [vmem:[%s6580_s2 + $0x168] sm:$0xff] }
 0x1d1   :  { %1901 = vmatpush.bf16.msrb.mxu0 %v4682_v39 }
 0x1d2   :  { %v1407_v29 = vmax.f32 %v5489_v26, %v1065_v18 }
 0x1d3   :  { %1253 = vmatmul.bf16.gmra.mxu0 %v5150_v51 }
 0x1d4   :  { %v5747_v36 = vmax.f32 %v1404_v24, %v1407_v29  ;;  %3788 = vmatmul.msk.bf16.gmra.mxu2 %vm484_vm1, %v5098_v33 }
 0x1d5   :  { %v936_v7 = vpop.f32.mrf.mxu3 }
 0x1d6   :  { %v5751_v35 = vadd.f32 %v936_v7, %v867_v21  ;;  %v870_v32 = vpop.f32.mrf.mxu1  ;;  %v4644_v7 = vld [vmem:[%s6580_s2 + $0x38] sm:$0xff] }
 0x1d7   :  { %v1067_v16 = vpop.f32.mrf.mxu2  ;;  %2101 = vmatpush.bf16.msrb.mxu2 %v4644_v7 }
 0x1d8   :  { %v1068_v5 = vadd.f32 %v1067_v16, %v998_v57  ;;  %v1000_v63 = vpop.f32.mrf.mxu0 }
 0x1d9   :  { %1125 = vmatmul.bf16.gmra.mxu1 %v5206_v6 }
 0x1da   :  { %v1410_v51 = vmax.f32 %v5502_v11, %v1068_v5  ;;  %3778 = vmatmul.msk.bf16.gmra.mxu3 %vm484_vm1, %v5160_v54 }
 0x1dd   :  { %v939_v33 = vpop.f32.mrf.mxu3 }
 0x1de   :  { %v5760_v26 = vadd.f32 %v939_v33, %v870_v32  ;;  %v872_v10 = vpop.f32.mrf.mxu1 }
 0x1df   :  { %v1069_v24 = vpop.f32.mrf.mxu2 }
 0x1e0   :  { %v1070_v8 = vadd.f32 %v1069_v24, %v1000_v63  ;;  %v1003_v21 = vpop.f32.mrf.mxu0 }
 0x1e2   :  { %v1413_v11 = vmax.f32 %v5515_v52, %v1070_v8 }
 0x1e3   :  { %1258 = vmatmul.bf16.gmra.mxu0 %v5178_v61 }
 0x1e4   :  { %v5770_v30 = vmax.f32 %v1410_v51, %v1413_v11  ;;  %3789 = vmatmul.msk.bf16.gmra.mxu2 %vm484_vm1, %v5126_v42 }
 0x1e5   :  { %v941_v18 = vpop.f32.mrf.mxu3 }
 0x1e6   :  { %v5774_v57 = vadd.f32 %v941_v18, %v872_v10  ;;  %v875_v29 = vpop.f32.mrf.mxu1  ;;  %v4673_v10 = vld [vmem:[%s6580_s2 + $0x120] sm:$0xff] }
 0x1e7   :  { %v1072_v32 = vpop.f32.mrf.mxu2  ;;  %1873 = vmatpush.bf16.msrb.mxu3 %v4673_v10 }
 0x1e8   :  { %v1073_v43 = vadd.f32 %v1072_v32, %v1003_v21  ;;  %v1005_v16 = vpop.f32.mrf.mxu0 }
 0x1e9   :  { %1130 = vmatmul.bf16.gmra.mxu1 %v5234_v15 }
 0x1ea   :  { %v1416_v61 = vmax.f32 %v5522_v4, %v1073_v43  ;;  %3779 = vmatmul.msk.bf16.gmra.mxu3 %vm484_vm1, %v5188_v0 }
 0x1ed   :  { %v944_v42 = vpop.f32.mrf.mxu3 }
 0x1ee   :  { %v5783_v52 = vadd.f32 %v944_v42, %v875_v29  ;;  %v877_v5 = vpop.f32.mrf.mxu1 }
 0x1ef   :  { %v1074_v63 = vpop.f32.mrf.mxu2 }
 0x1f0   :  { %v1075_v51 = vadd.f32 %v1074_v63, %v1005_v16  ;;  %v1008_v33 = vpop.f32.mrf.mxu0  ;;  %v4665_v16 = vld [vmem:[%s6580_s2 + $0xe0] sm:$0xff] }
 0x1f1   :  { %1844 = vmatpush.bf16.msrb.mxu1 %v4665_v16 }
 0x1f2   :  { %v1419_v59 = vmax.f32 %v5535_v55, %v1075_v51 }
 0x1f3   :  { %1263 = vmatmul.bf16.gmra.mxu0 %v5206_v6 }
 0x1f4   :  { %v5790_v4 = vmax.f32 %v1416_v61, %v1419_v59  ;;  %3790 = vmatmul.msk.bf16.gmra.mxu2 %vm484_vm1, %v5160_v54  ;;  %v4681_v61 = vld [vmem:[%s6580_s2 + $0x160] sm:$0xff] }
 0x1f5   :  { %v946_v39 = vpop.f32.mrf.mxu3  ;;  %1902 = vmatpush.bf16.msrb.mxu0 %v4681_v61 }
 0x1f6   :  { %v5794_v24 = vadd.f32 %v946_v39, %v877_v5  ;;  %v880_v8 = vpop.f32.mrf.mxu1 }
 0x1f7   :  { %v1077_v21 = vpop.f32.mrf.mxu2 }
 0x1f8   :  { %v1078_v11 = vadd.f32 %v1077_v21, %v1008_v33  ;;  %v1010_v18 = vpop.f32.mrf.mxu0 }
 0x1f9   :  { %1135 = vmatmul.bf16.gmra.mxu1 %v5262_v31 }
 0x1fa   :  { %v1422_v29 = vmax.f32 %v5548_v45, %v1078_v11  ;;  %3780 = vmatmul.msk.bf16.gmra.mxu3 %vm484_vm1, %v5216_v9  ;;  %v4643_v45 = vld [vmem:[%s6580_s2 + $0x30] sm:$0xff] }
 0x1fb   :  { %2102 = vmatpush.bf16.msrb.mxu2 %v4643_v45 }
 0x1fd   :  { %v949_v6 = vpop.f32.mrf.mxu3 }
 0x1fe   :  { %v5800_v55 = vadd.f32 %v949_v6, %v880_v8  ;;  %v882_v7 = vpop.f32.mrf.mxu1 }
 0x1ff   :  { %v1079_v32 = vpop.f32.mrf.mxu2 }
 0x200   :  { %v1080_v54 = vadd.f32 %v1079_v32, %v1010_v18  ;;  %v1013_v43 = vpop.f32.mrf.mxu0  ;;  %v6618_v18 = vld [vmem:[#allocation5_spill] sm:$0xff]  ;;  %v4664_v32 = vld [vmem:[%s6580_s2 + $0xd8] sm:$0xff] }
 0x201   :  { %1845 = vmatpush.bf16.msrb.mxu1 %v4664_v32 }
 0x202   :  { %v1425_v42 = vmax.f32 %v5555_v2, %v1080_v54 }
 0x203   :  { %1268 = vmatmul.bf16.gmra.mxu0 %v5234_v15 }
 0x204   :  { %v5813_v5 = vmax.f32 %v1422_v29, %v1425_v42  ;;  %3791 = vmatmul.msk.bf16.gmra.mxu2 %vm484_vm1, %v5188_v0 }
 0x205   :  { %v951_v63 = vpop.f32.mrf.mxu3 }
 0x206   :  { %v5817_v51 = vadd.f32 %v951_v63, %v882_v7  ;;  %v1101_v33 = vpop.f32.mrf.mxu1  ;;  %v4672_v7 = vld [vmem:[%s6580_s2 + $0x118] sm:$0xff]  ;;  %v6619_v63 = vld [vmem:[#allocation6_spill] sm:$0xff] }
 0x207   :  { %v1082_v10 = vpop.f32.mrf.mxu2  ;;  %1874 = vmatpush.bf16.msrb.mxu3 %v4672_v7 }
 0x208   :  { %v1083_v59 = vadd.f32 %v1082_v10, %v1013_v43  ;;  %v1015_v39 = vpop.f32.mrf.mxu0 }
 0x209   :  { %1140 = vmatmul.bf16.gmra.mxu1 %v5296_v50 }
 0x20a   :  { %v1428_v2 = vmax.f32 %v5574_v44, %v1083_v59  ;;  %3781 = vmatmul.msk.bf16.gmra.mxu3 %vm484_vm1, %v5250_v23  ;;  %v4680_v44 = vld [vmem:[%s6580_s2 + $0x158] sm:$0xff] }
 0x20b   :  { %1903 = vmatpush.bf16.msrb.mxu0 %v4680_v44 }
 0x20d   :  { %v1170_v15 = vpop.f32.mrf.mxu3 }
 0x20e   :  { %v1171_v8 = vadd.f32 %v1170_v15, %v1101_v33  ;;  %v1103_v21 = vpop.f32.mrf.mxu1  ;;  %v4663_v15 = vld [vmem:[%s6580_s2 + $0xd0] sm:$0xff] }
 0x20f   :  { %v1084_v11 = vpop.f32.mrf.mxu2  ;;  %1846 = vmatpush.bf16.msrb.mxu1 %v4663_v15  ;;  %v4679_v15 = vld [vmem:[%s6580_s2 + $0x150] sm:$0xff] }
 0x210   :  { %v1369_v0 = vmax.f32 %v6618_v18, %v1171_v8  ;;  %v1085_v29 = vadd.f32 %v1084_v11, %v1015_v39  ;;  %v1018_v6 = vpop.f32.mrf.mxu0  ;;  %v4671_v8 = vld [vmem:[%s6580_s2 + $0x110] sm:$0xff]  ;;  %1904 = vmatpush.bf16.msrb.mxu0 %v4679_v15  ;;  %v4678_v15 = vld [vmem:[%s6580_s2 + $0x148] sm:$0xff] }
 0x211   :  { %1875 = vmatpush.bf16.msrb.mxu3 %v4671_v8 }
 0x212   :  { %v1431_v54 = vmax.f32 %v5581_v41, %v1085_v29  ;;  %v4662_v29 = vld [vmem:[%s6580_s2 + $0xc8] sm:$0xff] }
 0x213   :  { %1273 = vmatmul.bf16.gmra.mxu0 %v5262_v31  ;;  %v1476_v31 = vmax.f32 %v5639_v49, 0.0  ;;  %v4642_v49 = vld [vmem:[%s6580_s2 + $0x28] sm:$0xff]  ;;  %1847 = vmatpush.bf16.msrb.mxu1 %v4662_v29 }
 0x214   :  { %v5835_v43 = vmax.f32 %v1428_v2, %v1431_v54  ;;  %3792 = vmatmul.msk.bf16.gmra.mxu2 %vm484_vm1, %v5216_v9  ;;  %1905 = vmatpush.bf16.msrb.mxu0 %v4678_v15 }
 0x215   :  { %v1172_v16 = vpop.f32.mrf.mxu3  ;;  %2103 = vmatpush.bf16.msrb.mxu2 %v4642_v49 }
 0x216   :  { %v1173_v61 = vadd.f32 %v1172_v16, %v1103_v21  ;;  %v1106_v45 = vpop.f32.mrf.mxu1  ;;  %v4661_v16 = vld [vmem:[%s6580_s2 + $0xc0] sm:$0xff] }
 0x217   :  { %v1087_v42 = vpop.f32.mrf.mxu2  ;;  %1848 = vmatpush.bf16.msrb.mxu1 %v4661_v16 }
 0x218   :  { %v1372_v33 = vmax.f32 %v6619_v63, %v1173_v61  ;;  %v1088_v10 = vadd.f32 %v1087_v42, %v1018_v6  ;;  %v1020_v59 = vpop.f32.mrf.mxu0  ;;  %v4670_v6 = vld [vmem:[%s6580_s2 + $0x108] sm:$0xff] }
 0x219   :  { %1145 = vmatmul.bf16.gmra.mxu1 %v5330_v13  ;;  %1876 = vmatpush.bf16.msrb.mxu3 %v4670_v6 }
 0x21a   :  { %v1441_v41 = vmax.f32 %v1369_v0, %v1372_v33  ;;  %v1434_v39 = vmax.f32 %v5590_v3, %v1088_v10  ;;  %3782 = vmatmul.msk.bf16.gmra.mxu3 %vm484_vm1, %v5278_v40  ;;  %v6621_v33 = vld [vmem:[#allocation8_spill] sm:$0xff] }
 0x21c   :  { %v1477_v9 = vmax.f32 %v1441_v41, 0.0 }
 0x21d   :  { %v1175_v2 = vpop.f32.mrf.mxu3 }
 0x21e   :  { %v1512_v21 = vpack.c.bf16 %v1477_v9, %v1476_v31  ;;  %v1108_v11 = vpop.f32.mrf.mxu1  ;;  %v1176_v32 = vadd.f32 %v1175_v2, %v1106_v45  ;;  %v6620_v45 = vld [vmem:[#allocation7_spill] sm:$0xff]  ;;  %v1479_v9 = vmax.f32 %v5659_v12, 0.0  ;;  %v4641_v12 = vld [vmem:[%s6580_s2 + $0x20] sm:$0xff] }
 0x21f   :  { %v1089_v18 = vpop.f32.mrf.mxu2  ;;  %2104 = vmatpush.bf16.msrb.mxu2 %v4641_v12 }
 0x220   :  { %v1090_v3 = vadd.f32 %v1089_v18, %v1020_v59  ;;  %v1239_v0 = vpop.f32.mrf.mxu0  ;;  %v1375_v63 = vmax.f32 %v6620_v45, %v1176_v32  ;;  %v1931_v49 = vunpack.c.h.b16 %v1512_v21 }
 0x222   :  { %v1437_v7 = vmax.f32 %v5605_v34, %v1090_v3  ;;  %v4669_v34 = vld [vmem:[%s6580_s2 + $0x100] sm:$0xff]  ;;  %v1930_v3 = vunpack.c.l.b16 %v1512_v21  ;;  %v4640_v21 = vld [vmem:[%s6580_s2 + $0x18] sm:$0xff] }
 0x223   :  { %1278 = vmatmul.bf16.gmra.mxu0 %v5296_v50  ;;  %1877 = vmatpush.bf16.msrb.mxu3 %v4669_v34 }
 0x224   :  { %v5862_v44 = vmax.f32 %v1434_v39, %v1437_v7  ;;  %3793 = vmatmul.msk.bf16.gmra.mxu2 %vm484_vm1, %v5250_v23  ;;  %v6622_v39 = vld [vmem:[#allocation26_spill] sm:$0xff] }
 0x225   :  { %v1177_v54 = vpop.f32.mrf.mxu3  ;;  %2105 = vmatpush.bf16.msrb.mxu2 %v4640_v21  ;;  %v6626_v21 = vld [vmem:[#allocation30_spill] sm:$0xff] }
 0x226   :  { %v1178_v61 = vadd.f32 %v1177_v54, %v1108_v11  ;;  %v1111_v42 = vpop.f32.mrf.mxu1  ;;  %v6623_v54 = vld [vmem:[#allocation28_spill] sm:$0xff] }
 0x227   :  { %v1308_v50 = vpop.f32.mrf.mxu2 }
 0x228   :  { %v1378_v10 = vmax.f32 %v6621_v33, %v1178_v61  ;;  %v1309_v59 = vadd.f32 %v1308_v50, %v1239_v0  ;;  %v1241_v23 = vpop.f32.mrf.mxu0 }
 0x229   :  { %1150 = vmatmul.bf16.gmra.mxu1 %v5372_v48 }
 0x22a   :  { %v1444_v41 = vmax.f32 %v1375_v63, %v1378_v10  ;;  %v1370_v31 = vmax.f32 %v6622_v39, %v1309_v59  ;;  %3783 = vmatmul.msk.bf16.gmra.mxu3 %vm484_vm1, %v5314_v62  ;;  %v6625_v39 = vld [vmem:[#allocation10_spill] sm:$0xff] }
 0x22c   :  { %v1480_v2 = vmax.f32 %v1444_v41, 0.0 }
 0x22d   :  { %v1180_v8 = vpop.f32.mrf.mxu3 }
 0x22e   :  { %v1514_v11 = vpack.c.bf16 %v1480_v2, %v1479_v9  ;;  %v1113_v18 = vpop.f32.mrf.mxu1  ;;  %v1181_v50 = vadd.f32 %v1180_v8, %v1111_v42  ;;  %v1482_v42 = vmax.f32 %v5673_v60, 0.0  ;;  %v4638_v8 = vld [vmem:[%s6580_s2 + $0x8] sm:$0xff] }
 0x22f   :  { %v1310_v0 = vpop.f32.mrf.mxu2 }
 0x230   :  { %v1649_v29 = vunpack.c.l.b16 %v1514_v11  ;;  %v1650_v6 = vunpack.c.h.b16 %v1514_v11  ;;  %v1311_v7 = vadd.f32 %v1310_v0, %v1241_v23  ;;  %v1244_v32 = vpop.f32.mrf.mxu0  ;;  %v6624_v23 = vld [vmem:[#allocation9_spill] sm:$0xff] }
 0x231   :  { %v1381_v41 = vmax.f32 %v6624_v23, %v1181_v50  ;;  %v4637_v50 = vld [vmem:[%s6580_s2] sm:$0xff] }
 0x232   :  { %v1373_v16 = vmax.f32 %v6623_v54, %v1311_v7  ;;  %v5886_v34 = vpack.c.b16 %v1649_v29, %v1930_v3  ;;  %v5888_v61 = vpack.c.b16 %v1650_v6, %v1931_v49 }
 0x233   :  { %1283 = vmatmul.bf16.gmra.mxu0 %v5330_v13  ;;  %v4639_v13 = vld [vmem:[%s6580_s2 + $0x10] sm:$0xff] }
 0x234   :  { %v1442_v45 = vmax.f32 %v1370_v31, %v1373_v16  ;;  %3794 = vmatmul.msk.bf16.gmra.mxu2 %vm484_vm1, %v5278_v40  ;;  %v4677_v16 = vld [vmem:[%s6580_s2 + $0x140] sm:$0xff] }
 0x235   :  { %v1182_v63 = vpop.f32.mrf.mxu3  ;;  %2106 = vmatpush.bf16.msrb.mxu2 %v4639_v13  ;;  %1906 = vmatpush.bf16.msrb.mxu0 %v4677_v16 }
 0x236   :  { %v1183_v33 = vadd.f32 %v1182_v63, %v1113_v18  ;;  %v1116_v10 = vpop.f32.mrf.mxu1  ;;  %v1478_v63 = vmax.f32 %v1442_v45, 0.0  ;;  %v6627_v45 = vld [vmem:[#allocation11_spill] sm:$0xff] }
 0x237   :  { %v1313_v59 = vpop.f32.mrf.mxu2 }
 0x238   :  { %v1384_v9 = vmax.f32 %v6625_v39, %v1183_v33  ;;  %v1246_v2 = vpop.f32.mrf.mxu0  ;;  %v1314_v11 = vadd.f32 %v1313_v59, %v1244_v32 }
 0x239   :  { %1155 = vmatmul.bf16.gmra.mxu1 %v5413_v38  ;;  %2107 = vmatpush.bf16.msrb.mxu2 %v4638_v8 }
 0x23a   :  { %v1447_v40 = vmax.f32 %v1381_v41, %v1384_v9  ;;  %3784 = vmatmul.msk.bf16.gmra.mxu3 %vm484_vm1, %v5350_v28  ;;  %v1376_v32 = vmax.f32 %v6626_v21, %v1314_v11 }
 0x23c   :  { %v1483_v31 = vmax.f32 %v1447_v40, 0.0 }
 0x23d   :  { %v1185_v18 = vpop.f32.mrf.mxu3  ;;  %2108 = vmatpush.bf16.msrb.mxu2 %v4637_v50 }
 0x23e   :  { %v1516_v3 = vpack.c.bf16 %v1483_v31, %v1482_v42  ;;  %v1118_v0 = vpop.f32.mrf.mxu1  ;;  %v1186_v41 = vadd.f32 %v1185_v18, %v1116_v10  ;;  %v1485_v18 = vmax.f32 %v5687_v22, 0.0 }
 0x23f   :  { %v1315_v49 = vpop.f32.mrf.mxu2 }
 0x240   :  { %v1652_v7 = vunpack.c.l.b16 %v1516_v3  ;;  %v1653_v12 = vunpack.c.h.b16 %v1516_v3  ;;  %v1316_v54 = vadd.f32 %v1315_v49, %v1246_v2  ;;  %v1249_v60 = vpop.f32.mrf.mxu0  ;;  %v1513_v2 = vpack.c.bf16 %v1478_v63, %v1478_v63 }
 0x241   :  { %v1387_v15 = vmax.f32 %v6627_v45, %v1186_v41  ;;  %v6629_v41 = vld [vmem:[#allocation32_spill] sm:$0xff] }
 0x242   :  { %v1379_v33 = vmax.f32 %v5629_v47, %v1316_v54  ;;  %v1673_v59 = vpack.c.b16 %v1652_v7, %v1649_v29  ;;  %v1674_v23 = vpack.c.b16 %v1653_v12, %v1650_v6  ;;  %v6628_v29 = vld [vmem:[#allocation12_spill] sm:$0xff]  ;;  %v1932_v11 = vunpack.c.l.b16 %v1513_v2 }
 0x243   :  { %1288 = vmatmul.bf16.gmra.mxu0 %v5372_v48 }
 0x244   :  { %v1445_v39 = vmax.f32 %v1376_v32, %v1379_v33  ;;  %3795 = vmatmul.msk.bf16.gmra.mxu2 %vm484_vm1, %v5314_v62 }
 0x245   :  { %v1187_v9 = vpop.f32.mrf.mxu3 }
 0x246   :  { %v1481_v13 = vmax.f32 %v1445_v39, 0.0  ;;  %v1188_v40 = vadd.f32 %v1187_v9, %v1118_v0  ;;  %v1121_v42 = vpop.f32.mrf.mxu1  ;;  %v6630_v39 = vld [vmem:[#allocation33_spill] sm:$0xff] }
 0x247   :  { %v1318_v31 = vpop.f32.mrf.mxu2 }
 0x248   :  { %v1515_v47 = vpack.c.bf16 %v1481_v13, %v1481_v13  ;;  %v1390_v6 = vmax.f32 %v6628_v29, %v1188_v40  ;;  %v1251_v8 = vpop.f32.mrf.mxu0  ;;  %v1319_v0 = vadd.f32 %v1318_v31, %v1249_v60 }
 0x249   :  { %1849 = vmatmul.bf16.vlgmr.msrb.gmra.mxu1 %v1673_v59 }
 0x24a   :  { %v1651_v48 = vunpack.c.l.b16 %v1515_v47  ;;  %v1450_v10 = vmax.f32 %v1387_v15, %v1390_v6  ;;  %1878 = vmatmul.bf16.vlgmr.msrb.gmra.mxu3 %v1674_v23  ;;  %v1382_v59 = vmax.f32 %v6629_v41, %v1319_v0  ;;  %v6631_v47 = vld [vmem:[#allocation13_spill] sm:$0xff] }
 0x24c   :  { %v5925_v62 = vpack.c.b16 %v1651_v48, %v1932_v11  ;;  %v1486_v3 = vmax.f32 %v1450_v10, 0.0 }
 0x24d   :  { %v1190_v49 = vpop.f32.mrf.mxu3 }
 0x24e   :  { %v1123_v54 = vpop.f32.mrf.mxu1  ;;  %v1518_v16 = vpack.c.bf16 %v1486_v3, %v1485_v18  ;;  %v1191_v22 = vadd.f32 %v1190_v49, %v1121_v42 }
 0x24f   :  { %v1320_v50 = vpop.f32.mrf.mxu2 }
 0x250   :  { %v1321_v21 = vadd.f32 %v1320_v50, %v1251_v8  ;;  %v1254_v32 = vpop.f32.mrf.mxu0  ;;  %v1655_v63 = vunpack.c.l.b16 %v1518_v16  ;;  %v1656_v33 = vunpack.c.h.b16 %v1518_v16  ;;  %v1393_v29 = vmax.f32 %v6631_v47, %v1191_v22  ;;  %v6632_v8 = vld [vmem:[#allocation14_spill] sm:$0xff] }
 0x252   :  { %v1385_v9 = vmax.f32 %v6630_v39, %v1321_v21  ;;  %v5929_v2 = vpack.c.b16 %v1656_v33, %v1653_v12  ;;  %v5931_v23 = vpack.c.b16 %v1655_v63, %v1652_v7 }
 0x253   :  { %1293 = vmatmul.bf16.gmra.mxu0 %v5413_v38  ;;  %v1488_v38 = vmax.f32 %v5710_v46, 0.0 }
 0x254   :  { %v1448_v13 = vmax.f32 %v1382_v59, %v1385_v9  ;;  %3796 = vmatmul.msk.bf16.gmra.mxu2 %vm484_vm1, %v5350_v28 }
 0x255   :  { %v1192_v60 = vpop.f32.mrf.mxu3 }
 0x256   :  { %v1484_v40 = vmax.f32 %v1448_v13, 0.0  ;;  %v1193_v31 = vadd.f32 %v1192_v60, %v1123_v54  ;;  %v1126_v45 = vpop.f32.mrf.mxu1  ;;  %v6633_v60 = vld [vmem:[#allocation15_spill] sm:$0xff] }
 0x257   :  { %v1323_v15 = vpop.f32.mrf.mxu2 }
 0x258   :  { %v1517_v6 = vpack.c.bf16 %v1484_v40, %v1484_v40  ;;  %v1396_v12 = vmax.f32 %v6632_v8, %v1193_v31  ;;  %v1256_v11 = vpop.f32.mrf.mxu0  ;;  %v1324_v49 = vadd.f32 %v1323_v15, %v1254_v32  ;;  %v4700_v32 = vld [vmem:[%s6580_s2 + $0x1f8] sm:$0xff]  ;;  %v6634_v31 = vld [vmem:[#allocation16_spill] sm:$0xff] }
 0x259   :  { %2421 = vmatpush.bf16.msra.mxu2 %v4700_v32 }
 0x25a   :  { %v1654_v7 = vunpack.c.l.b16 %v1517_v6  ;;  %v1453_v10 = vmax.f32 %v1393_v29, %v1396_v12  ;;  %v1388_v59 = vmax.f32 %v5655_v27, %v1324_v49  ;;  %v4699_v29 = vld [vmem:[%s6580_s2 + $0x1f0] sm:$0xff] }
 0x25c   :  { %v1675_v42 = vpack.c.b16 %v1654_v7, %v1651_v48  ;;  %v1489_v18 = vmax.f32 %v1453_v10, 0.0  ;;  %v4698_v10 = vld [vmem:[%s6580_s2 + $0x1e8] sm:$0xff] }
 0x25d   :  { %v1195_v3 = vpop.f32.mrf.mxu3  ;;  %2422 = vmatpush.bf16.msra.mxu2 %v4699_v29 }
 0x25e   :  { %v1128_v28 = vpop.f32.mrf.mxu1  ;;  %v1520_v0 = vpack.c.bf16 %v1489_v18, %v1488_v38  ;;  %v1196_v46 = vadd.f32 %v1195_v3, %v1126_v45 }
 0x25f   :  { %v1325_v16 = vpop.f32.mrf.mxu2 }
 0x260   :  { %v1326_v54 = vadd.f32 %v1325_v16, %v1256_v11  ;;  %v1259_v50 = vpop.f32.mrf.mxu0  ;;  %v1658_v21 = vunpack.c.l.b16 %v1520_v0  ;;  %v1659_v41 = vunpack.c.h.b16 %v1520_v0  ;;  %v1399_v40 = vmax.f32 %v6633_v60, %v1196_v46  ;;  %v4660_v11 = vld [vmem:[%s6580_s2 + $0xb8] sm:$0xff]  ;;  %v4697_v46 = vld [vmem:[%s6580_s2 + $0x1e0] sm:$0xff] }
 0x261   :  { %2159 = vmatpush.bf16.msra.mxu3 %v4660_v11  ;;  %2423 = vmatpush.bf16.msra.mxu2 %v4698_v10  ;;  %v4658_v11 = vld [vmem:[%s6580_s2 + $0xa8] sm:$0xff] }
 0x262   :  { %v1391_v39 = vmax.f32 %v5663_v25, %v1326_v54  ;;  %v5941_v9 = vpack.c.b16 %v1658_v21, %v1655_v63  ;;  %v5943_v22 = vpack.c.b16 %v1659_v41, %v1656_v33  ;;  %v4650_v10 = vld [vmem:[%s6580_s2 + $0x68] sm:$0xff] }
 0x263   :  { %1907 = vmatmul.bf16.vlgmr.msrb.gmra.mxu0 %v1675_v42 }
 0x264   :  { %v1451_v48 = vmax.f32 %v1388_v59, %v1391_v39  ;;  %1854 = vmatmul.bf16.gmra.mxu1 %v5941_v9  ;;  %1883 = vmatmul.bf16.gmra.mxu3 %v5943_v22  ;;  %v4652_v59 = vld [vmem:[%s6580_s2 + $0x78] sm:$0xff] }
 0x265   :  { %v1197_v13 = vpop.f32.mrf.mxu3  ;;  %2109 = vmatmul.bf16.vlgmr.msrb.gmra.mxu2 %v5886_v34  ;;  %v1491_v34 = vmax.f32 %v5727_v1, 0.0  ;;  %2130 = vmatpush.bf16.msra.mxu1 %v4652_v59 }
 0x266   :  { %v1487_v27 = vmax.f32 %v1451_v48, 0.0  ;;  %v1198_v25 = vadd.f32 %v1197_v13, %v1128_v28  ;;  %v1131_v63 = vpop.f32.mrf.mxu1  ;;  %2424 = vmatpush.bf16.msra.mxu2 %v4697_v46  ;;  %v4649_v46 = vld [vmem:[%s6580_s2 + $0x60] sm:$0xff] }
 0x267   :  { %v1328_v33 = vpop.f32.mrf.mxu2 }
 0x268   :  { %v1402_v45 = vmax.f32 %v6634_v31, %v1198_v25  ;;  %v1261_v15 = vpop.f32.mrf.mxu0  ;;  %v1519_v47 = vpack.c.bf16 %v1487_v27, %v1487_v27  ;;  %v1329_v42 = vadd.f32 %v1328_v33, %v1259_v50  ;;  %v4692_v50 = vld [vmem:[%s6580_s2 + $0x1b8] sm:$0xff]  ;;  %v6635_v31 = vld [vmem:[#allocation17_spill] sm:$0xff] }
 0x269   :  { %2392 = vmatpush.bf16.msra.mxu0 %v4692_v50  ;;  %v4696_v25 = vld [vmem:[%s6580_s2 + $0x1d8] sm:$0xff] }
 0x26a   :  { %v1456_v6 = vmax.f32 %v1399_v40, %v1402_v45  ;;  %v1657_v8 = vunpack.c.l.b16 %v1519_v47  ;;  %v1394_v39 = vmax.f32 %v5669_v58, %v1329_v42  ;;  %2425 = vmatpush.bf16.msra.mxu2 %v4696_v25  ;;  %v1494_v42 = vmax.f32 %v5747_v36, 0.0  ;;  %v4690_v25 = vld [vmem:[%s6580_s2 + $0x1a8] sm:$0xff] }
 0x26c   :  { %v1492_v12 = vmax.f32 %v1456_v6, 0.0  ;;  %v5963_v38 = vpack.c.b16 %v1657_v8, %v1654_v7  ;;  %v4659_v7 = vld [vmem:[%s6580_s2 + $0xb0] sm:$0xff] }
 0x26d   :  { %v1200_v18 = vpop.f32.mrf.mxu3  ;;  %2160 = vmatpush.bf16.msra.mxu3 %v4659_v7  ;;  %v4695_v6 = vld [vmem:[%s6580_s2 + $0x1d0] sm:$0xff] }
 0x26e   :  { %v1133_v3 = vpop.f32.mrf.mxu1  ;;  %v5965_v49 = vpack.c.bf16 %v1492_v12, %v1491_v34  ;;  %v1201_v27 = vadd.f32 %v1200_v18, %v1131_v63  ;;  %v6636_v63 = vld [vmem:[#allocation18_spill] sm:$0xff]  ;;  %2426 = vmatpush.bf16.msra.mxu2 %v4695_v6  ;;  %v6637_v6 = vld [vmem:[#allocation19_spill] sm:$0xff] }
 0x26f   :  { %v1330_v28 = vpop.f32.mrf.mxu2 }
 0x270   :  { %v1331_v1 = vadd.f32 %v1330_v28, %v1261_v15  ;;  %v1264_v0 = vpop.f32.mrf.mxu0  ;;  %v1661_v16 = vunpack.c.l.b16 %v5965_v49  ;;  %v1662_v54 = vunpack.c.h.b16 %v5965_v49  ;;  %v1405_v45 = vmax.f32 %v6635_v31, %v1201_v27  ;;  %v4691_v28 = vld [vmem:[%s6580_s2 + $0x1b0] sm:$0xff]  ;;  %v4648_v31 = vld [vmem:[%s6580_s2 + $0x58] sm:$0xff] }
 0x271   :  { %2161 = vmatpush.bf16.msra.mxu3 %v4658_v11  ;;  %2393 = vmatpush.bf16.msra.mxu0 %v4691_v28  ;;  %v6638_v11 = vld [vmem:[#allocation20_spill] sm:$0xff] }
 0x272   :  { %v1397_v48 = vmax.f32 %v5677_v53, %v1331_v1  ;;  %v5985_v32 = vpack.c.b16 %v1661_v16, %v1658_v21  ;;  %v5989_v13 = vpack.c.b16 %v1662_v54, %v1659_v41  ;;  %v4651_v41 = vld [vmem:[%s6580_s2 + $0x70] sm:$0xff]  ;;  %v4694_v1 = vld [vmem:[%s6580_s2 + $0x1c8] sm:$0xff] }
 0x273   :  { %2131 = vmatpush.bf16.msra.mxu1 %v4651_v41  ;;  %2427 = vmatpush.bf16.msra.mxu2 %v4694_v1 }
 0x274   :  { %v1454_v58 = vmax.f32 %v1394_v39, %v1397_v48 }
 0x275   :  { %v1202_v33 = vpop.f32.mrf.mxu3  ;;  %2114 = vmatmul.bf16.gmra.mxu2 %v5931_v23  ;;  %2394 = vmatpush.bf16.msra.mxu0 %v4690_v25 }
 0x276   :  { %v1490_v53 = vmax.f32 %v1454_v58, 0.0  ;;  %v1203_v21 = vadd.f32 %v1202_v33, %v1133_v3  ;;  %v1136_v60 = vpop.f32.mrf.mxu1  ;;  %v4693_v33 = vld [vmem:[%s6580_s2 + $0x1c0] sm:$0xff] }
 0x277   :  { %v1333_v40 = vpop.f32.mrf.mxu2  ;;  %2132 = vmatpush.bf16.msra.mxu1 %v4650_v10  ;;  %2428 = vmatpush.bf16.msra.mxu2 %v4693_v33 }
 0x278   :  { %v1408_v15 = vmax.f32 %v6636_v63, %v1203_v21  ;;  %v1266_v47 = vpop.f32.mrf.mxu0  ;;  %v6000_v29 = vpack.c.bf16 %v1490_v53, %v1490_v53  ;;  %v1334_v7 = vadd.f32 %v1333_v40, %v1264_v0 }
 0x27a   :  { %v1459_v34 = vmax.f32 %v1405_v45, %v1408_v15  ;;  %v1660_v12 = vunpack.c.l.b16 %v6000_v29  ;;  %v1400_v53 = vmax.f32 %v5683_v19, %v1334_v7  ;;  %v4656_v19 = vld [vmem:[%s6580_s2 + $0x98] sm:$0xff]  ;;  %v4654_v7 = vld [vmem:[%s6580_s2 + $0x88] sm:$0xff] }
 0x27b   :  { %2133 = vmatpush.bf16.msra.mxu1 %v4649_v46 }
 0x27c   :  { %v1495_v18 = vmax.f32 %v1459_v34, 0.0  ;;  %v6015_v3 = vpack.c.b16 %v1660_v12, %v1657_v8  ;;  %v4657_v8 = vld [vmem:[%s6580_s2 + $0xa0] sm:$0xff] }
 0x27d   :  { %v1205_v59 = vpop.f32.mrf.mxu3  ;;  %2162 = vmatpush.bf16.msra.mxu3 %v4657_v8 }
 0x27e   :  { %v1138_v50 = vpop.f32.mrf.mxu1  ;;  %1912 = vmatmul.bf16.gmra.mxu0 %v6015_v3  ;;  %v6024_v36 = vpack.c.bf16 %v1495_v18, %v1494_v42  ;;  %v1206_v45 = vadd.f32 %v1205_v59, %v1136_v60  ;;  %v4655_v60 = vld [vmem:[%s6580_s2 + $0x90] sm:$0xff]  ;;  %v4646_v59 = vld [vmem:[%s6580_s2 + $0x48] sm:$0xff] }
 0x27f   :  { %v1335_v39 = vpop.f32.mrf.mxu2  ;;  %2134 = vmatpush.bf16.msra.mxu1 %v4648_v31 }
 0x280   :  { %v1336_v48 = vadd.f32 %v1335_v39, %v1266_v47  ;;  %v1269_v27 = vpop.f32.mrf.mxu0  ;;  %v1664_v0 = vunpack.c.l.b16 %v6024_v36  ;;  %v1665_v58 = vunpack.c.h.b16 %v6024_v36  ;;  %v4647_v47 = vld [vmem:[%s6580_s2 + $0x50] sm:$0xff]  ;;  %v1411_v34 = vmax.f32 %v6637_v6, %v1206_v45  ;;  %v4689_v39 = vld [vmem:[%s6580_s2 + $0x1a0] sm:$0xff] }
 0x281   :  { %2163 = vmatpush.bf16.msra.mxu3 %v4656_v19  ;;  %2395 = vmatpush.bf16.msra.mxu0 %v4689_v39  ;;  %v6639_v45 = vld [vmem:[#allocation34_spill] sm:$0xff] }
 0x282   :  { %v1403_v21 = vmax.f32 %v5691_v56, %v1336_v48  ;;  %v6044_v40 = vpack.c.b16 %v1664_v0, %v1661_v16  ;;  %v6048_v41 = vpack.c.b16 %v1665_v58, %v1662_v54  ;;  %v4687_v39 = vld [vmem:[%s6580_s2 + $0x190] sm:$0xff] }
 0x283   :  { %2135 = vmatpush.bf16.msra.mxu1 %v4647_v47 }
 0x284   :  { %v1457_v56 = vmax.f32 %v1400_v53, %v1403_v21  ;;  %1859 = vmatmul.bf16.gmra.mxu1 %v6044_v40  ;;  %1888 = vmatmul.bf16.gmra.mxu3 %v6048_v41  ;;  %v4653_v21 = vld [vmem:[%s6580_s2 + $0x80] sm:$0xff] }
 0x285   :  { %v1207_v16 = vpop.f32.mrf.mxu3  ;;  %2119 = vmatmul.bf16.gmra.mxu2 %v5985_v32  ;;  %2164 = vmatpush.bf16.msra.mxu3 %v4655_v60 }
 0x286   :  { %v1493_v49 = vmax.f32 %v1457_v56, 0.0  ;;  %v1208_v54 = vadd.f32 %v1207_v16, %v1138_v50  ;;  %v1141_v63 = vpop.f32.mrf.mxu1  ;;  %v1497_v50 = vmax.f32 %v5770_v30, 0.0  ;;  %v4645_v30 = vld [vmem:[%s6580_s2 + $0x40] sm:$0xff] }
 0x287   :  { %v1338_v15 = vpop.f32.mrf.mxu2  ;;  %2136 = vmatpush.bf16.msra.mxu1 %v4646_v59 }
 0x288   :  { %v1414_v10 = vmax.f32 %v6638_v11, %v1208_v54  ;;  %v1271_v42 = vpop.f32.mrf.mxu0  ;;  %v1523_v18 = vpack.c.bf16 %v1493_v49, %v1493_v49  ;;  %v1339_v46 = vadd.f32 %v1338_v15, %v1269_v27  ;;  %v4688_v27 = vld [vmem:[%s6580_s2 + $0x198] sm:$0xff] }
 0x289   :  { %2165 = vmatpush.bf16.msra.mxu3 %v4654_v7  ;;  %2396 = vmatpush.bf16.msra.mxu0 %v4688_v27 }
 0x28a   :  { %v1462_v28 = vmax.f32 %v1411_v34, %v1414_v10  ;;  %v1663_v1 = vunpack.c.l.b16 %v1523_v18  ;;  %v1406_v56 = vmax.f32 %v6639_v45, %v1339_v46 }
 0x28b   :  { %2137 = vmatpush.bf16.msra.mxu1 %v4645_v30 }
 0x28c   :  { %v1498_v36 = vmax.f32 %v1462_v28, 0.0  ;;  %v6079_v8 = vpack.c.b16 %v1663_v1, %v1660_v12  ;;  %v6641_v28 = vld [vmem:[#allocation22_spill] sm:$0xff] }
 0x28d   :  { %v1210_v48 = vpop.f32.mrf.mxu3  ;;  %2166 = vmatpush.bf16.msra.mxu3 %v4653_v21  ;;  %2397 = vmatpush.bf16.msra.mxu0 %v4687_v39  ;;  %v4730_v39 = vld [vmem:[%s6580_s2 + $0x2e8] sm:$0xff] }
 0x28e   :  { %v1143_v25 = vpop.f32.mrf.mxu1  ;;  %v1526_v33 = vpack.c.bf16 %v1498_v36, %v1497_v50  ;;  %v1211_v15 = vadd.f32 %v1210_v48, %v1141_v63 }
 0x28f   :  { %v1340_v53 = vpop.f32.mrf.mxu2 }
 0x290   :  { %v1341_v31 = vadd.f32 %v1340_v53, %v1271_v42  ;;  %v1274_v29 = vpop.f32.mrf.mxu0  ;;  %v1667_v12 = vunpack.c.l.b16 %v1526_v33  ;;  %v1668_v19 = vunpack.c.h.b16 %v1526_v33  ;;  %v6640_v42 = vld [vmem:[#allocation21_spill] sm:$0xff] }
 0x291   :  { %v1417_v18 = vmax.f32 %v6640_v42, %v1211_v15 }
 0x292   :  { %v1409_v16 = vmax.f32 %v5714_v17, %v1341_v31  ;;  %v6092_v49 = vpack.c.b16 %v1667_v12, %v1664_v0  ;;  %v6094_v54 = vpack.c.b16 %v1668_v19, %v1665_v58  ;;  %v1500_v58 = vmax.f32 %v5790_v4, 0.0  ;;  %v4686_v31 = vld [vmem:[%s6580_s2 + $0x188] sm:$0xff] }
 0x293   :  { %2398 = vmatpush.bf16.msra.mxu0 %v4686_v31 }
 0x294   :  { %v1460_v47 = vmax.f32 %v1406_v56, %v1409_v16 }
 0x295   :  { %v1212_v60 = vpop.f32.mrf.mxu3  ;;  %2124 = vmatmul.bf16.gmra.mxu2 %v6092_v49 }
 0x296   :  { %v1496_v6 = vmax.f32 %v1460_v47, 0.0  ;;  %v1213_v34 = vadd.f32 %v1212_v60, %v1143_v25  ;;  %v1146_v11 = vpop.f32.mrf.mxu1  ;;  %v4732_v47 = vld [vmem:[%s6580_s2 + $0x2f8] sm:$0xff] }
 0x297   :  { %v1343_v10 = vpop.f32.mrf.mxu2  ;;  %2749 = vmatpush.bf16.msrb.mxu2 %v4732_v47 }
 0x298   :  { %v1420_v59 = vmax.f32 %v6641_v28, %v1213_v34  ;;  %v1276_v17 = vpop.f32.mrf.mxu0  ;;  %v1525_v0 = vpack.c.bf16 %v1496_v6, %v1496_v6  ;;  %v1344_v48 = vadd.f32 %v1343_v10, %v1274_v29  ;;  %v6642_v6 = vld [vmem:[#allocation23_spill] sm:$0xff]  ;;  %v4731_v28 = vld [vmem:[%s6580_s2 + $0x2f0] sm:$0xff] }
 0x29a   :  { %v1465_v7 = vmax.f32 %v1417_v18, %v1420_v59  ;;  %v1666_v50 = vunpack.c.l.b16 %v1525_v0  ;;  %v1412_v27 = vmax.f32 %v5720_v37, %v1344_v48  ;;  %v4685_v0 = vld [vmem:[%s6580_s2 + $0x180] sm:$0xff] }
 0x29b   :  { %2750 = vmatpush.bf16.msrb.mxu2 %v4731_v28  ;;  %2399 = vmatpush.bf16.msra.mxu0 %v4685_v0  ;;  %v4727_v0 = vld [vmem:[%s6580_s2 + $0x2d0] sm:$0xff] }
 0x29c   :  { %v1501_v36 = vmax.f32 %v1465_v7, 0.0  ;;  %v6100_v63 = vpack.c.b16 %v1666_v50, %v1663_v1  ;;  %v1503_v7 = vmax.f32 %v5813_v5, 0.0  ;;  %v4715_v5 = vld [vmem:[%s6580_s2 + $0x270] sm:$0xff] }
 0x29d   :  { %v1215_v46 = vpop.f32.mrf.mxu3 }
 0x29e   :  { %v1148_v25 = vpop.f32.mrf.mxu1  ;;  %1917 = vmatmul.bf16.gmra.mxu0 %v6100_v63  ;;  %v6106_v33 = vpack.c.bf16 %v1501_v36, %v1500_v58  ;;  %v1216_v16 = vadd.f32 %v1215_v46, %v1146_v11  ;;  %v6643_v11 = vld [vmem:[#allocation24_spill] sm:$0xff]  ;;  %v4716_v36 = vld [vmem:[%s6580_s2 + $0x278] sm:$0xff] }
 0x29f   :  { %v1345_v53 = vpop.f32.mrf.mxu2  ;;  %2691 = vmatpush.bf16.msrb.mxu3 %v4716_v36  ;;  %2751 = vmatpush.bf16.msrb.mxu2 %v4730_v39  ;;  %v4706_v39 = vld [vmem:[%s6580_s2 + $0x228] sm:$0xff] }
 0x2a0   :  { %v1346_v30 = vadd.f32 %v1345_v53, %v1276_v17  ;;  %v1279_v21 = vpop.f32.mrf.mxu0  ;;  %v1670_v4 = vunpack.c.l.b16 %v6106_v33  ;;  %v1671_v1 = vunpack.c.h.b16 %v6106_v33  ;;  %v1423_v34 = vmax.f32 %v6642_v6, %v1216_v16  ;;  %v4708_v33 = vld [vmem:[%s6580_s2 + $0x238] sm:$0xff] }
 0x2a1   :  { %v4724_v53 = vld [vmem:[%s6580_s2 + $0x2b8] sm:$0xff]  ;;  %2450 = vmatpush.bf16.msrb.mxu1 %v4708_v33 }
 0x2a2   :  { %v1415_v29 = vmax.f32 %v5731_v14, %v1346_v30  ;;  %v6115_v45 = vpack.c.b16 %v1670_v4, %v1667_v12  ;;  %v6117_v56 = vpack.c.b16 %v1671_v1, %v1668_v19  ;;  %2720 = vmatpush.bf16.msrb.mxu0 %v4724_v53 }
 0x2a3   :  { %2692 = vmatpush.bf16.msrb.mxu3 %v4715_v5 }
 0x2a4   :  { %v1463_v15 = vmax.f32 %v1412_v27, %v1415_v29  ;;  %1864 = vmatmul.bf16.gmra.mxu1 %v6115_v45  ;;  %1893 = vmatmul.bf16.gmra.mxu3 %v6117_v56  ;;  %v4729_v29 = vld [vmem:[%s6580_s2 + $0x2e0] sm:$0xff] }
 0x2a5   :  { %v1217_v60 = vpop.f32.mrf.mxu3  ;;  %2429 = vmatmul.bf16.vlgmr.msra.gmra.mxu2 %v5929_v2 }
 0x2a6   :  { %v1499_v37 = vmax.f32 %v1463_v15, 0.0  ;;  %v1218_v14 = vadd.f32 %v1217_v60, %v1148_v25  ;;  %v1151_v12 = vpop.f32.mrf.mxu1  ;;  %2752 = vmatpush.bf16.msrb.mxu2 %v4729_v29  ;;  %v4722_v29 = vld [vmem:[%s6580_s2 + $0x2a8] sm:$0xff] }
 0x2a7   :  { %v1348_v19 = vpop.f32.mrf.mxu2 }
 0x2a8   :  { %v1426_v10 = vmax.f32 %v6643_v11, %v1218_v14  ;;  %v1281_v42 = vpop.f32.mrf.mxu0  ;;  %v6127_v18 = vpack.c.bf16 %v1499_v37, %v1499_v37  ;;  %v1349_v48 = vadd.f32 %v1348_v19, %v1279_v21 }
 0x2aa   :  { %v1468_v59 = vmax.f32 %v1423_v34, %v1426_v10  ;;  %v1669_v17 = vunpack.c.l.b16 %v6127_v18  ;;  %v1418_v47 = vmax.f32 %v5743_v20, %v1349_v48  ;;  %v4728_v20 = vld [vmem:[%s6580_s2 + $0x2d8] sm:$0xff]  ;;  %v4726_v48 = vld [vmem:[%s6580_s2 + $0x2c8] sm:$0xff] }
 0x2ab   :  { %2753 = vmatpush.bf16.msrb.mxu2 %v4728_v20  ;;  %v4725_v20 = vld [vmem:[%s6580_s2 + $0x2c0] sm:$0xff] }
 0x2ac   :  { %v1504_v58 = vmax.f32 %v1468_v59, 0.0  ;;  %v6143_v46 = vpack.c.b16 %v1669_v17, %v1666_v50 }
 0x2ad   :  { %v1220_v25 = vpop.f32.mrf.mxu3 }
 0x2ae   :  { %v6154_v30 = vpack.c.bf16 %v1504_v58, %v1503_v7  ;;  %v1153_v50 = vpop.f32.mrf.mxu1  ;;  %v1221_v19 = vadd.f32 %v1220_v25, %v1151_v12  ;;  %v6644_v12 = vld [vmem:[#allocation25_spill] sm:$0xff]  ;;  %v1506_v25 = vmax.f32 %v5835_v43, 0.0 }
 0x2af   :  { %v1350_v31 = vpop.f32.mrf.mxu2  ;;  %2754 = vmatpush.bf16.msrb.mxu2 %v4727_v0  ;;  %v4721_v0 = vld [vmem:[%s6580_s2 + $0x2a0] sm:$0xff] }
 0x2b0   :  { %v1351_v21 = vadd.f32 %v1350_v31, %v1281_v42  ;;  %v1284_v27 = vpop.f32.mrf.mxu0  ;;  %v2240_v16 = vunpack.c.h.b16 %v6154_v30  ;;  %v2239_v15 = vunpack.c.l.b16 %v6154_v30  ;;  %v1429_v10 = vmax.f32 %v6644_v12, %v1221_v19  ;;  %v6645_v42 = vld [vmem:[#allocation27_spill] sm:$0xff] }
 0x2b1   :  { %v4704_v12 = vld [vmem:[%s6580_s2 + $0x218] sm:$0xff] }
 0x2b2   :  { %v1421_v60 = vmax.f32 %v5751_v35, %v1351_v21  ;;  %v6165_v37 = vpack.c.b16 %v2240_v16, %v1671_v1  ;;  %v6167_v14 = vpack.c.b16 %v2239_v15, %v1670_v4  ;;  %v4707_v4 = vld [vmem:[%s6580_s2 + $0x230] sm:$0xff]  ;;  %v4713_v21 = vld [vmem:[%s6580_s2 + $0x260] sm:$0xff] }
 0x2b3   :  { %2451 = vmatpush.bf16.msrb.mxu1 %v4707_v4  ;;  %2755 = vmatpush.bf16.msrb.mxu2 %v4726_v48  ;;  %v4710_v48 = vld [vmem:[%s6580_s2 + $0x248] sm:$0xff] }
 0x2b4   :  { %v1466_v6 = vmax.f32 %v1418_v47, %v1421_v60  ;;  %2138 = vmatmul.bf16.vlgmr.msra.gmra.mxu1 %v5888_v61  ;;  %2167 = vmatmul.bf16.vlgmr.msra.gmra.mxu3 %v5925_v62  ;;  %v4714_v61 = vld [vmem:[%s6580_s2 + $0x268] sm:$0xff]  ;;  %v4723_v62 = vld [vmem:[%s6580_s2 + $0x2b0] sm:$0xff] }
 0x2b5   :  { %v1222_v34 = vpop.f32.mrf.mxu3  ;;  %2434 = vmatmul.bf16.gmra.mxu2 %v5989_v13  ;;  %2693 = vmatpush.bf16.msrb.mxu3 %v4714_v61 }
 0x2b6   :  { %v1502_v35 = vmax.f32 %v1466_v6, 0.0  ;;  %v1223_v11 = vadd.f32 %v1222_v34, %v1153_v50  ;;  %v1156_v7 = vpop.f32.mrf.mxu1  ;;  %2721 = vmatpush.bf16.msrb.mxu0 %v4723_v62 }
 0x2b7   :  { %v1353_v1 = vpop.f32.mrf.mxu2  ;;  %2452 = vmatpush.bf16.msrb.mxu1 %v4706_v39  ;;  %2756 = vmatpush.bf16.msrb.mxu2 %v4725_v20 }
 0x2b8   :  { %v1432_v18 = vmax.f32 %v6645_v42, %v1223_v11  ;;  %v1286_v28 = vpop.f32.mrf.mxu0  ;;  %v6186_v59 = vpack.c.bf16 %v1502_v35, %v1502_v35  ;;  %v1354_v50 = vadd.f32 %v1353_v1, %v1284_v27  ;;  %v6646_v27 = vld [vmem:[#allocation29_spill] sm:$0xff] }
 0x2b9   :  { %2694 = vmatpush.bf16.msrb.mxu3 %v4713_v21 }
 0x2ba   :  { %v1471_v58 = vmax.f32 %v1429_v10, %v1432_v18  ;;  %v1672_v36 = vunpack.c.l.b16 %v6186_v59  ;;  %2722 = vmatpush.bf16.msrb.mxu0 %v4722_v29  ;;  %v1424_v11 = vmax.f32 %v5760_v26, %v1354_v50  ;;  %v4712_v10 = vld [vmem:[%s6580_s2 + $0x258] sm:$0xff]  ;;  %v4711_v18 = vld [vmem:[%s6580_s2 + $0x250] sm:$0xff] }
 0x2bc   :  { %v1507_v33 = vmax.f32 %v1471_v58, 0.0  ;;  %v6199_v5 = vpack.c.b16 %v1672_v36, %v1669_v17  ;;  %v4705_v17 = vld [vmem:[%s6580_s2 + $0x220] sm:$0xff]  ;;  %v4702_v58 = vld [vmem:[%s6580_s2 + $0x208] sm:$0xff] }
 0x2bd   :  { %v1225_v53 = vpop.f32.mrf.mxu3  ;;  %2453 = vmatpush.bf16.msrb.mxu1 %v4705_v17  ;;  %2695 = vmatpush.bf16.msrb.mxu3 %v4712_v10 }
 0x2be   :  { %v1226_v31 = vadd.f32 %v1225_v53, %v1156_v7  ;;  %1922 = vmatmul.bf16.gmra.mxu0 %v6199_v5  ;;  %v6208_v47 = vpack.c.bf16 %v1507_v33, %v1506_v25  ;;  %v1158_v1 = vpop.f32.mrf.mxu1  ;;  %v1509_v33 = vmax.f32 %v5862_v44, 0.0  ;;  %v4709_v44 = vld [vmem:[%s6580_s2 + $0x240] sm:$0xff] }
 0x2bf   :  { %v1355_v43 = vpop.f32.mrf.mxu2  ;;  %2723 = vmatpush.bf16.msrb.mxu0 %v4721_v0 }
 0x2c0   :  { %v1435_v60 = vmax.f32 %v6646_v27, %v1226_v31  ;;  %v1356_v19 = vadd.f32 %v1355_v43, %v1286_v28  ;;  %v1289_v6 = vpop.f32.mrf.mxu0  ;;  %v2538_v34 = vunpack.c.l.b16 %v6208_v47  ;;  %v2539_v35 = vunpack.c.h.b16 %v6208_v47  ;;  %v6647_v28 = vld [vmem:[#allocation31_spill] sm:$0xff]  ;;  %v4701_v27 = vld [vmem:[%s6580_s2 + $0x200] sm:$0xff] }
 0x2c1   :  { %2454 = vmatpush.bf16.msrb.mxu1 %v4704_v12  ;;  %2696 = vmatpush.bf16.msrb.mxu3 %v4711_v18 }
 0x2c2   :  { %v1427_v4 = vmax.f32 %v5774_v57, %v1356_v19  ;;  %v6221_v61 = vpack.c.b16 %v2538_v34, %v2239_v15  ;;  %v6225_v62 = vpack.c.b16 %v2539_v35, %v2240_v16  ;;  %v4703_v15 = vld [vmem:[%s6580_s2 + $0x210] sm:$0xff]  ;;  %v4720_v19 = vld [vmem:[%s6580_s2 + $0x298] sm:$0xff] }
 0x2c3   :  { %2724 = vmatpush.bf16.msrb.mxu0 %v4720_v19  ;;  %v4755_v19 = vld [vmem:[%s6580_s2 + $0x3b0] sm:$0xff] }
 0x2c4   :  { %v1469_v42 = vmax.f32 %v1424_v11, %v1427_v4  ;;  %2143 = vmatmul.bf16.gmra.mxu1 %v5929_v2  ;;  %2172 = vmatmul.bf16.gmra.mxu3 %v5963_v38 }
 0x2c5   :  { %v1227_v26 = vpop.f32.mrf.mxu3  ;;  %2439 = vmatmul.bf16.gmra.mxu2 %v6094_v54  ;;  %2455 = vmatpush.bf16.msrb.mxu1 %v4703_v15  ;;  %v4718_v15 = vld [vmem:[%s6580_s2 + $0x288] sm:$0xff] }
 0x2c6   :  { %v1505_v57 = vmax.f32 %v1469_v42, 0.0  ;;  %v1228_v30 = vadd.f32 %v1227_v26, %v1158_v1  ;;  %v1850_v31 = vpop.f32.mrf.mxu1  ;;  %2697 = vmatpush.bf16.msrb.mxu3 %v4710_v48 }
 0x2c7   :  { %v1358_v16 = vpop.f32.mrf.mxu2 }
 0x2c8   :  { %v1438_v2 = vmax.f32 %v6647_v28, %v1228_v30  ;;  %v1291_v59 = vpop.f32.mrf.mxu0  ;;  %v1531_v7 = vpack.c.bf16 %v1505_v57, %v1505_v57  ;;  %v1359_v21 = vadd.f32 %v1358_v16, %v1289_v6 }
 0x2c9   :  { %2456 = vmatpush.bf16.msrb.mxu1 %v4702_v58 }
 0x2ca   :  { %v1474_v39 = vmax.f32 %v1435_v60, %v1438_v2  ;;  %v2241_v25 = vunpack.c.l.b16 %v1531_v7  ;;  %2698 = vmatpush.bf16.msrb.mxu3 %v4709_v44 }
 0x2cc   :  { %v1510_v53 = vmax.f32 %v1474_v39, 0.0  ;;  %v6253_v50 = vpack.c.b16 %v2241_v25, %v1672_v36 }
 0x2cd   :  { %v1879_v29 = vpop.f32.mrf.mxu3  ;;  %2457 = vmatpush.bf16.msrb.mxu1 %v4701_v27  ;;  %v4756_v27 = vld [vmem:[%s6580_s2 + $0x3b8] sm:$0xff] }
 0x2ce   :  { %v1880_v47 = vadd.f32 %v1879_v29, %v1850_v31  ;;  %2400 = vmatmul.bf16.vlgmr.msra.gmra.mxu0 %v5931_v23  ;;  %v1534_v43 = vpack.c.bf16 %v1510_v53, %v1509_v33  ;;  %v1430_v23 = vmax.f32 %v5783_v52, %v1359_v21  ;;  %v4719_v52 = vld [vmem:[%s6580_s2 + $0x290] sm:$0xff]  ;;  %v6280_v16 = vpop.f32.mrf.mxu1  ;;  %v4717_v53 = vld [vmem:[%s6580_s2 + $0x280] sm:$0xff] }
 0x2cf   :  { %v1360_v17 = vpop.f32.mrf.mxu2  ;;  %2725 = vmatpush.bf16.msrb.mxu0 %v4719_v52 }
 0x2d0   :  { %v1361_v36 = vadd.f32 %v1360_v17, %v1291_v59  ;;  %v1294_v60 = vpop.f32.mrf.mxu0  ;;  %v2837_v6 = vunpack.c.l.b16 %v1534_v43  ;;  %v2838_v20 = vunpack.c.h.b16 %v1534_v43  ;;  %v4747_v17 = vld [vmem:[%s6580_s2 + $0x370] sm:$0xff] }
 0x2d2   :  { %v1433_v11 = vmax.f32 %v5794_v24, %v1361_v36  ;;  %v6267_v4 = vpack.c.b16 %v2837_v6, %v2538_v34  ;;  %v6269_v1 = vpack.c.b16 %v2838_v20, %v2539_v35  ;;  %v4739_v36 = vld [vmem:[%s6580_s2 + $0x330] sm:$0xff]  ;;  %v4745_v20 = vld [vmem:[%s6580_s2 + $0x360] sm:$0xff] }
 0x2d3   :  { %2726 = vmatpush.bf16.msrb.mxu0 %v4718_v15  ;;  %v4743_v15 = vld [vmem:[%s6580_s2 + $0x350] sm:$0xff] }
 0x2d4   :  { %v1472_v12 = vmax.f32 %v1430_v23, %v1433_v11  ;;  %2148 = vmatmul.bf16.gmra.mxu1 %v5989_v13  ;;  %2177 = vmatmul.bf16.gmra.mxu3 %v6079_v8  ;;  %v4754_v23 = vld [vmem:[%s6580_s2 + $0x3a8] sm:$0xff] }
 0x2d5   :  { %2444 = vmatmul.bf16.gmra.mxu2 %v6165_v37  ;;  %v6286_v18 = vpop.f32.mrf.mxu3 }
 0x2d6   :  { %v1508_v10 = vmax.f32 %v1472_v12, 0.0 }
 0x2d7   :  { %v1363_v42 = vpop.f32.mrf.mxu2  ;;  %2727 = vmatpush.bf16.msrb.mxu0 %v4717_v53 }
 0x2d8   :  { %v1364_v24 = vadd.f32 %v1363_v42, %v1294_v60  ;;  %v1296_v26 = vpop.f32.mrf.mxu0  ;;  %v1533_v34 = vpack.c.bf16 %v1508_v10, %v1508_v10  ;;  %v4746_v60 = vld [vmem:[%s6580_s2 + $0x368] sm:$0xff]  ;;  %v4737_v10 = vld [vmem:[%s6580_s2 + $0x320] sm:$0xff] }
 0x2da   :  { %v1436_v35 = vmax.f32 %v5800_v55, %v1364_v24  ;;  %v2540_v57 = vunpack.c.l.b16 %v1533_v34  ;;  %v4736_v24 = vld [vmem:[%s6580_s2 + $0x318] sm:$0xff] }
 0x2db   :  { %3048 = vmatpush.bf16.msra.mxu0 %v4756_v27  ;;  %v4749_v27 = vld [vmem:[%s6580_s2 + $0x380] sm:$0xff] }
 0x2dc   :  { %v6278_v30 = vpack.c.b16 %v2540_v57, %v2241_v25 }
 0x2de   :  { %2405 = vmatmul.bf16.gmra.mxu0 %v5985_v32 }
 0x2df   :  { %v1365_v28 = vpop.f32.mrf.mxu2  ;;  %3049 = vmatpush.bf16.msra.mxu0 %v4755_v19 }
 0x2e0   :  { %v1366_v2 = vadd.f32 %v1365_v28, %v1296_v26  ;;  %v1908_v59 = vpop.f32.mrf.mxu0  ;;  %v4744_v26 = vld [vmem:[%s6580_s2 + $0x358] sm:$0xff] }
 0x2e1   :  { %v1909_v0 = vadd.f32 %v1908_v59, %v1880_v47  ;;  %v1855_v39 = vpop.f32.mrf.mxu1  ;;  %v4742_v59 = vld [vmem:[%s6580_s2 + $0x348] sm:$0xff] }
 0x2e2   :  { %v1439_v55 = vmax.f32 %v5817_v51, %v1366_v2  ;;  %v4748_v51 = vld [vmem:[%s6580_s2 + $0x378] sm:$0xff]  ;;  %v4753_v2 = vld [vmem:[%s6580_s2 + $0x3a0] sm:$0xff] }
 0x2e3   :  { %3019 = vmatpush.bf16.msra.mxu3 %v4748_v51  ;;  %3050 = vmatpush.bf16.msra.mxu0 %v4754_v23 }
 0x2e4   :  { %v1475_v7 = vmax.f32 %v1436_v35, %v1439_v55  ;;  %2153 = vmatmul.bf16.gmra.mxu1 %v6094_v54  ;;  %2182 = vmatmul.bf16.gmra.mxu3 %v6143_v46  ;;  %v4741_v55 = vld [vmem:[%s6580_s2 + $0x340] sm:$0xff] }
 0x2e5   :  { %2757 = vmatmul.bf16.vlgmr.msrb.gmra.mxu2 %v6015_v3  ;;  %v4740_v3 = vld [vmem:[%s6580_s2 + $0x338] sm:$0xff] }
 0x2e6   :  { %v1511_v58 = vmax.f32 %v1475_v7, 0.0  ;;  %2990 = vmatpush.bf16.msra.mxu1 %v4740_v3  ;;  %v4752_v7 = vld [vmem:[%s6580_s2 + $0x398] sm:$0xff]  ;;  %v4750_v3 = vld [vmem:[%s6580_s2 + $0x388] sm:$0xff] }
 0x2e7   :  { %v1884_v48 = vpop.f32.mrf.mxu3  ;;  %3020 = vmatpush.bf16.msra.mxu3 %v4747_v17  ;;  %3051 = vmatpush.bf16.msra.mxu0 %v4753_v2 }
 0x2e8   :  { %v1885_v25 = vadd.f32 %v1884_v48, %v1855_v39  ;;  %v2110_v33 = vpop.f32.mrf.mxu2  ;;  %v1535_v31 = vpack.c.bf16 %v1511_v58, %v1511_v58  ;;  %v6314_v44 = vpop.f32.mrf.mxu0 }
 0x2e9   :  { %v6298_v21 = vadd.f32 %v2110_v33, %v1909_v0  ;;  %v6340_v12 = vpop.f32.mrf.mxu1  ;;  %v4733_v0 = vld [vmem:[%s6580_s2 + $0x300] sm:$0xff] }
 0x2ea   :  { %v2839_v29 = vunpack.c.l.b16 %v1535_v31  ;;  %2991 = vmatpush.bf16.msra.mxu1 %v4739_v36 }
 0x2eb   :  { %3021 = vmatpush.bf16.msra.mxu3 %v4746_v60  ;;  %3052 = vmatpush.bf16.msra.mxu0 %v4752_v7 }
 0x2ec   :  { %v6303_v47 = vpack.c.b16 %v2839_v29, %v2540_v57  ;;  %v4735_v57 = vld [vmem:[%s6580_s2 + $0x310] sm:$0xff] }
 0x2ee   :  { %2410 = vmatmul.bf16.gmra.mxu0 %v6092_v49 }
 0x2ef   :  { %v6342_v52 = vpop.f32.mrf.mxu3  ;;  %3022 = vmatpush.bf16.msra.mxu3 %v4745_v20 }
 0x2f0   :  { %v6306_v43 = vpop.f32.mrf.mxu2 }
 0x2f3   :  { %3023 = vmatpush.bf16.msra.mxu3 %v4744_v26 }
 0x2f4   :  { %2458 = vmatmul.bf16.vlgmr.msrb.gmra.mxu1 %v5963_v38  ;;  %2699 = vmatmul.bf16.vlgmr.msrb.gmra.mxu3 %v5941_v9  ;;  %v4738_v9 = vld [vmem:[%s6580_s2 + $0x328] sm:$0xff] }
 0x2f5   :  { %2762 = vmatmul.bf16.gmra.mxu2 %v6100_v63  ;;  %2992 = vmatpush.bf16.msra.mxu1 %v4738_v9 }
 0x2f7   :  { %3024 = vmatpush.bf16.msra.mxu3 %v4743_v15 }
 0x2f8   :  { %v2115_v6 = vpop.f32.mrf.mxu2 }
 0x2f9   :  { %2993 = vmatpush.bf16.msra.mxu1 %v4737_v10 }
 0x2fb   :  { %v1913_v38 = vpop.f32.mrf.mxu0  ;;  %3025 = vmatpush.bf16.msra.mxu3 %v4742_v59 }
 0x2fc   :  { %v1914_v63 = vadd.f32 %v1913_v38, %v1885_v25 }
 0x2fd   :  { %2994 = vmatpush.bf16.msra.mxu1 %v4736_v24 }
 0x2fe   :  { %2415 = vmatmul.bf16.gmra.mxu0 %v6167_v14  ;;  %v6338_v11 = vadd.f32 %v2115_v6, %v1914_v63 }
 0x2ff   :  { %3026 = vmatpush.bf16.msra.mxu3 %v4741_v55 }
 0x300   :  { %v6347_v42 = vpop.f32.mrf.mxu2 }
 0x301   :  { %v1860_v34 = vpop.f32.mrf.mxu1  ;;  %2995 = vmatpush.bf16.msra.mxu1 %v4735_v57  ;;  %v1887_v57 = vadd.f32 %v6342_v52, %v6340_v12 }
 0x303   :  { %v1915_v58 = vpop.f32.mrf.mxu0 }
 0x304   :  { %2463 = vmatmul.bf16.gmra.mxu1 %v6079_v8  ;;  %2704 = vmatmul.bf16.gmra.mxu3 %v6044_v40  ;;  %v1916_v2 = vadd.f32 %v1915_v58, %v1887_v57 }
 0x305   :  { %2767 = vmatmul.bf16.gmra.mxu2 %v6199_v5  ;;  %v4734_v5 = vld [vmem:[%s6580_s2 + $0x308] sm:$0xff] }
 0x306   :  { %2996 = vmatpush.bf16.msra.mxu1 %v4734_v5  ;;  %v2118_v59 = vadd.f32 %v6347_v42, %v1916_v2 }
 0x307   :  { %v1889_v35 = vpop.f32.mrf.mxu3 }
 0x308   :  { %v1890_v28 = vadd.f32 %v1889_v35, %v1860_v34  ;;  %v2120_v40 = vpop.f32.mrf.mxu2 }
 0x309   :  { %v1862_v48 = vpop.f32.mrf.mxu1 }
 0x30a   :  { %2997 = vmatpush.bf16.msra.mxu1 %v4733_v0 }
 0x30e   :  { %2728 = vmatmul.bf16.vlgmr.msrb.gmra.mxu0 %v5943_v22  ;;  %v4751_v22 = vld [vmem:[%s6580_s2 + $0x390] sm:$0xff]  ;;  %s4830_s2 = smov 64  }
 0x30f   :  { %3053 = vmatpush.bf16.msra.mxu0 %v4751_v22  ;;  %v1891_v31 = vpop.f32.mrf.mxu3 }
 0x310   :  { %v6383_v39 = vpop.f32.mrf.mxu2  ;;  %v1892_v22 = vadd.f32 %v1891_v31, %v1862_v48 }
 0x313   :  { %3054 = vmatpush.bf16.msra.mxu0 %v4750_v3 }
 0x314   :  { %2468 = vmatmul.bf16.gmra.mxu1 %v6143_v46  ;;  %2709 = vmatmul.bf16.gmra.mxu3 %v6115_v45 }
 0x315   :  { %2772 = vmatmul.bf16.gmra.mxu2 %v6278_v30 }
 0x317   :  { %3055 = vmatpush.bf16.msra.mxu0 %v4749_v27 }
 0x318   :  { %v2125_v53 = vpop.f32.mrf.mxu2 }
 0x31b   :  { %v1918_v25 = vpop.f32.mrf.mxu0 }
 0x31c   :  { %v1919_v33 = vadd.f32 %v1918_v25, %v1890_v28 }
 0x31e   :  { %2733 = vmatmul.bf16.gmra.mxu0 %v6048_v41  ;;  %v2121_v51 = vadd.f32 %v2120_v40, %v1919_v33 }
 0x320   :  { %v2127_v30 = vpop.f32.mrf.mxu2 }
 0x321   :  { %v1865_v45 = vpop.f32.mrf.mxu1 }
 0x323   :  { %v1920_v9 = vpop.f32.mrf.mxu0 }
 0x324   :  { %2473 = vmatmul.bf16.gmra.mxu1 %v6253_v50  ;;  %2714 = vmatmul.bf16.gmra.mxu3 %v6221_v61  ;;  %v1921_v12 = vadd.f32 %v1920_v9, %v1892_v22 }
 0x326   :  { %v2123_v42 = vadd.f32 %v6383_v39, %v1921_v12 }
 0x327   :  { %v1894_v29 = vpop.f32.mrf.mxu3 }
 0x328   :  { %v1895_v17 = vadd.f32 %v1894_v29, %v1865_v45  ;;  %v2430_v19 = vpop.f32.mrf.mxu2 }
 0x329   :  { %v1867_v41 = vpop.f32.mrf.mxu1 }
 0x32e   :  { %2738 = vmatmul.bf16.gmra.mxu0 %v6117_v56 }
 0x32f   :  { %v1896_v36 = vpop.f32.mrf.mxu3 }
 0x330   :  { %v1897_v60 = vadd.f32 %v1896_v36, %v1867_v41  ;;  %v6408_v23 = vpop.f32.mrf.mxu2 }
 0x331   :  { %v2139_v6 = vpop.f32.mrf.mxu1 }
 0x332   :  { %v2140_v38 = vadd.f32 %v2139_v6, %v6298_v21 }
 0x334   :  { %2998 = vmatmul.bf16.vlgmr.msra.gmra.mxu1 %v5985_v32  ;;  %3027 = vmatmul.bf16.vlgmr.msra.gmra.mxu3 %v5989_v13 }
 0x337   :  { %v2168_v61 = vpop.f32.mrf.mxu3 }
 0x338   :  { %v6404_v63 = vadd.f32 %v2168_v61, %v2140_v38  ;;  %v2435_v13 = vpop.f32.mrf.mxu2 }
 0x339   :  { %v6406_v20 = vpop.f32.mrf.mxu1 }
 0x33b   :  { %v1923_v10 = vpop.f32.mrf.mxu0 }
 0x33c   :  { %v1924_v56 = vadd.f32 %v1923_v10, %v1895_v17 }
 0x33e   :  { %2743 = vmatmul.bf16.gmra.mxu0 %v6225_v62  ;;  %v2126_v24 = vadd.f32 %v2125_v53, %v1924_v56 }
 0x33f   :  { %v6411_v26 = vpop.f32.mrf.mxu3 }
 0x340   :  { %v2437_v55 = vpop.f32.mrf.mxu2 }
 0x341   :  { %v2144_v21 = vpop.f32.mrf.mxu1 }
 0x342   :  { %v2145_v34 = vadd.f32 %v2144_v21, %v6338_v11 }
 0x343   :  { %v1925_v32 = vpop.f32.mrf.mxu0 }
 0x344   :  { %v1926_v35 = vadd.f32 %v1925_v32, %v1897_v60  ;;  %3003 = vmatmul.bf16.gmra.mxu1 %v6092_v49  ;;  %3032 = vmatmul.bf16.gmra.mxu3 %v6094_v54 }
 0x346   :  { %v2128_v15 = vadd.f32 %v2127_v30, %v1926_v35 }
 0x347   :  { %v2173_v28 = vpop.f32.mrf.mxu3 }
 0x348   :  { %v2174_v62 = vadd.f32 %v2173_v28, %v2145_v34  ;;  %v2440_v53 = vpop.f32.mrf.mxu2 }
 0x349   :  { %v2146_v40 = vpop.f32.mrf.mxu1 }
 0x34a   :  { %v2147_v11 = vadd.f32 %v2146_v40, %v2118_v59 }
 0x34b   :  { %v2401_v5 = vpop.f32.mrf.mxu0 }
 0x34c   :  { %v2431_v0 = vadd.f32 %v2430_v19, %v2401_v5 }
 0x34e   :  { %3056 = vmatmul.bf16.vlgmr.msra.gmra.mxu0 %v6079_v8 }
 0x34f   :  { %v2175_v49 = vpop.f32.mrf.mxu3 }
 0x350   :  { %v2176_v7 = vadd.f32 %v2175_v49, %v2147_v11  ;;  %v2442_v17 = vpop.f32.mrf.mxu2 }
 0x351   :  { %v2149_v54 = vpop.f32.mrf.mxu1 }
 0x352   :  { %v2150_v25 = vadd.f32 %v2149_v54, %v2121_v51 }
 0x353   :  { %v6420_v33 = vpop.f32.mrf.mxu0 }
 0x354   :  { %3008 = vmatmul.bf16.gmra.mxu1 %v6167_v14  ;;  %3037 = vmatmul.bf16.gmra.mxu3 %v6165_v37 }
 0x357   :  { %v2178_v52 = vpop.f32.mrf.mxu3 }
 0x358   :  { %v2179_v58 = vadd.f32 %v2178_v52, %v2150_v25  ;;  %v2445_v19 = vpop.f32.mrf.mxu2 }
 0x359   :  { %v2151_v3 = vpop.f32.mrf.mxu1 }
 0x35a   :  { %v2152_v8 = vadd.f32 %v2151_v3, %v2123_v42 }
 0x35b   :  { %v2406_v45 = vpop.f32.mrf.mxu0 }
 0x35c   :  { %v2436_v30 = vadd.f32 %v2435_v13, %v2406_v45 }
 0x35e   :  { %3061 = vmatmul.bf16.gmra.mxu0 %v6143_v46 }
 0x35f   :  { %v2180_v48 = vpop.f32.mrf.mxu3 }
 0x360   :  { %v2181_v51 = vadd.f32 %v2180_v48, %v2152_v8  ;;  %v2447_v56 = vpop.f32.mrf.mxu2 }
 0x361   :  { %v2154_v31 = vpop.f32.mrf.mxu1 }
 0x362   :  { %v2155_v29 = vadd.f32 %v2154_v31, %v2126_v24 }
 0x363   :  { %v2408_v27 = vpop.f32.mrf.mxu0 }
 0x364   :  { %3013 = vmatmul.bf16.gmra.mxu1 %v6267_v4  ;;  %3042 = vmatmul.bf16.gmra.mxu3 %v6269_v1  ;;  %v2438_v28 = vadd.f32 %v2437_v55, %v2408_v27 }
 0x367   :  { %v2183_v37 = vpop.f32.mrf.mxu3 }
 0x368   :  { %v2184_v14 = vadd.f32 %v2183_v37, %v2155_v29  ;;  %v2758_v32 = vpop.f32.mrf.mxu2 }
 0x369   :  { %v2156_v39 = vpop.f32.mrf.mxu1 }
 0x36a   :  { %v2157_v41 = vadd.f32 %v2156_v39, %v2128_v15 }
 0x36b   :  { %v2411_v36 = vpop.f32.mrf.mxu0 }
 0x36c   :  { %v2441_v60 = vadd.f32 %v2440_v53, %v2411_v36 }
 0x36e   :  { %3066 = vmatmul.bf16.gmra.mxu0 %v6253_v50 }
 0x36f   :  { %v2185_v46 = vpop.f32.mrf.mxu3 }
 0x370   :  { %v2186_v6 = vadd.f32 %v2185_v46, %v2157_v41 }
 0x371   :  { %v2459_v38 = vpop.f32.mrf.mxu1 }
 0x372   :  { %v2460_v9 = vadd.f32 %v2459_v38, %v2431_v0 }
 0x373   :  { %v2413_v61 = vpop.f32.mrf.mxu0 }
 0x374   :  { %v2479_v10 = vadd.f32 %v2460_v9, %v6404_v63  ;;  %v2760_v63 = vpop.f32.mrf.mxu2  ;;  %v2443_v42 = vadd.f32 %v2442_v17, %v2413_v61 }
 0x377   :  { %v2700_v4 = vpop.f32.mrf.mxu3 }
 0x379   :  { %v6430_v24 = vpop.f32.mrf.mxu1 }
 0x37b   :  { %v2416_v1 = vpop.f32.mrf.mxu0 }
 0x37c   :  { %v2446_v21 = vadd.f32 %v2445_v19, %v2416_v1  ;;  %v2763_v52 = vpop.f32.mrf.mxu2 }
 0x37e   :  { %3071 = vmatmul.bf16.gmra.mxu0 %v6303_v47 }
 0x37f   :  { %v6433_v34 = vpop.f32.mrf.mxu3 }
 0x381   :  { %v2464_v35 = vpop.f32.mrf.mxu1 }
 0x382   :  { %v2465_v50 = vadd.f32 %v2464_v35, %v2436_v30 }
 0x383   :  { %v2418_v13 = vpop.f32.mrf.mxu0 }
 0x384   :  { %v2481_v57 = vadd.f32 %v2465_v50, %v2174_v62  ;;  %v2765_v30 = vpop.f32.mrf.mxu2  ;;  %v2448_v41 = vadd.f32 %v2447_v56, %v2418_v13 }
 0x387   :  { %v2705_v15 = vpop.f32.mrf.mxu3 }
 0x389   :  { %v2466_v2 = vpop.f32.mrf.mxu1 }
 0x38a   :  { %v2467_v40 = vadd.f32 %v2466_v2, %v2438_v28 }
 0x38b   :  { %v2729_v5 = vpop.f32.mrf.mxu0 }
 0x38c   :  { %v6435_v59 = vadd.f32 %v2467_v40, %v2176_v7  ;;  %v2730_v0 = vadd.f32 %v2729_v5, %v2700_v4  ;;  %v2768_v36 = vpop.f32.mrf.mxu2  ;;  %v2433_v5 = vadd.f32 %v6408_v23, %v6420_v33 }
 0x38e   :  { %v2759_v11 = vadd.f32 %v2758_v32, %v2730_v0 }
 0x38f   :  { %v6437_v49 = vpop.f32.mrf.mxu3 }
 0x390   :  { %v6439_v47 = vadd.f32 %v2759_v11, %v2479_v10 }
 0x391   :  { %v2469_v54 = vpop.f32.mrf.mxu1 }
 0x392   :  { %v2470_v22 = vadd.f32 %v2469_v54, %v2441_v60 }
 0x393   :  { %v2731_v25 = vpop.f32.mrf.mxu0 }
 0x394   :  { %v2483_v12 = vadd.f32 %v2470_v22, %v2179_v58  ;;  %v2770_v10 = vpop.f32.mrf.mxu2  ;;  %v2732_v0 = vadd.f32 %v2731_v25, %v6433_v34  ;;  %v2462_v22 = vadd.f32 %v6430_v24, %v2433_v5 }
 0x397   :  { %v2710_v62 = vpop.f32.mrf.mxu3 }
 0x399   :  { %v2471_v55 = vpop.f32.mrf.mxu1 }
 0x39a   :  { %v2472_v53 = vadd.f32 %v2471_v55, %v2443_v42 }
 0x39b   :  { %v2734_v3 = vpop.f32.mrf.mxu0 }
 0x39c   :  { %v6441_v8 = vadd.f32 %v2472_v53, %v2181_v51  ;;  %v2735_v7 = vadd.f32 %v2734_v3, %v2705_v15  ;;  %v2773_v35 = vpop.f32.mrf.mxu2  ;;  %v1882_v15 = vadd.f32 %v6286_v18, %v6280_v16 }
 0x39e   :  { %v2764_v45 = vadd.f32 %v2763_v52, %v2735_v7  ;;  %v1911_v28 = vadd.f32 %v6314_v44, %v1882_v15 }
 0x39f   :  { %v6443_v48 = vpop.f32.mrf.mxu3 }
 0x3a0   :  { %v6445_v31 = vadd.f32 %v2764_v45, %v2481_v57  ;;  %v2113_v40 = vadd.f32 %v6306_v43, %v1911_v28 }
 0x3a1   :  { %v2474_v29 = vpop.f32.mrf.mxu1 }
 0x3a2   :  { %v2475_v27 = vadd.f32 %v2474_v29, %v2446_v21  ;;  %v2142_v54 = vadd.f32 %v6406_v20, %v2113_v40 }
 0x3a3   :  { %v2736_v37 = vpop.f32.mrf.mxu0 }
 0x3a4   :  { %v2485_v39 = vadd.f32 %v2475_v27, %v2184_v14  ;;  %v2171_v52 = vadd.f32 %v6411_v26, %v2142_v54 }
 0x3a6   :  { %v2480_v18 = vadd.f32 %v2462_v22, %v2171_v52 }
 0x3a7   :  { %v2715_v58 = vpop.f32.mrf.mxu3 }
 0x3a9   :  { %v2476_v17 = vpop.f32.mrf.mxu1 }
 0x3aa   :  { %v2477_v60 = vadd.f32 %v2476_v17, %v2448_v41 }
 0x3ab   :  { %v2739_v19 = vpop.f32.mrf.mxu0 }
 0x3ac   :  { %v6447_v46 = vadd.f32 %v2477_v60, %v2186_v6  ;;  %v2740_v51 = vadd.f32 %v2739_v19, %v2710_v62  ;;  %v2761_v62 = vadd.f32 %v2760_v63, %v2732_v0  ;;  %v2737_v63 = vadd.f32 %v2736_v37, %v6437_v49 }
 0x3ae   :  { %v2769_v38 = vadd.f32 %v2768_v36, %v2740_v51  ;;  %v2779_v43 = vadd.f32 %v2761_v62, %v2480_v18  ;;  %v2766_v25 = vadd.f32 %v2765_v30, %v2737_v63  ;;  %v4764_v18 = vld [vmem:[%s6581_s3 + $0x38] sm:$0xff] }
 0x3af   :  { %v6449_v9 = vpop.f32.mrf.mxu3  ;;  %3276 = vmatpush.bf16.msra.mxu2 %v4764_v18 }
 0x3b0   :  { %v6451_v61 = vadd.f32 %v2769_v38, %v2483_v12 }
 0x3b1   :  { %v2999_v21 = vpop.f32.mrf.mxu1 }
 0x3b3   :  { %v2741_v4 = vpop.f32.mrf.mxu0 }
 0x3b4   :  { %v2742_v49 = vadd.f32 %v2741_v4, %v6443_v48  ;;  %v2775_v4 = vpop.f32.mrf.mxu2 }
 0x3b6   :  { %v2771_v37 = vadd.f32 %v2770_v10, %v2742_v49 }
 0x3b7   :  { %v3028_v1 = vpop.f32.mrf.mxu3 }
 0x3b8   :  { %v3029_v16 = vadd.f32 %v3028_v1, %v2999_v21 }
 0x3b9   :  { %v3001_v6 = vpop.f32.mrf.mxu1 }
 0x3bb   :  { %v2744_v32 = vpop.f32.mrf.mxu0 }
 0x3bc   :  { %v2745_v14 = vadd.f32 %v2744_v32, %v2715_v58  ;;  %v2783_v32 = vadd.f32 %v2771_v37, %v6441_v8  ;;  %v4774_v37 = vld [vmem:[%s6583_s5 + $0x8] sm:$0xff] }
 0x3be   :  { %v2774_v56 = vadd.f32 %v2773_v35, %v2745_v14 }
 0x3bf   :  { %v3030_v13 = vpop.f32.mrf.mxu3 }
 0x3c0   :  { %v6453_v50 = vadd.f32 %v2774_v56, %v2485_v39  ;;  %v3031_v44 = vadd.f32 %v3030_v13, %v3001_v6  ;;  %v2781_v39 = vadd.f32 %v2766_v25, %v6435_v59 }
 0x3c1   :  { %v3004_v12 = vpop.f32.mrf.mxu1 }
 0x3c3   :  { %v2746_v57 = vpop.f32.mrf.mxu0 }
 0x3c4   :  { %v2747_v10 = vadd.f32 %v2746_v57, %v6449_v9 }
 0x3c6   :  { %v2776_v15 = vadd.f32 %v2775_v4, %v2747_v10 }
 0x3c7   :  { %v3033_v11 = vpop.f32.mrf.mxu3 }
 0x3c8   :  { %v3034_v3 = vadd.f32 %v3033_v11, %v3004_v12  ;;  %v2785_v5 = vadd.f32 %v2776_v15, %v6447_v46  ;;  %v4763_v46 = vld [vmem:[%s6581_s3 + $0x30] sm:$0xff]  ;;  %v4773_v15 = vld [vmem:[%s6583_s5] sm:$0xff] }
 0x3c9   :  { %v3006_v24 = vpop.f32.mrf.mxu1  ;;  %3277 = vmatpush.bf16.msra.mxu2 %v4763_v46 }
 0x3cb   :  { %v3057_v2 = vpop.f32.mrf.mxu0 }
 0x3cc   :  { %v3058_v42 = vadd.f32 %v3057_v2, %v3029_v16 }
 0x3ce   :  { %v6466_v23 = vadd.f32 %v3058_v42, %v6439_v47  ;;  %v4760_v42 = vld [vmem:[%s6581_s3 + $0x18] sm:$0xff] }
 0x3cf   :  { %v3035_v34 = vpop.f32.mrf.mxu3 }
 0x3d0   :  { %v3036_v45 = vadd.f32 %v3035_v34, %v3006_v24  ;;  %v4757_v24 = vld [vmem:[%s6581_s3] sm:$0xff] }
 0x3d1   :  { %v3009_v47 = vpop.f32.mrf.mxu1 }
 0x3d3   :  { %v3059_v55 = vpop.f32.mrf.mxu0 }
 0x3d4   :  { %v3060_v53 = vadd.f32 %v3059_v55, %v3031_v44  ;;  %v4761_v44 = vld [vmem:[%s6581_s3 + $0x20] sm:$0xff]  ;;  %v4759_v55 = vld [vmem:[%s6581_s3 + $0x10] sm:$0xff] }
 0x3d6   :  { %v6468_v33 = vadd.f32 %v3060_v53, %v2779_v43  ;;  %v4758_v43 = vld [vmem:[%s6581_s3 + $0x8] sm:$0xff] }
 0x3d7   :  { %v3038_v7 = vpop.f32.mrf.mxu3 }
 0x3d8   :  { %v4791_v20 = vpack.i.bf16 %v6468_v33, %v6466_v23  ;;  %v3039_v51 = vadd.f32 %v3038_v7, %v3009_v47  ;;  %v4771_v7 = vld [vmem:[%s6581_s3 + $0x70] sm:$0xff]  ;;  %v4768_v47 = vld [vmem:[%s6581_s3 + $0x58] sm:$0xff] }
 0x3d9   :  { %v3011_v30 = vpop.f32.mrf.mxu1 }
 0x3da   :  { %4792 = vrot.lane.b32.xlu1 %v4791_v20, %s4830_s2 }
 0x3db   :  { %v3062_v26 = vpop.f32.mrf.mxu0 }
 0x3dc   :  { %v3063_v29 = vadd.f32 %v3062_v26, %v3034_v3  ;;  %v4772_v26 = vld [vmem:[%s6581_s3 + $0x78] sm:$0xff] }
 0x3de   :  { %v3079_v41 = vadd.f32 %v3063_v29, %v6445_v31  ;;  %v4769_v29 = vld [vmem:[%s6581_s3 + $0x60] sm:$0xff] }
 0x3df   :  { %v3040_v60 = vpop.f32.mrf.mxu3 }
 0x3e0   :  { %v3041_v38 = vadd.f32 %v3040_v60, %v3011_v30 }
 0x3e1   :  { %v3014_v56 = vpop.f32.mrf.mxu1 }
 0x3e3   :  { %v3064_v27 = vpop.f32.mrf.mxu0 }
 0x3e4   :  { %v3065_v58 = vadd.f32 %v3064_v27, %v3036_v45  ;;  %v4770_v45 = vld [vmem:[%s6581_s3 + $0x68] sm:$0xff]  ;;  %v4767_v27 = vld [vmem:[%s6581_s3 + $0x50] sm:$0xff] }
 0x3e6   :  { %v3080_v36 = vadd.f32 %v3065_v58, %v2781_v39  ;;  %v4766_v39 = vld [vmem:[%s6581_s3 + $0x48] sm:$0xff]  ;;  %v4765_v58 = vld [vmem:[%s6581_s3 + $0x40] sm:$0xff] }
 0x3e7   :  { %v3043_v14 = vpop.f32.mrf.mxu3 }
 0x3e8   :  { %v4781_v17 = vpack.i.bf16 %v3080_v36, %v3079_v41  ;;  %v3044_v8 = vadd.f32 %v3043_v14, %v3014_v56 }
 0x3e9   :  { %v3016_v28 = vpop.f32.mrf.mxu1 }
 0x3ea   :  { %4782 = vrot.lane.b32.xlu0 %v4781_v17, %s4830_s2 }
 0x3eb   :  { %v3067_v19 = vpop.f32.mrf.mxu0 }
 0x3ec   :  { %v3068_v1 = vadd.f32 %v3067_v19, %v3039_v51  ;;  %v4775_v19 = vld [vmem:[%s6583_s5 + $0x10] sm:$0xff] }
 0x3ee   :  { %v6480_v31 = vadd.f32 %v3068_v1, %v6451_v61 }
 0x3ef   :  { %v3045_v6 = vpop.f32.mrf.mxu3 }
 0x3f0   :  { %v3046_v2 = vadd.f32 %v3045_v6, %v3016_v28 }
 0x3f3   :  { %v3069_v21 = vpop.f32.mrf.mxu0 }
 0x3f4   :  { %v3070_v59 = vadd.f32 %v3069_v21, %v3041_v38 }
 0x3f6   :  { %v6482_v35 = vadd.f32 %v3070_v59, %v2783_v32 }
 0x3f8   :  { %v4796_v13 = vpack.i.bf16 %v6482_v35, %v6480_v31 }
 0x3fa   :  { %4797 = vrot.lane.b32.xlu2 %v4796_v13, %s4830_s2 }
 0x3fb   :  { %v3072_v48 = vpop.f32.mrf.mxu0 }
 0x3fc   :  { %v3073_v40 = vadd.f32 %v3072_v48, %v3044_v8  ;;  %v4778_v8 = vld [vmem:[%s6585_s7 + $0x8] sm:$0xff] }
 0x3fd   :  { %3388 = vmatpush.bf16.msrb.mxu3 %v4778_v8 }
 0x3fe   :  { %v3083_v11 = vadd.f32 %v3073_v40, %v6453_v50  ;;  %v4762_v50 = vld [vmem:[%s6581_s3 + $0x28] sm:$0xff] }
 0x3ff   :  { %3278 = vmatpush.bf16.msra.mxu2 %v4762_v50 }
 0x403   :  { %v3074_v61 = vpop.f32.mrf.mxu0  ;;  %3279 = vmatpush.bf16.msra.mxu2 %v4761_v44 }
 0x404   :  { %v3075_v0 = vadd.f32 %v3074_v61, %v3046_v2  ;;  %v4801_v2 = vld [vmem:[%s6582_s4] ss:$0 sm:$0xff] }
 0x406   :  { %v3084_v54 = vadd.f32 %v3075_v0, %v2785_v5 }
 0x407   :  { %3280 = vmatpush.bf16.msra.mxu2 %v4760_v42 }
 0x408   :  { %v4786_v22 = vpack.i.bf16 %v3084_v54, %v3083_v11 }
 0x40a   :  { %4787 = vrot.lane.b32.xlu0 %v4786_v22, %s4830_s2  ;;  %v4802_v22 = vld [vmem:[%s6584_s6] ss:$0 sm:$0xff] }
 0x40b   :  { %3281 = vmatpush.bf16.msra.mxu2 %v4759_v55 }
 0x40f   :  { %3282 = vmatpush.bf16.msra.mxu2 %v4758_v43 }
 0x413   :  { %3283 = vmatpush.bf16.msra.mxu2 %v4757_v24 }
 0x417   :  { %3289 = vmatpush.bf16.msrb.mxu2 %v4772_v26 }
 0x41b   :  { %3290 = vmatpush.bf16.msrb.mxu2 %v4771_v7 }
 0x41f   :  { %3291 = vmatpush.bf16.msrb.mxu2 %v4770_v45 }
 0x423   :  { %3292 = vmatpush.bf16.msrb.mxu2 %v4769_v29 }
 0x427   :  { %3293 = vmatpush.bf16.msrb.mxu2 %v4768_v47 }
 0x42b   :  { %3294 = vmatpush.bf16.msrb.mxu2 %v4767_v27 }
 0x42f   :  { %3295 = vmatpush.bf16.msrb.mxu2 %v4766_v39 }
 0x433   :  { %3296 = vmatpush.bf16.msrb.mxu2 %v4765_v58 }
 0x454   :  { %v4798_v38 = vpop.permute.xlu2 %4797 }
 0x455   :  { %v4800_v59 = vunpack.i.h.bf16 %v4798_v38  ;;  %v4799_v14 = vunpack.i.l.bf16 %v4798_v38 }
 0x45c   :  { %v4783_v12 = vpop.permute.xlu0 %4782 }
 0x45d   :  { %v4785_v52 = vunpack.i.h.bf16 %v4783_v12  ;;  %v4784_v9 = vunpack.i.l.bf16 %v4783_v12 }
 0x45f   :  { %v3120_v57 = vmax.f32 %v3080_v36, %v4785_v52  ;;  %v3119_v62 = vmax.f32 %v3079_v41, %v4784_v9  ;;  %v4793_v41 = vpop.permute.xlu1 %4792  ;;  %v4776_v36 = vld [vmem:[%s6583_s5 + $0x18] sm:$0xff] }
 0x460   :  { %v4795_v17 = vunpack.i.h.bf16 %v4793_v41  ;;  %v4794_v60 = vunpack.i.l.bf16 %v4793_v41  ;;  %3347 = vmatpush.bf16.msrb.mxu1 %v4776_v36 }
 0x461   :  { %v3126_v16 = vmax.f32 %v3119_v62, %v3120_v57 }
 0x462   :  { %v3118_v49 = vmax.f32 %v6468_v33, %v4795_v17  ;;  %v3117_v30 = vmax.f32 %v6466_v23, %v4794_v60  ;;  %v3122_v33 = vmax.f32 %v6482_v35, %v4800_v59  ;;  %v3121_v23 = vmax.f32 %v6480_v31, %v4799_v14  ;;  %v4777_v31 = vld [vmem:[%s6585_s7] sm:$0xff] }
 0x463   :  { %3130 = vrot.lane.b32.xlu1 %v3126_v16, %s4830_s2  ;;  %3389 = vmatpush.bf16.msrb.mxu3 %v4777_v31  ;;  %v4803_v16 = vld [vmem:[%s6586_s8] ss:$0 sm:$0xff] }
 0x464   :  { %3348 = vmatpush.bf16.msrb.mxu1 %v4775_v19  ;;  %v3125_v51 = vmax.f32 %v3117_v30, %v3118_v49  ;;  %v3127_v48 = vmax.f32 %v3121_v23, %v3122_v33 }
 0x468   :  { %3349 = vmatpush.bf16.msrb.mxu1 %v4774_v37 }
 0x46c   :  { %3350 = vmatpush.bf16.msrb.mxu1 %v4773_v15 }
 0x47c   :  { %v4788_v53 = vpop.permute.xlu0 %4787 }
 0x47d   :  { %v4790_v34 = vunpack.i.h.bf16 %v4788_v53  ;;  %v4789_v20 = vunpack.i.l.bf16 %v4788_v53 }
 0x47f   :  { %v3124_v63 = vmax.f32 %v3084_v54, %v4790_v34  ;;  %v3123_v25 = vmax.f32 %v3083_v11, %v4789_v20 }
 0x481   :  { %v3128_v3 = vmax.f32 %v3123_v25, %v3124_v63 }
 0x483   :  { %3134 = vrot.lane.b32.xlu2 %v3128_v3, %s4830_s2 }
 0x4d5   :  { %v3131_v1 = vpop.permute.xlu1 %3130 }
 0x4d6   :  { %v3138_v21 = vsel %vm3137_vm2, %v3125_v51, %v3131_v1 }
 0x4d7   :  { %v3140_v32 = vmax.f32 %v3138_v21, 0.0 }
 0x4d9   :  { %v3142_v56 = vpack.c.bf16 %v3140_v32, %v3140_v32 }
 0x4db   :  { %3284 = vmatmul.bf16.vlgmr.msra.gmra.mxu2 %v3142_v56 }
 0x4dd   :  { %v3135_v13 = vpop.permute.xlu2 %3134 }
 0x4de   :  { %v3139_v10 = vsel %vm3137_vm2, %v3127_v48, %v3135_v13 }
 0x4df   :  { %v3141_v4 = vmax.f32 %v3139_v10, 0.0 }
 0x4e1   :  { %v3143_v6 = vpack.c.bf16 %v3141_v4, %v3141_v4 }
 0x4eb   :  { %3297 = vmatmul.bf16.vlgmr.msrb.gmra.mxu2 %v3143_v6 }
 0x55e   :  { %v3285_v35 = vpop.f32.mrf.mxu2 }
 0x55f   :  { %v3286_v40 = vadd.f32 %v4801_v2, %v3285_v35 }
 0x566   :  { %v3287_v28 = vpop.f32.mrf.mxu2 }
 0x56e   :  { %v3298_v61 = vpop.f32.mrf.mxu2 }
 0x56f   :  { %v3299_v5 = vadd.f32 %v3298_v61, %v3286_v40 }
 0x571   :  { %v3302_v0 = vmax.f32 %v3299_v5, 0.0 }
 0x573   :  { %v3303_v11 = vpack.c.bf16 %v3302_v0, %v3302_v0 }
 0x575   :  { %4549 = vmatmul.msk.bf16.vlgmr.msrb.gmra.mxu1 %vm3137_vm2, %v3303_v11 }
 0x576   :  { %v3300_v54 = vpop.f32.mrf.mxu2 }
 0x5f2   :  { %v3352_v12 = vpop.f32.mrf.mxu1 }
 0x5f3   :  { %v3353_v52 = vadd.f32 %v4802_v22, %v3352_v12 }
 0x5f5   :  { %v3356_v9 = vmax.f32 %v3353_v52, 0.0 }
 0x5f7   :  { %v3357_v57 = vpack.c.bf16 %v3356_v9, %v3356_v9 }
 0x5f9   :  { %4558 = vmatmul.msk.bf16.vlgmr.msrb.gmra.mxu3 %vm3378_vm3, %v3357_v57 }
 0x5fa   :  { %v3354_v62 = vpop.f32.mrf.mxu1 }
 0x67c   :  { %v3391_v18 = vpop.f32.mrf.mxu3 }
 0x67d   :  { %v3392_v46 = vadd.f32 %v4803_v16, %v3391_v18 }
 0x67f   :  { %3396 = vst.msk [vmem:[#allocation2] sm:$0xff] %vm3395_vm4, %v3392_v46 }
 0x680   :  { %3407 = dma.vmem_to_hbm [thread:$0]  %s3403_s12, 128, %s3405_s14, [#allocation3]  }
 0x684   :  { %v3393_v50 = vpop.f32.mrf.mxu3 }
 0x685   :  { %4828 = dma.done.wait [#allocation3], 128  }
 0x686   :  { %4829 = vsyncadd [#allocation3], 4294967168 }
 0x687   :  { %3412 = vsyncpa [#allocation3], 1 }

</bundles_post_ra>
